<compile_context>
chip_gen: v5e
topology: v5e:2x2
jax: 0.10.0
libtpu: 0.0.40
codegen_flags: <defaults>
</compile_context>

<pallas_src>
import jax
import jax.numpy as jnp
from jax.experimental import pallas as pl
from jax.experimental.pallas import tpu as pltpu


LANE = 128


def _round_up(x, m):
    return (x + m - 1) // m * m


def _pad_to(arr, shape):
    pads = [(0, s - d) for d, s in zip(arr.shape, shape)]
    if all(p == (0, 0) for p in pads):
        return arr
    return jnp.pad(arr, pads)


def _mlp_kernel(x_ref,
                w1_ref, b1_ref,
                w2_ref, b2_ref,
                w3_ref, b3_ref,
                w4_ref, b4_ref,
                pose_ref, hid_ref):
    """Fused 4-layer MLP: 3x (matmul + bias + relu) + final matmul + bias.

    Matmuls run with low-precision operands (bf16 by default) and f32
    accumulation; bias/ReLU elementwise work stays in f32.
    """
    cdt = w1_ref.dtype  # compute dtype of the MXU operands

    x = x_ref[...]  # already in compute dtype, no redundant cast

    h1 = jnp.dot(x, w1_ref[...], preferred_element_type=jnp.float32)
    h1 = jnp.maximum(h1 + b1_ref[...], 0.0)

    h2 = jnp.dot(h1.astype(cdt), w2_ref[...], preferred_element_type=jnp.float32)
    h2 = jnp.maximum(h2 + b2_ref[...], 0.0)

    h3 = jnp.dot(h2.astype(cdt), w3_ref[...], preferred_element_type=jnp.float32)
    h3 = jnp.maximum(h3 + b3_ref[...], 0.0)

    pose = jnp.dot(h3.astype(cdt), w4_ref[...], preferred_element_type=jnp.float32)
    pose = pose + b4_ref[...]

    pose_ref[...] = pose.astype(pose_ref.dtype)
    hid_ref[...] = h3.astype(hid_ref.dtype)


def contact_slamer_forward(contact, params, *, batch_tile=256,
                           compute_dtype=jnp.bfloat16):
    """Run the ContactSLAMer MLP.

    contact: (B, contact_size) float32
    params:  dict with w1..w4 stored as (in, out) and b1..b4 as (1, out)
    returns: (output_pose (B, P) f32, hidden (B, 64) f32)
    """
    B, C = contact.shape
    H1 = params["w1"].shape[1]
    H2 = params["w2"].shape[1]
    H3 = params["w3"].shape[1]
    P = params["w4"].shape[1]

    # Lane-pad every feature dimension to a multiple of 128.
    Cp = _round_up(C, LANE)
    H1p = _round_up(H1, LANE)
    H2p = _round_up(H2, LANE)
    H3p = _round_up(H3, LANE)
    Pp = _round_up(P, LANE)

    # Batch tile: capped (default 256, safe on v5e/v6e/v7x VMEM budgets) and
    # rounded to the sublane packing of the compute dtype.
    sub = 16 if compute_dtype == jnp.bfloat16 else 8
    batch_tile = min(batch_tile, _round_up(B, sub))
    batch_tile = max(sub, _round_up(batch_tile, sub))
    Bp = _round_up(B, batch_tile)

    # Pad + cast operands (zero padding is mathematically inert).
    x = _pad_to(contact, (Bp, Cp)).astype(compute_dtype)
    w1 = _pad_to(params["w1"], (Cp, H1p)).astype(compute_dtype)
    w2 = _pad_to(params["w2"], (H1p, H2p)).astype(compute_dtype)
    w3 = _pad_to(params["w3"], (H2p, H3p)).astype(compute_dtype)
    w4 = _pad_to(params["w4"], (H3p, Pp)).astype(compute_dtype)
    b1 = _pad_to(params["b1"], (1, H1p)).astype(jnp.float32)
    b2 = _pad_to(params["b2"], (1, H2p)).astype(jnp.float32)
    b3 = _pad_to(params["b3"], (1, H3p)).astype(jnp.float32)
    b4 = _pad_to(params["b4"], (1, Pp)).astype(jnp.float32)

    full = lambda shape: pl.BlockSpec(shape, lambda i: (0, 0))

    grid_spec = pltpu.PrefetchScalarGridSpec(
        num_scalar_prefetch=0,
        grid=(Bp // batch_tile,),
        in_specs=[
            pl.BlockSpec((batch_tile, Cp), lambda i: (i, 0)),   # contact tile
            full((Cp, H1p)),  full((1, H1p)),
            full((H1p, H2p)), full((1, H2p)),
            full((H2p, H3p)), full((1, H3p)),
            full((H3p, Pp)),  full((1, Pp)),
        ],
        out_specs=[
            pl.BlockSpec((batch_tile, Pp), lambda i: (i, 0)),    # lane-dense pose
            pl.BlockSpec((batch_tile, H3p), lambda i: (i, 0)),   # lane-dense hidden
        ],
    )

    out_shape = (
        jax.ShapeDtypeStruct((Bp, Pp), jnp.float32),
        jax.ShapeDtypeStruct((Bp, H3p), jnp.float32),
    )

    pose_p, hid_p = pl.pallas_call(
        _mlp_kernel,
        out_shape=out_shape,
        grid_spec=grid_spec,
        compiler_params=pltpu.CompilerParams(
            dimension_semantics=("parallel",)),
    )(x, w1, b1, w2, b2, w3, b3, w4, b4)

    # Slice padding back off so callers see the original module's shapes.
    return pose_p[:B, :P], hid_p[:B, :H3]


def init_params(key, contact_size, output_pose_size):
    """Deterministic PyTorch-style (Kaiming-uniform-ish) init.

    Weights are stored transposed: (in_features, out_features)."""
    dims = [(contact_size, 512), (512, 256), (256, 64), (64, output_pose_size)]
    params = {}
    for idx, (fan_in, fan_out) in enumerate(dims, start=1):
        key, kw, kb = jax.random.split(key, 3)
        bound = 1.0 / jnp.sqrt(fan_in)
        params[f"w{idx}"] = jax.random.uniform(
            kw, (fan_in, fan_out), jnp.float32, -bound, bound)
        params[f"b{idx}"] = jax.random.uniform(
            kb, (1, fan_out), jnp.float32, -bound, bound)
    return params


def _reference_forward(contact, params, compute_dtype=jnp.bfloat16):
    """Pure-JAX reference using the same mixed-precision recipe as the kernel."""
    def mm(a, w):
        return jnp.dot(a.astype(compute_dtype), w.astype(compute_dtype),
                       preferred_element_type=jnp.float32)

    x = jnp.maximum(mm(contact, params["w1"]) + params["b1"], 0.0)
    x = jnp.maximum(mm(x, params["w2"]) + params["b2"], 0.0)
    x = jnp.maximum(mm(x, params["w3"]) + params["b3"], 0.0)
    pose = mm(x, params["w4"]) + params["b4"]
    return pose, x


if __name__ == "__main__":
    key = jax.random.PRNGKey(0)

    # Deliberately non-aligned small sizes to exercise batch + feature padding
    # and a multi-step (pipelined) grid.
    batch = 300
    contact_size = 37
    output_pose_size = 7     # position (3) + quaternion (4)

    key, k_in, k_param = jax.random.split(key, 3)
    contact = jax.random.normal(k_in, (batch, contact_size), jnp.float32)
    params = init_params(k_param, contact_size, output_pose_size)

    pose, hidden = contact_slamer_forward(contact, params, batch_tile=256)
    jax.block_until_ready((pose, hidden))

    ref_pose, ref_hidden = _reference_forward(contact, params)
    assert pose.shape == (batch, output_pose_size)
    assert hidden.shape == (batch, 64)
    assert jnp.allclose(pose, ref_pose, atol=2e-3, rtol=2e-3)
    assert jnp.allclose(hidden, ref_hidden, atol=2e-3, rtol=2e-3)

    # Sanity check against the full-f32 math as well (looser tolerance for
    # bf16 operand rounding).
    ref_pose32, ref_hidden32 = _reference_forward(contact, params, jnp.float32)
    assert jnp.allclose(pose, ref_pose32, atol=5e-2, rtol=5e-2)
    assert jnp.allclose(hidden, ref_hidden32, atol=5e-2, rtol=5e-2)

    print("KERNEL_OK")
</pallas_src>

<mosaic_0001>
module attributes {stable_mosaic.version = 11 : i64} {
  func.func @_mlp_kernel(%arg0: i32, %arg1: memref<256x128xbf16, #tpu.memory_space<vmem>>, %arg2: memref<128x512xbf16, #tpu.memory_space<vmem>>, %arg3: memref<1x512xf32, #tpu.memory_space<vmem>>, %arg4: memref<512x256xbf16, #tpu.memory_space<vmem>>, %arg5: memref<1x256xf32, #tpu.memory_space<vmem>>, %arg6: memref<256x128xbf16, #tpu.memory_space<vmem>>, %arg7: memref<1x128xf32, #tpu.memory_space<vmem>>, %arg8: memref<128x128xbf16, #tpu.memory_space<vmem>>, %arg9: memref<1x128xf32, #tpu.memory_space<vmem>>, %arg10: memref<256x128xf32, #tpu.memory_space<vmem>>, %arg11: memref<256x128xf32, #tpu.memory_space<vmem>>) attributes {dimension_semantics = [#tpu.dimension_semantics<parallel>], iteration_bounds = array<i64: 2>, scalar_prefetch = 0 : i64, scratch_operands = 0 : i64, tpu.core_type = #tpu.core_type<tc>, window_params = [{transform_indices = @transform_0, window_bounds = array<i64: 256, 128>}, {pipeline_mode = #tpu.pipeline_mode<synchronous>, transform_indices = @transform_1, window_bounds = array<i64: 128, 512>}, {pipeline_mode = #tpu.pipeline_mode<synchronous>, transform_indices = @transform_2, window_bounds = array<i64: 1, 512>}, {pipeline_mode = #tpu.pipeline_mode<synchronous>, transform_indices = @transform_3, window_bounds = array<i64: 512, 256>}, {pipeline_mode = #tpu.pipeline_mode<synchronous>, transform_indices = @transform_4, window_bounds = array<i64: 1, 256>}, {pipeline_mode = #tpu.pipeline_mode<synchronous>, transform_indices = @transform_5, window_bounds = array<i64: 256, 128>}, {pipeline_mode = #tpu.pipeline_mode<synchronous>, transform_indices = @transform_6, window_bounds = array<i64: 1, 128>}, {pipeline_mode = #tpu.pipeline_mode<synchronous>, transform_indices = @transform_7, window_bounds = array<i64: 128, 128>}, {pipeline_mode = #tpu.pipeline_mode<synchronous>, transform_indices = @transform_8, window_bounds = array<i64: 1, 128>}, {transform_indices = @transform_9, window_bounds = array<i64: 256, 128>}, {transform_indices = @transform_10, window_bounds = array<i64: 256, 128>}]} {
    %c0 = arith.constant 0 : index
    %c0_0 = arith.constant 0 : index
    %0 = vector.load %arg1[%c0, %c0_0] : memref<256x128xbf16, #tpu.memory_space<vmem>>, vector<256x128xbf16>
    %c0_1 = arith.constant 0 : index
    %c0_2 = arith.constant 0 : index
    %1 = vector.load %arg2[%c0_1, %c0_2] : memref<128x512xbf16, #tpu.memory_space<vmem>>, vector<128x512xbf16>
    %cst = arith.constant dense<0.000000e+00> : vector<256x512xf32>
    %2 = tpu.matmul %0, %1, %cst {dimension_numbers = #tpu.dot_dimension_numbers<[1], [0], [0], [1], [0, 0, 1, 1], [], []>} : vector<256x128xbf16>, vector<128x512xbf16>, vector<256x512xf32> -> vector<256x512xf32>
    %c0_3 = arith.constant 0 : index
    %c0_4 = arith.constant 0 : index
    %3 = vector.load %arg3[%c0_3, %c0_4] : memref<1x512xf32, #tpu.memory_space<vmem>>, vector<1x512xf32>
    %4 = vector.broadcast %3 : vector<1x512xf32> to vector<256x512xf32>
    %5 = arith.addf %2, %4 : vector<256x512xf32>
    %cst_5 = arith.constant 0.000000e+00 : f32
    %6 = vector.broadcast %cst_5 : f32 to vector<256x512xf32>
    %7 = arith.maximumf %5, %6 : vector<256x512xf32>
    %8 = arith.truncf %7 : vector<256x512xf32> to vector<256x512xbf16>
    %c0_6 = arith.constant 0 : index
    %c0_7 = arith.constant 0 : index
    %9 = vector.load %arg4[%c0_6, %c0_7] : memref<512x256xbf16, #tpu.memory_space<vmem>>, vector<512x256xbf16>
    %cst_8 = arith.constant dense<0.000000e+00> : vector<256x256xf32>
    %10 = tpu.matmul %8, %9, %cst_8 {dimension_numbers = #tpu.dot_dimension_numbers<[1], [0], [0], [1], [0, 0, 1, 1], [], []>} : vector<256x512xbf16>, vector<512x256xbf16>, vector<256x256xf32> -> vector<256x256xf32>
    %c0_9 = arith.constant 0 : index
    %c0_10 = arith.constant 0 : index
    %11 = vector.load %arg5[%c0_9, %c0_10] : memref<1x256xf32, #tpu.memory_space<vmem>>, vector<1x256xf32>
    %12 = vector.broadcast %11 : vector<1x256xf32> to vector<256x256xf32>
    %13 = arith.addf %10, %12 : vector<256x256xf32>
    %cst_11 = arith.constant 0.000000e+00 : f32
    %14 = vector.broadcast %cst_11 : f32 to vector<256x256xf32>
    %15 = arith.maximumf %13, %14 : vector<256x256xf32>
    %16 = arith.truncf %15 : vector<256x256xf32> to vector<256x256xbf16>
    %c0_12 = arith.constant 0 : index
    %c0_13 = arith.constant 0 : index
    %17 = vector.load %arg6[%c0_12, %c0_13] : memref<256x128xbf16, #tpu.memory_space<vmem>>, vector<256x128xbf16>
    %cst_14 = arith.constant dense<0.000000e+00> : vector<256x128xf32>
    %18 = tpu.matmul %16, %17, %cst_14 {dimension_numbers = #tpu.dot_dimension_numbers<[1], [0], [0], [1], [0, 0, 1, 1], [], []>} : vector<256x256xbf16>, vector<256x128xbf16>, vector<256x128xf32> -> vector<256x128xf32>
    %c0_15 = arith.constant 0 : index
    %c0_16 = arith.constant 0 : index
    %19 = vector.load %arg7[%c0_15, %c0_16] : memref<1x128xf32, #tpu.memory_space<vmem>>, vector<1x128xf32>
    %20 = vector.broadcast %19 : vector<1x128xf32> to vector<256x128xf32>
    %21 = arith.addf %18, %20 : vector<256x128xf32>
    %cst_17 = arith.constant 0.000000e+00 : f32
    %22 = vector.broadcast %cst_17 : f32 to vector<256x128xf32>
    %23 = arith.maximumf %21, %22 : vector<256x128xf32>
    %24 = arith.truncf %23 : vector<256x128xf32> to vector<256x128xbf16>
    %c0_18 = arith.constant 0 : index
    %c0_19 = arith.constant 0 : index
    %25 = vector.load %arg8[%c0_18, %c0_19] : memref<128x128xbf16, #tpu.memory_space<vmem>>, vector<128x128xbf16>
    %cst_20 = arith.constant dense<0.000000e+00> : vector<256x128xf32>
    %26 = tpu.matmul %24, %25, %cst_20 {dimension_numbers = #tpu.dot_dimension_numbers<[1], [0], [0], [1], [0, 0, 1, 1], [], []>} : vector<256x128xbf16>, vector<128x128xbf16>, vector<256x128xf32> -> vector<256x128xf32>
    %c0_21 = arith.constant 0 : index
    %c0_22 = arith.constant 0 : index
    %27 = vector.load %arg9[%c0_21, %c0_22] : memref<1x128xf32, #tpu.memory_space<vmem>>, vector<1x128xf32>
    %28 = vector.broadcast %27 : vector<1x128xf32> to vector<256x128xf32>
    %29 = arith.addf %26, %28 : vector<256x128xf32>
    %c0_23 = arith.constant 0 : index
    %c0_24 = arith.constant 0 : index
    %30 = vector.load %arg10[%c0_23, %c0_24] : memref<256x128xf32, #tpu.memory_space<vmem>>, vector<256x128xf32>
    tpu.vector_store %arg10[%c0_23, %c0_24], %29 {strides = array<i32>} : memref<256x128xf32, #tpu.memory_space<vmem>>, vector<256x128xf32>,
    %c0_25 = arith.constant 0 : index
    %c0_26 = arith.constant 0 : index
    %31 = vector.load %arg11[%c0_25, %c0_26] : memref<256x128xf32, #tpu.memory_space<vmem>>, vector<256x128xf32>
    tpu.vector_store %arg11[%c0_25, %c0_26], %23 {strides = array<i32>} : memref<256x128xf32, #tpu.memory_space<vmem>>, vector<256x128xf32>,
    return
  }
  func.func @transform_0(%arg0: i32) -> (i32, i32) {
    %c0_i32 = arith.constant 0 : i32
    %c0_i32_0 = arith.constant 0 : i32
    return %arg0, %c0_i32 : i32, i32
  }
  func.func @transform_1(%arg0: i32) -> (i32, i32) {
    %c0_i32 = arith.constant 0 : i32
    %c0_i32_0 = arith.constant 0 : i32
    %c0_i32_1 = arith.constant 0 : i32
    return %c0_i32, %c0_i32_0 : i32, i32
  }
  func.func @transform_2(%arg0: i32) -> (i32, i32) {
    %c0_i32 = arith.constant 0 : i32
    %c0_i32_0 = arith.constant 0 : i32
    %c0_i32_1 = arith.constant 0 : i32
    return %c0_i32, %c0_i32_0 : i32, i32
  }
  func.func @transform_3(%arg0: i32) -> (i32, i32) {
    %c0_i32 = arith.constant 0 : i32
    %c0_i32_0 = arith.constant 0 : i32
    %c0_i32_1 = arith.constant 0 : i32
    return %c0_i32, %c0_i32_0 : i32, i32
  }
  func.func @transform_4(%arg0: i32) -> (i32, i32) {
    %c0_i32 = arith.constant 0 : i32
    %c0_i32_0 = arith.constant 0 : i32
    %c0_i32_1 = arith.constant 0 : i32
    return %c0_i32, %c0_i32_0 : i32, i32
  }
  func.func @transform_5(%arg0: i32) -> (i32, i32) {
    %c0_i32 = arith.constant 0 : i32
    %c0_i32_0 = arith.constant 0 : i32
    %c0_i32_1 = arith.constant 0 : i32
    return %c0_i32, %c0_i32_0 : i32, i32
  }
  func.func @transform_6(%arg0: i32) -> (i32, i32) {
    %c0_i32 = arith.constant 0 : i32
    %c0_i32_0 = arith.constant 0 : i32
    %c0_i32_1 = arith.constant 0 : i32
    return %c0_i32, %c0_i32_0 : i32, i32
  }
  func.func @transform_7(%arg0: i32) -> (i32, i32) {
    %c0_i32 = arith.constant 0 : i32
    %c0_i32_0 = arith.constant 0 : i32
    %c0_i32_1 = arith.constant 0 : i32
    return %c0_i32, %c0_i32_0 : i32, i32
  }
  func.func @transform_8(%arg0: i32) -> (i32, i32) {
    %c0_i32 = arith.constant 0 : i32
    %c0_i32_0 = arith.constant 0 : i32
    %c0_i32_1 = arith.constant 0 : i32
    return %c0_i32, %c0_i32_0 : i32, i32
  }
  func.func @transform_9(%arg0: i32) -> (i32, i32) {
    %c0_i32 = arith.constant 0 : i32
    %c0_i32_0 = arith.constant 0 : i32
    return %arg0, %c0_i32 : i32, i32
  }
  func.func @transform_10(%arg0: i32) -> (i32, i32) {
    %c0_i32 = arith.constant 0 : i32
    %c0_i32_0 = arith.constant 0 : i32
    return %arg0, %c0_i32 : i32, i32
  }
}

</mosaic_0001>

<bundles_post_ra>
// kernel: tpu_custom_call.1
= control target key start
LH: loop header
LB: loop body
LE: loop exit
PB: predicated region body
PF: predicated region fallthrough
CT: control target
= control target key end

     0   :  { %s6046_s0 = inlined_call_operand.hbm [shape: bf16[512,128], index: 0, kind: input, shape index: {}]   ;;  %s6047_s1 = inlined_call_operand.hbm [shape: bf16[128,512], index: 1, kind: input, shape index: {}]   ;;  %s6048_s2 = inlined_call_operand.hbm [shape: f32[1,512], index: 2, kind: input, shape index: {}]   ;;  %s6049_s3 = inlined_call_operand.hbm [shape: bf16[512,256], index: 3, kind: input, shape index: {}]   ;;  %s6050_s4 = inlined_call_operand.vmem [shape: f32[1,256], index: 4, kind: input, shape index: {}]   ;;  %s6051_s5 = inlined_call_operand.hbm [shape: bf16[256,128], index: 5, kind: input, shape index: {}]   ;;  %s6052_s6 = inlined_call_operand.vmem [shape: f32[1,128], index: 6, kind: input, shape index: {}]   ;;  %s6053_s7 = inlined_call_operand.hbm [shape: bf16[128,128], index: 7, kind: input, shape index: {}]   ;;  %s6054_s8 = inlined_call_operand.vmem [shape: f32[1,128], index: 8, kind: input, shape index: {}]   ;;  %s6055_s9 = inlined_call_operand.hbm [shape: f32[512,128], index: 9, kind: output, shape index: {0}]   ;;  %s6056_s10 = inlined_call_operand.hbm [shape: f32[512,128], index: 10, kind: output, shape index: {1}]  }
   0x1   :  { %6088 = sst [smem:[#allocation55_spill]] %s6047_s1 }
   0x2   :  { %6089 = sst [smem:[#allocation56_spill]] %s6048_s2 }
   0x3   :  { %6090 = sst [smem:[#allocation57_spill]] %s6049_s3 }
   0x4   :  { %6091 = sst [smem:[#allocation58_spill]] %s6051_s5 }
   0x5   :  { %16 = vsyncpa [#allocation3], 0 }
   0x6   :  { %18 = vsyncpa [#allocation3 + $0x1], 0 }
   0x7   :  { %19 = vsyncpa [#allocation6], 0 }
   0x8   :  { %20 = vsyncpa [#allocation9], 0 }
   0x9   :  { %21 = vsyncpa [#allocation12], 0 }
   0xa   :  { %22 = vsyncpa [#allocation4], 0 }
   0xb   :  { %24 = vsyncpa [#allocation4 + $0x1], 0 }
   0xc   :  { %25 = vsyncpa [#allocation15], 0 }
   0xd   :  { %27 = vsyncpa [#allocation15 + $0x1], 0  ;;  %s4534_s13 = smov 0   ;;  %s4536_s14 = smov 0  }
   0xe   :  { %s4538_s15 = smov 0   ;;  %s4540_s16 = smov 0  }
   0xf LB: > { %s6092_s1 = sld [smem:[#allocation55_spill]]  ;;  %s4558_s20 = sadd.s32 4294967295, %s4464_s16   ;;  %s4464_s16 = sphi %s4540_s16, %s6214_s16   ;;  %s4460_s15 = sphi %s4538_s15, %s6213_s15   ;;  %s4456_s14 = sphi %s4536_s14, %s6212_s14   ;;  %s4452_s13 = sphi %s4534_s13, %s6211_s13  }
  0x10   : > { %p3323_p0 = scmp.ge.s32.totalorder %s4464_s16, 1  ;;  %p54_p1 = scmp.eq.s32.totalorder %s4558_s20, 0 }
  0x11   : > { %p284_p2 = scmp.lt.s32.totalorder %s4464_s16, 3  ;;  %s4466_s22 = smov [#allocation5]  }
  0x12   : > { %s297_s23 = sshll.u32 %s4466_s22, 4  ;;  %s6094_s3 = sld [smem:[#allocation57_spill]]  ;;  %s298_s23 = int_to_ptr.vmem [resolvable:$true] %s297_s23 }
  0x13   : > { %p4563_p3 = pnand %p3323_p0, %p284_p2  ;;  %s4467_s28 = smov [#allocation8]  }
  0x14   : > { %s323_s29 = sshll.u32 %s4467_s28, 4  ;;  %s4468_s30 = smov 256   ;;  %s324_s29 = int_to_ptr.vmem [resolvable:$true] %s323_s29 }
  0x15   : > { %s295_s19 = sshll.u32 %s6092_s1, 4  ;;  %p4083_p4 = pneg %p4563_p3  ;;  %s296_s19 = int_to_ptr.hbm [resolvable:$true] %s295_s19 }
  0x16   : > { %s4469_s11 = smov 16   ;;  %s4470_s12 = smov 128  }
  0x17   : > { %p4575_p6 = pnand %p4083_p4, %p54_p1  ;;  %s4471_s17 = smov 8  }
  0x18   : > { %s321_s26 = sshll.u32 %s6094_s3, 4  ;;  %s6096_s2 = sld [smem:[#allocation56_spill]]  ;;  %s322_s26 = int_to_ptr.hbm [resolvable:$true] %s321_s26 }
  0x19   : > { %4086 = dma.hbm_to_vmem [thread:$0]  (!%p4575_p6), %s296_s19, 4096, %s298_s23, [#allocation6], %s4468_s30, %s4468_s30, %s4469_s11  }
  0x1a   : > { %4092 = dma.hbm_to_vmem [thread:$0]  (!%p4575_p6), %s322_s26, 8192, %s324_s29, [#allocation9], %s4470_s12, %s4470_s12, %s4471_s17  }
  0x1b   : > { %s4472_s25 = smov [#allocation7]   ;;  %s6097_s5 = sld [smem:[#allocation58_spill]] }
  0x1c   : > { %s312_s1 = sshll.u32 %s4472_s25, 4  ;;  %s4473_s23 = smov [#allocation10]   ;;  %s313_s1 = int_to_ptr.vmem [resolvable:$true] %s312_s1 }
  0x1d   : > { %s340_s26 = sshll.u32 %s4473_s23, 4  ;;  %s6057_s29 = smov 64   ;;  %s341_s26 = int_to_ptr.vmem [resolvable:$true] %s340_s26 }
  0x1e   : > { %s310_s24 = sshll.u32 %s6096_s2, 4  ;;  %s6058_s30 = smov 4   ;;  %s311_s24 = int_to_ptr.hbm [resolvable:$true] %s310_s24 }
  0x1f   : > { %4089 = dma.hbm_to_vmem [thread:$0]  (!%p4575_p6), %s311_s24, 64, %s313_s1, [#allocation6]  }
  0x20   : > { %s355_s11 = sshll.u32 %s6053_s7, 4  ;;  %s4476_s12 = smov [#allocation11]   ;;  %s356_s11 = int_to_ptr.hbm [resolvable:$true] %s355_s11 }
  0x21   : > { %s338_s19 = sshll.u32 %s6097_s5, 4  ;;  %s357_s17 = sshll.u32 %s4476_s12, 4  ;;  %s339_s19 = int_to_ptr.hbm [resolvable:$true] %s338_s19  ;;  %s358_s17 = int_to_ptr.vmem [resolvable:$true] %s357_s17 }
  0x22   : > { %4095 = dma.hbm_to_vmem [thread:$0]  (!%p4575_p6), %s339_s19, 2048, %s341_s26, [#allocation9], %s6057_s29, %s6057_s29, %s6058_s30  }
  0x23   : > { %4098 = dma.hbm_to_vmem [thread:$0]  (!%p4575_p6), %s356_s11, 1024, %s358_s17, [#allocation12], %s6057_s29, %s6057_s29, %s6058_s30  }
  0x24   : > { %s3322_s18 = sadd.s32 4294967294, %s4464_s16   ;;  %s4606_s22 = sadd.s32 1, %s4464_s16  }
  0x25   : > { %s40_s24 = sadd.s32 1, %s4460_s15  ;;  %s37_s25 = ssub.s32 %s4464_s16, %s4606_s22 }
  0x26   : > { %p47_p7 = scmp.ne.s32.totalorder %s4460_s15, %s4456_s14  ;;  %p38_p8 = scmp.eq.s32.totalorder %s37_s25, 0 }
  0x27   : > { %p48_p9 = scmp.eq.s32.totalorder %s4464_s16, 0  ;;  %p53_p10 = scmp.ne.s32.totalorder %s4456_s14, %s4452_s13 }
  0x28   : > { %p245_p11 = scmp.eq.s32.totalorder %s4558_s20, 1  ;;  %p251_p0 = scmp.eq.s32.totalorder %s3322_s18, 1 }
  0x29   : > { %s4618_s28 = scalar_select %p38_p8, %s4460_s15, %s40_s24  }
  0x2a   : > { %p4622_p12 = por %p54_p1, %p53_p10  ;;  %p4626_p13 = por %p245_p11, %p47_p7 }
  0x2b   : > { %p49_p2 = por %p48_p9, %p47_p7  ;;  %s374_s23 = sand.u32 1, %s4460_s15  }
  0x2c   : > { %p4631_p4 = por %p251_p0, %p53_p10  ;;  %p4115_p6 = scmp.lt.s32.totalorder %s4464_s16, 2 }
  0x2d   : > { %s3330_s1 = sshll.u32 %s374_s23, 7  ;;  %s3894_s3 = sshll.u32 %s4464_s16, 7 }
  0x2e   : > { %s383_s17 = scalar_lea.hbm %s6046_s0, %s3894_s3  ;;  %s378_s25 = scalar_lea.vmem [#allocation2], %s3330_s1 }
  0x2f   : > { %s384_s24 = sshll.u32 %s383_s17, 4  ;;  %s386_s29 = sshll.u32 %s378_s25, 4  ;;  %s385_s24 = int_to_ptr.hbm [resolvable:$true] %s384_s24  ;;  %s387_s29 = int_to_ptr.vmem [resolvable:$true] %s386_s29 }
  0x30   : > { %p4640_p8 = pnand %p4115_p6, %p49_p2  ;;  %s375_s30 = scalar_lea.sflag [#allocation3], %s374_s23 }
  0x31   : > { %s4324_s2 = sshra.s32 %s385_s24, 4  ;;  %s4331_s1 = scalar_lea.hbm %s6046_s0, 256  ;;  %s4325_s2 = int_to_ptr.hbm [resolvable:$true] %s4324_s2 }
  0x32   : > { %s4326_s5 = scalar_lea.hbm %s4325_s2, 128  ;;  %p4328_p9 = pneg %p4640_p8 }
  0x33   : > { %p4327_p7 = scmp.ne.s32.totalorder %s4325_s2, %s4326_s5  ;;  %p4332_p0 = scmp.lt.s32.totalorder %s4325_s2, %s6046_s0 }
  0x34   : > { %p4333_p2 = scmp.lt.s32.totalorder %s4331_s1, %s4326_s5 }
  0x35   : > { %p4329_p10 = pnand %p4328_p9, %p4327_p7 }
  0x36   : > { %p4334_p6 = por %p4333_p2, %p4332_p0 }
  0x37   : > { %p4330_p11 = pneg %p4329_p10 }
  0x39   : > { %p4335_p5 = pnand %p4334_p6, %p4330_p11 }
  0x3b   : > { %4338 = shalt.err (!%p4335_p5)
}
  0x3c   : > { %s6102_s23 = smov 4   ;;  %s6103_s25 = smov 64  }
  0x3d   : > { %4102 = dma.hbm_to_vmem [thread:$0]  (!%p4640_p8), %s385_s24, 2048, %s387_s29, %s375_s30, %s6103_s25, %s6103_s25, %s6102_s23  }
  0x3e   : > { %398 = sbr.rel (%p4563_p3) target bundleno = 1486 (0x5ce), region = 56 }
  0x43   : > { %s4660_s3 = sand.u32 1, %s4456_s14  }
  0x44   : > { %s3334_s2 = sshll.u32 %s4660_s3, 7  ;;  %s401_s5 = scalar_lea.sflag [#allocation3], %s4660_s3 }
  0x45   : > { %s4664_s11 = scalar_lea.vmem [#allocation2], %s3334_s2 }
  0x46   : > { %4427 = dma.done.wait (%p4622_p12), %s401_s5, 2048  }
  0x47   : > { %4429 = vsyncadd (%p4622_p12), %s401_s5, 4294965248 }
  0x48   : > { %4431 = dma.done.wait (%p54_p1), [#allocation6], 4160  }
  0x49   : > { %4433 = vsyncadd (%p54_p1), [#allocation6], 4294963136 }
  0x4a   : > { %4435 = dma.done.wait (%p54_p1), [#allocation9], 10240  }
  0x4b   : > { %4437 = vsyncadd (%p54_p1), [#allocation9], 4294957056 }
  0x4c   : > { %4439 = dma.done.wait (%p54_p1), [#allocation12], 1024  }
  0x4d   : > { %4441 = vsyncadd (%p54_p1), [#allocation12], 4294966272  ;;  %v3520_v0 = vld [vmem:[#allocation5 + $0xe0] sm:$0xf]  ;;  %v3941_v1 = vld [vmem:[#allocation5 + $0xec] sm:$0xf0] }
  0x4e   : > { %v3939_v2 = vld [vmem:[#allocation5 + $0xe4] sm:$0xf]  ;;  %v3521_v3 = vor.u32 %v3941_v1, %v3520_v0  ;;  %v3522_v4 = vld [vmem:[#allocation5 + $0xf0] sm:$0xf0]  ;;  %v3528_v5 = vld [vmem:[#allocation5 + $0xe8] sm:$0xf] }
  0x4f   : > { %v3942_v6 = vld [vmem:[#allocation5 + $0xf4] sm:$0xf0]  ;;  %v4682_v7 = vor.u32 %v3939_v2, %v3522_v4  ;;  %v3504_v9 = vld [vmem:[#allocation5 + $0xc0] sm:$0xf]  ;;  %v3937_v10 = vld [vmem:[#allocation5 + $0xcc] sm:$0xf0] }
  0x50   : > { %v4684_v8 = vor.u32 %v3942_v6, %v3528_v5  ;;  %v3935_v11 = vld [vmem:[#allocation5 + $0xc4] sm:$0xf]  ;;  %805 = vmatpush.bf16.msra.mxu0 %v3521_v3  ;;  %4033 = vmatpush.bf16.msra.mxu3 %v3521_v3  ;;  %v3505_v12 = vor.u32 %v3937_v10, %v3504_v9  ;;  %v3506_v13 = vld [vmem:[#allocation5 + $0xd0] sm:$0xf0]  ;;  %v3512_v14 = vld [vmem:[#allocation5 + $0xc8] sm:$0xf] }
  0x51   : > { %v3938_v15 = vld [vmem:[#allocation5 + $0xd4] sm:$0xf0]  ;;  %894 = vmatpush.bf16.msra.mxu1 %v4682_v7  ;;  %v4688_v16 = vor.u32 %v3935_v11, %v3506_v13  ;;  %v3488_v18 = vld [vmem:[#allocation5 + $0xa0] sm:$0xf]  ;;  %v3933_v19 = vld [vmem:[#allocation5 + $0xac] sm:$0xf0] }
  0x52   : > { %983 = vmatpush.bf16.msra.mxu2 %v4684_v8  ;;  %v4690_v17 = vor.u32 %v3938_v15, %v3512_v14  ;;  %v3931_v20 = vld [vmem:[#allocation5 + $0xa4] sm:$0xf]  ;;  %v3490_v21 = vld [vmem:[#allocation5 + $0xb0] sm:$0xf0]  ;;  %v3496_v22 = vld [vmem:[#allocation5 + $0xa8] sm:$0xf]  ;;  %v3489_v24 = vor.u32 %v3933_v19, %v3488_v18 }
  0x53   : > { %v3934_v23 = vld [vmem:[#allocation5 + $0xb4] sm:$0xf0]  ;;  %v4694_v25 = vor.u32 %v3931_v20, %v3490_v21  ;;  %v3472_v27 = vld [vmem:[#allocation5 + $0x80] sm:$0xf]  ;;  %v3929_v28 = vld [vmem:[#allocation5 + $0x8c] sm:$0xf0] }
  0x54   : > { %806 = vmatpush.bf16.msra.mxu0 %v3505_v12  ;;  %4034 = vmatpush.bf16.msra.mxu3 %v3505_v12  ;;  %v4696_v26 = vor.u32 %v3934_v23, %v3496_v22  ;;  %v3927_v29 = vld [vmem:[#allocation5 + $0x84] sm:$0xf]  ;;  %v3474_v30 = vld [vmem:[#allocation5 + $0x90] sm:$0xf0]  ;;  %v3480_v31 = vld [vmem:[#allocation5 + $0x88] sm:$0xf]  ;;  %v3473_v33 = vor.u32 %v3929_v28, %v3472_v27 }
  0x55   : > { %895 = vmatpush.bf16.msra.mxu1 %v4688_v16  ;;  %v3930_v32 = vld [vmem:[#allocation5 + $0x94] sm:$0xf0]  ;;  %v4700_v34 = vor.u32 %v3927_v29, %v3474_v30  ;;  %v3456_v36 = vld [vmem:[#allocation5 + $0x60] sm:$0xf]  ;;  %v3925_v37 = vld [vmem:[#allocation5 + $0x6c] sm:$0xf0] }
  0x56   : > { %984 = vmatpush.bf16.msra.mxu2 %v4690_v17  ;;  %v4702_v35 = vor.u32 %v3930_v32, %v3480_v31  ;;  %v3923_v38 = vld [vmem:[#allocation5 + $0x64] sm:$0xf]  ;;  %v3458_v39 = vld [vmem:[#allocation5 + $0x70] sm:$0xf0]  ;;  %v3464_v40 = vld [vmem:[#allocation5 + $0x68] sm:$0xf]  ;;  %v3457_v42 = vor.u32 %v3925_v37, %v3456_v36 }
  0x57   : > { %v3926_v41 = vld [vmem:[#allocation5 + $0x74] sm:$0xf0]  ;;  %v3440_v43 = vld [vmem:[#allocation5 + $0x40] sm:$0xf]  ;;  %v3921_v44 = vld [vmem:[#allocation5 + $0x4c] sm:$0xf0]  ;;  %v3461_v45 = vor.u32 %v3923_v38, %v3458_v39 }
  0x58   : > { %807 = vmatpush.bf16.msra.mxu0 %v3489_v24  ;;  %4035 = vmatpush.bf16.msra.mxu3 %v3489_v24  ;;  %v4706_v46 = vor.u32 %v3926_v41, %v3464_v40  ;;  %v3919_v47 = vld [vmem:[#allocation5 + $0x44] sm:$0xf]  ;;  %v3442_v48 = vld [vmem:[#allocation5 + $0x50] sm:$0xf0]  ;;  %v3448_v49 = vld [vmem:[#allocation5 + $0x48] sm:$0xf]  ;;  %v3441_v51 = vor.u32 %v3921_v44, %v3440_v43 }
  0x59   : > { %896 = vmatpush.bf16.msra.mxu1 %v4694_v25  ;;  %v3922_v50 = vld [vmem:[#allocation5 + $0x54] sm:$0xf0]  ;;  %v3445_v52 = vor.u32 %v3919_v47, %v3442_v48  ;;  %v3424_v54 = vld [vmem:[#allocation5 + $0x20] sm:$0xf]  ;;  %v3917_v55 = vld [vmem:[#allocation5 + $0x2c] sm:$0xf0] }
  0x5a   : > { %985 = vmatpush.bf16.msra.mxu2 %v4696_v26  ;;  %v4709_v53 = vor.u32 %v3922_v50, %v3448_v49  ;;  %v3915_v56 = vld [vmem:[#allocation5 + $0x24] sm:$0xf]  ;;  %v3426_v57 = vld [vmem:[#allocation5 + $0x30] sm:$0xf0]  ;;  %v3432_v58 = vld [vmem:[#allocation5 + $0x28] sm:$0xf]  ;;  %v3425_v60 = vor.u32 %v3917_v55, %v3424_v54 }
  0x5b   : > { %v3918_v59 = vld [vmem:[#allocation5 + $0x34] sm:$0xf0]  ;;  %v3429_v61 = vor.u32 %v3915_v56, %v3426_v57  ;;  %v3408_v63 = vld [vmem:[#allocation5] sm:$0xf]  ;;  %v3913_v0 = vld [vmem:[#allocation5 + $0xc] sm:$0xf0] }
  0x5c   : > { %808 = vmatpush.bf16.msra.mxu0 %v3473_v33  ;;  %4036 = vmatpush.bf16.msra.mxu3 %v3473_v33  ;;  %v3433_v62 = vor.u32 %v3918_v59, %v3432_v58  ;;  %v3911_v1 = vld [vmem:[#allocation5 + $0x4] sm:$0xf]  ;;  %v3410_v2 = vld [vmem:[#allocation5 + $0x10] sm:$0xf0]  ;;  %v3416_v3 = vld [vmem:[#allocation5 + $0x8] sm:$0xf]  ;;  %v3409_v5 = vor.u32 %v3913_v0, %v3408_v63 }
  0x5d   : > { %897 = vmatpush.bf16.msra.mxu1 %v4700_v34  ;;  %v3914_v4 = vld [vmem:[#allocation5 + $0x14] sm:$0xf0]  ;;  %v3413_v6 = vor.u32 %v3911_v1, %v3410_v2  ;;  %v4713_v10 = vld [vmem:[%s4664_s11] sm:$0xff]  ;;  %v4727_v12 = vld [vmem:[%s4664_s11 + $0x8] sm:$0xff]  ;;  %s3340_s1 = sshll.u32 %s4660_s3, 8  ;;  %s4031_s2 = sshll.u32 %s4558_s20, 8 }
  0x5e   : > { %986 = vmatpush.bf16.msra.mxu2 %v4702_v35  ;;  %v3417_v9 = vor.u32 %v3914_v4, %v3416_v3  ;;  %v4716_v11 = vld [vmem:[%s4664_s11 + $0x60] sm:$0xff]  ;;  %v4730_v13 = vld [vmem:[%s4664_s11 + $0x68] sm:$0xff]  ;;  %v4740_v14 = vld [vmem:[%s4664_s11 + $0x70] sm:$0xff]  ;;  %s5798_s12 = scalar_lea.vmem [#allocation14], %s3340_s1  ;;  %s5896_s25 = scalar_lea.vmem [#allocation13], %s3340_s1 }
  0x5f   : > { %v4751_v15 = vld [vmem:[%s4664_s11 + $0x18] sm:$0xff]  ;;  %v4777_v18 = vld [vmem:[%s4664_s11 + $0x30] sm:$0xff]  ;;  %v3940_v19 = vld [vmem:[#allocation5 + $0xec] sm:$0xf]  ;;  %s3164_s21 = scalar_lea.hbm %s6056_s10, %s4031_s2  ;;  %s3165_s29 = sshll.u32 %s5798_s12, 4  ;;  %s3166_s29 = int_to_ptr.vmem [resolvable:$true] %s3165_s29 }
  0x60   : > { %809 = vmatpush.bf16.msra.mxu0 %v3457_v42  ;;  %4037 = vmatpush.bf16.msra.mxu3 %v3457_v42  ;;  %v3530_v20 = vld [vmem:[#allocation5 + $0xf8] sm:$0xf0]  ;;  %v3936_v22 = vld [vmem:[#allocation5 + $0xcc] sm:$0xf]  ;;  %v3592_v28 = vld [vmem:[#allocation8 + $0x70] sm:$0xf] }
  0x61   : > { %898 = vmatpush.bf16.msra.mxu1 %v3461_v45  ;;  %v3533_v21 = vor.u32 %v3940_v19, %v3530_v20  ;;  %v3514_v23 = vld [vmem:[#allocation5 + $0xd8] sm:$0xf0]  ;;  %v3656_v31 = vld [vmem:[#allocation8 + $0xf0] sm:$0xf]  ;;  %v4791_v38 = vld [vmem:[%s4664_s11 + $0x40] sm:$0xff]  ;;  %s3167_s30 = sshll.u32 %s3164_s21, 4  ;;  %s3168_s30 = int_to_ptr.hbm [resolvable:$true] %s3167_s30 }
  0x62   : > { %987 = vmatpush.bf16.msra.mxu2 %v4706_v46  ;;  %v4784_v24 = vld [vmem:[%s4664_s11 + $0x38] sm:$0xff]  ;;  %v3720_v41 = vld [vmem:[#allocation8 + $0x170] sm:$0xf]  ;;  %v3924_v44 = vld [vmem:[#allocation5 + $0x6c] sm:$0xf]  ;;  %s3136_s27 = scalar_lea.sflag [#allocation15], %s4660_s3 }
  0x63   : > { %v3498_v27 = vld [vmem:[#allocation5 + $0xb8] sm:$0xf0]  ;;  %v3584_v49 = vld [vmem:[#allocation8 + $0x60] sm:$0xf]  ;;  %v3956_v50 = vld [vmem:[#allocation8 + $0x64] sm:$0xf0] }
  0x64   : > { %810 = vmatpush.bf16.msra.mxu0 %v3441_v51  ;;  %4038 = vmatpush.bf16.msra.mxu3 %v3441_v51  ;;  %v3958_v30 = vld [vmem:[#allocation8 + $0x74] sm:$0xf0]  ;;  %v3648_v51 = vld [vmem:[#allocation8 + $0xe0] sm:$0xf]  ;;  %v3972_v54 = vld [vmem:[#allocation8 + $0xe4] sm:$0xf0] }
  0x65   : > { %899 = vmatpush.bf16.msra.mxu1 %v3445_v52  ;;  %v3974_v32 = vld [vmem:[#allocation8 + $0xf4] sm:$0xf0]  ;;  %v3593_v33 = vor.u32 %v3958_v30, %v3592_v28  ;;  %v3712_v55 = vld [vmem:[#allocation8 + $0x160] sm:$0xf]  ;;  %v3988_v56 = vld [vmem:[#allocation8 + $0x164] sm:$0xf0]  ;;  %v3649_v58 = vor.u32 %v3972_v54, %v3648_v51 }
  0x66   : > { %988 = vmatpush.bf16.msra.mxu2 %v4709_v53  ;;  %v3482_v36 = vld [vmem:[#allocation5 + $0x98] sm:$0xf0]  ;;  %v3713_v59 = vor.u32 %v3988_v56, %v3712_v55  ;;  %v3640_v1 = vld [vmem:[#allocation8 + $0xd0] sm:$0xf]  ;;  %v3920_v3 = vld [vmem:[#allocation5 + $0x4c] sm:$0xf] }
  0x67   : > { %v3990_v42 = vld [vmem:[#allocation8 + $0x174] sm:$0xf0]  ;;  %v3704_v19 = vld [vmem:[#allocation8 + $0x150] sm:$0xf]  ;;  %v3968_v30 = vld [vmem:[#allocation8 + $0xc4] sm:$0xf0] }
  0x68   : > { %811 = vmatpush.bf16.msra.mxu0 %v3425_v60  ;;  %4039 = vmatpush.bf16.msra.mxu3 %v3425_v60  ;;  %v3721_v43 = vor.u32 %v3990_v42, %v3720_v41  ;;  %v3954_v63 = vld [vmem:[#allocation8 + $0x54] sm:$0xf0]  ;;  %v3560_v42 = vld [vmem:[#allocation8 + $0x30] sm:$0xf]  ;;  %s4368_s24 = sshra.s32 %s3168_s30, 4  ;;  %s4374_s23 = scalar_lea.hbm %s6056_s10, 512  ;;  %s4369_s24 = int_to_ptr.hbm [resolvable:$true] %s4368_s24 }
  0x69   : > { %900 = vmatpush.bf16.msra.mxu1 %v3429_v61  ;;  %v3970_v2 = vld [vmem:[#allocation8 + $0xd4] sm:$0xf0]  ;;  %v3688_v54 = vld [vmem:[#allocation8 + $0x130] sm:$0xf]  ;;  %s4370_s18 = scalar_lea.hbm %s4369_s24, 256  ;;  %p4375_p12 = scmp.lt.s32.totalorder %s4369_s24, %s6056_s10 }
  0x6a   : > { %989 = vmatpush.bf16.msra.mxu2 %v3433_v62  ;;  %v3450_v4 = vld [vmem:[#allocation5 + $0x58] sm:$0xf0]  ;;  %p4371_p1 = scmp.ne.s32.totalorder %s4369_s24, %s4370_s18  ;;  %p4376_p8 = scmp.lt.s32.totalorder %s4374_s23, %s4370_s18 }
  0x6b   : > { %v3986_v20 = vld [vmem:[#allocation8 + $0x154] sm:$0xf0] }
  0x6c   : > { %812 = vmatpush.bf16.msra.mxu0 %v3409_v5  ;;  %4040 = vmatpush.bf16.msra.mxu3 %v3409_v5  ;;  %v3641_v5 = vor.u32 %v3970_v2, %v3640_v1  ;;  %v3982_v55 = vld [vmem:[#allocation8 + $0x134] sm:$0xf0]  ;;  %v3964_v1 = vld [vmem:[#allocation8 + $0xa4] sm:$0xf0]  ;;  %v3680_v2 = vld [vmem:[#allocation8 + $0x120] sm:$0xf]  ;;  %p4372_p3 = pnand %p4371_p1, %p4626_p13  ;;  %p4377_p7 = por %p4376_p8, %p4375_p12 }
  0x6d   : > { %901 = vmatpush.bf16.msra.mxu1 %v3413_v6 }
  0x6e   : > { %990 = vmatpush.bf16.msra.mxu2 %v3417_v9  ;;  %p4373_p5 = pneg %p4372_p3 }
  0x6f   : > { %813 = vmatmul.bf16.vlgmr.msra.gmra.mxu0 %v4713_v10  ;;  %873 = vmatmul.bf16.vlgmr.msra.gmra.mxu3 %v4716_v11 }
  0x70   : > { %4041 = vmatpush.bf16.msrb.mxu3 %v4682_v7  ;;  %902 = vmatmul.bf16.vlgmr.msra.gmra.mxu1 %v4713_v10  ;;  %v4737_v7 = vld [vmem:[%s4664_s11 + $0x10] sm:$0xff]  ;;  %p4378_p9 = pnand %p4377_p7, %p4373_p5 }
  0x71   : > { %991 = vmatmul.bf16.vlgmr.msra.gmra.mxu2 %v4713_v10  ;;  %1743 = vmatpush.bf16.msrb.mxu0 %v3593_v33 }
  0x72   : > { %1921 = vmatpush.bf16.msrb.mxu2 %v3721_v43  ;;  %v3950_v43 = vld [vmem:[#allocation8 + $0x34] sm:$0xf0] }
  0x74   : > { %4042 = vmatpush.bf16.msrb.mxu3 %v4688_v16  ;;  %v4754_v16 = vld [vmem:[%s4664_s11 + $0x78] sm:$0xff] }
  0x76   : > { %1922 = vmatpush.bf16.msrb.mxu2 %v3713_v59  ;;  %v3948_v59 = vld [vmem:[#allocation8 + $0x24] sm:$0xf0] }
  0x78   : > { %4043 = vmatpush.bf16.msrb.mxu3 %v4694_v25  ;;  %v3517_v25 = vor.u32 %v3936_v22, %v3514_v23  ;;  %v3705_v22 = vor.u32 %v3986_v20, %v3704_v19  ;;  %v3568_v23 = vld [vmem:[#allocation8 + $0x40] sm:$0xf]  ;;  %v3544_v19 = vld [vmem:[#allocation8 + $0x10] sm:$0xf]  ;;  %v3946_v20 = vld [vmem:[#allocation8 + $0x14] sm:$0xf0] }
  0x7a   : > { %1923 = vmatpush.bf16.msrb.mxu2 %v3705_v22  ;;  %v3608_v22 = vld [vmem:[#allocation8 + $0x90] sm:$0xf] }
  0x7c   : > { %4044 = vmatpush.bf16.msrb.mxu3 %v4700_v34  ;;  %v3657_v34 = vor.u32 %v3974_v32, %v3656_v31  ;;  %v3696_v31 = vld [vmem:[#allocation8 + $0x140] sm:$0xf]  ;;  %v3984_v32 = vld [vmem:[#allocation8 + $0x144] sm:$0xf0] }
  0x7d   : > { %v3697_v41 = vor.u32 %v3984_v32, %v3696_v31  ;;  %v3672_v32 = vld [vmem:[#allocation8 + $0x110] sm:$0xf] }
  0x7e   : > { %1832 = vmatpush.bf16.msrb.mxu1 %v3657_v34 }
  0x7f   : > { %818 = vmatmul.bf16.gmra.mxu0 %v4727_v12  ;;  %878 = vmatmul.bf16.gmra.mxu3 %v4730_v13 }
  0x80   : > { %4045 = vmatpush.bf16.msrb.mxu3 %v3461_v45  ;;  %907 = vmatmul.bf16.gmra.mxu1 %v4727_v12  ;;  %v3466_v45 = vld [vmem:[#allocation5 + $0x78] sm:$0xf0] }
  0x81   : > { %996 = vmatmul.bf16.gmra.mxu2 %v4727_v12  ;;  %v3469_v47 = vor.u32 %v3924_v44, %v3466_v45  ;;  %v3561_v44 = vor.u32 %v3950_v43, %v3560_v42  ;;  %v3624_v45 = vld [vmem:[#allocation8 + $0xb0] sm:$0xf]  ;;  %v3944_v42 = vld [vmem:[#allocation8 + $0x4] sm:$0xf0]  ;;  %v3600_v43 = vld [vmem:[#allocation8 + $0x80] sm:$0xf] }
  0x82   : > { %1833 = vmatpush.bf16.msrb.mxu1 %v3649_v58  ;;  %1924 = vmatpush.bf16.msrb.mxu2 %v3697_v41  ;;  %v3552_v58 = vld [vmem:[#allocation8 + $0x20] sm:$0xf] }
  0x83   : > { %v3536_v41 = vld [vmem:[#allocation8] sm:$0xf] }
  0x84   : > { %4046 = vmatpush.bf16.msrb.mxu3 %v3445_v52 }
  0x86   : > { %1834 = vmatpush.bf16.msrb.mxu1 %v3641_v5 }
  0x88   : > { %4047 = vmatpush.bf16.msrb.mxu3 %v3429_v61 }
  0x8c   : > { %4048 = vmatpush.bf16.msrb.mxu3 %v3413_v6 }
  0x8f   : > { %823 = vmatmul.bf16.gmra.mxu0 %v4737_v7  ;;  %883 = vmatmul.bf16.gmra.mxu3 %v4740_v14 }
  0x90   : > { %4049 = vmatpush.bf16.msra.mxu3 %v4684_v8  ;;  %912 = vmatmul.bf16.gmra.mxu1 %v4737_v7  ;;  %v4763_v8 = vld [vmem:[%s4664_s11 + $0x20] sm:$0xff] }
  0x91   : > { %1001 = vmatmul.bf16.gmra.mxu2 %v4737_v7 }
  0x94   : > { %4050 = vmatpush.bf16.msra.mxu3 %v4690_v17  ;;  %v4770_v17 = vld [vmem:[%s4664_s11 + $0x28] sm:$0xff] }
  0x98   : > { %4051 = vmatpush.bf16.msra.mxu3 %v4696_v26  ;;  %v3932_v26 = vld [vmem:[#allocation5 + $0xac] sm:$0xf] }
  0x99   : > { %v3501_v29 = vor.u32 %v3932_v26, %v3498_v27  ;;  %v3632_v26 = vld [vmem:[#allocation8 + $0xc0] sm:$0xf] }
  0x9a   : > { %v3633_v34 = vor.u32 %v3968_v30, %v3632_v26  ;;  %v3418_v26 = vld [vmem:[#allocation5 + $0x18] sm:$0xf0]  ;;  %v4837_v30 = vld [vmem:[%s4664_s11 + $0x50] sm:$0xff] }
  0x9c   : > { %4052 = vmatpush.bf16.msra.mxu3 %v4702_v35  ;;  %v3928_v35 = vld [vmem:[#allocation5 + $0x8c] sm:$0xf]  ;;  %1835 = vmatpush.bf16.msrb.mxu1 %v3633_v34  ;;  %v3978_v34 = vld [vmem:[#allocation8 + $0x114] sm:$0xf0] }
  0x9d   : > { %v3485_v37 = vor.u32 %v3928_v35, %v3482_v36 }
  0x9f   : > { %828 = vmatmul.bf16.gmra.mxu0 %v4751_v15  ;;  %888 = vmatmul.bf16.gmra.mxu3 %v4754_v16 }
  0xa0   : > { %4053 = vmatpush.bf16.msra.mxu3 %v4706_v46  ;;  %917 = vmatmul.bf16.gmra.mxu1 %v4751_v15  ;;  %v4801_v46 = vld [vmem:[#allocation7] sm:$0xf] }
  0xa1   : > { %1006 = vmatmul.bf16.gmra.mxu2 %v4751_v15  ;;  %v4808_v60 = vperm.slane %v4801_v46, 0 }
  0xa4   : > { %4054 = vmatpush.bf16.msra.mxu3 %v4709_v53  ;;  %v3585_v53 = vor.u32 %v3956_v50, %v3584_v49  ;;  %v3916_v49 = vld [vmem:[#allocation5 + $0x2c] sm:$0xf]  ;;  %v3434_v50 = vld [vmem:[#allocation5 + $0x38] sm:$0xf0] }
  0xa6   : > { %1744 = vmatpush.bf16.msrb.mxu0 %v3585_v53  ;;  %v3437_v53 = vor.u32 %v3916_v49, %v3434_v50  ;;  %v3960_v49 = vld [vmem:[#allocation8 + $0x84] sm:$0xf0]  ;;  %v3664_v50 = vld [vmem:[#allocation8 + $0x100] sm:$0xf] }
  0xa8   : > { %4055 = vmatpush.bf16.msra.mxu3 %v3433_v62  ;;  %v3576_v62 = vld [vmem:[#allocation8 + $0x50] sm:$0xf] }
  0xa9   : > { %v3577_v0 = vor.u32 %v3954_v63, %v3576_v62  ;;  %v3616_v62 = vld [vmem:[#allocation8 + $0xa0] sm:$0xf] }
  0xaa   : > { %v3617_v5 = vor.u32 %v3964_v1, %v3616_v62  ;;  %v3784_v62 = vld [vmem:[#allocation8 + $0x1f0] sm:$0xf] }
  0xab   : > { %1745 = vmatpush.bf16.msrb.mxu0 %v3577_v0  ;;  %v3553_v0 = vor.u32 %v3948_v59, %v3552_v58 }
  0xac   : > { %4056 = vmatpush.bf16.msra.mxu3 %v3417_v9  ;;  %v4814_v9 = vld [vmem:[%s4664_s11 + $0x48] sm:$0xff] }
  0xaf   : > { %833 = vmatmul.bf16.gmra.mxu0 %v4763_v8  ;;  %962 = vmatmul.bf16.vlgmr.msrb.gmra.mxu3 %v4716_v11 }
  0xb0   : > { %922 = vmatmul.bf16.gmra.mxu1 %v4763_v8  ;;  %1072 = vmatpush.bf16.msrb.mxu3 %v3533_v21 }
  0xb1   : > { %1011 = vmatmul.bf16.gmra.mxu2 %v4763_v8 }
  0xb4   : > { %1073 = vmatpush.bf16.msrb.mxu3 %v3517_v25  ;;  %v3952_v25 = vld [vmem:[#allocation8 + $0x44] sm:$0xf0] }
  0xb8   : > { %1074 = vmatpush.bf16.msrb.mxu3 %v3501_v29  ;;  %v3569_v29 = vor.u32 %v3952_v25, %v3568_v23  ;;  %v3962_v23 = vld [vmem:[#allocation8 + $0x94] sm:$0xf0]  ;;  %v3912_v25 = vld [vmem:[#allocation5 + $0xc] sm:$0xf] }
  0xb9   : > { %v3421_v31 = vor.u32 %v3912_v25, %v3418_v26 }
  0xba   : > { %1746 = vmatpush.bf16.msrb.mxu0 %v3569_v29 }
  0xbc   : > { %1075 = vmatpush.bf16.msrb.mxu3 %v3485_v37 }
  0xbe   : > { %1747 = vmatpush.bf16.msrb.mxu0 %v3561_v44 }
  0xbf   : > { %838 = vmatmul.bf16.gmra.mxu0 %v4770_v17  ;;  %967 = vmatmul.bf16.gmra.mxu3 %v4730_v13 }
  0xc0   : > { %927 = vmatmul.bf16.gmra.mxu1 %v4770_v17  ;;  %1076 = vmatpush.bf16.msrb.mxu3 %v3469_v47  ;;  %v3966_v47 = vld [vmem:[#allocation8 + $0xb4] sm:$0xf0] }
  0xc1   : > { %1016 = vmatmul.bf16.gmra.mxu2 %v4770_v17  ;;  %v3625_v51 = vor.u32 %v3966_v47, %v3624_v45  ;;  %v3537_v47 = vor.u32 %v3944_v42, %v3536_v41 }
  0xc2   : > { %1748 = vmatpush.bf16.msrb.mxu0 %v3553_v0  ;;  %v4006_v0 = vld [vmem:[#allocation8 + $0x1f4] sm:$0xf0] }
  0xc3   : > { %1836 = vmatpush.bf16.msrb.mxu1 %v3625_v51  ;;  %v3976_v51 = vld [vmem:[#allocation8 + $0x104] sm:$0xf0]  ;;  %v3785_v1 = vor.u32 %v4006_v0, %v3784_v62 }
  0xc4   : > { %v3665_v58 = vor.u32 %v3976_v51, %v3664_v50 }
  0xc7   : > { %1837 = vmatpush.bf16.msrb.mxu1 %v3617_v5 }
  0xcf   : > { %843 = vmatmul.bf16.gmra.mxu0 %v4777_v18  ;;  %972 = vmatmul.bf16.gmra.mxu3 %v4740_v14 }
  0xd0   : > { %932 = vmatmul.bf16.gmra.mxu1 %v4777_v18 }
  0xd1   : > { %1021 = vmatmul.bf16.gmra.mxu2 %v4777_v18 }
  0xdf   : > { %848 = vmatmul.bf16.gmra.mxu0 %v4784_v24  ;;  %977 = vmatmul.bf16.gmra.mxu3 %v4754_v16 }
  0xe0   : > { %937 = vmatmul.bf16.gmra.mxu1 %v4784_v24 }
  0xe1   : > { %1026 = vmatmul.bf16.gmra.mxu2 %v4784_v24 }
  0xec   : > { %v4793_v39 = vpop.f32.mrf.mxu0 }
  0xed   : > { %v4795_v40 = vpop.f32.mrf.mxu1 }
  0xef   : > { %853 = vmatmul.bf16.gmra.mxu0 %v4791_v38  ;;  %1051 = vmatmul.bf16.vlgmr.msra.gmra.mxu3 %v4716_v11  ;;  %v3453_v11 = vor.u32 %v3920_v3, %v3450_v4  ;;  %v3980_v3 = vld [vmem:[#allocation8 + $0x124] sm:$0xf0] }
  0xf0   : > { %942 = vmatmul.bf16.gmra.mxu1 %v4791_v38 }
  0xf1   : > { %1031 = vmatmul.bf16.gmra.mxu2 %v4791_v38  ;;  %1077 = vmatpush.bf16.msrb.mxu3 %v3453_v11  ;;  %v3681_v11 = vor.u32 %v3980_v3, %v3680_v2 }
  0xf2   : > { %v874_v48 = vpop.f32.mrf.mxu3 }
  0xf3   : > { %v875_v6 = vadd.f32 %v874_v48, %v4808_v60 }
  0xf4   : > { %v4803_v52 = vpop.f32.mrf.mxu2  ;;  %v4805_v57 = vpop.f32.mrf.mxu0 }
  0xf5   : > { %v4810_v61 = vpop.f32.mrf.mxu1  ;;  %v1257_v35 = vmax.f32 %v875_v6, 0.0  ;;  %1078 = vmatpush.bf16.msrb.mxu3 %v3437_v53 }
  0xf9   : > { %1079 = vmatpush.bf16.msrb.mxu3 %v3421_v31  ;;  %v4874_v31 = vperm.slane %v4801_v46, 1 }
  0xfa   : > { %v876_v21 = vpop.f32.mrf.mxu3 }
  0xfb   : > { %v877_v27 = vadd.f32 %v876_v21, %v4808_v60  ;;  %v3545_v21 = vor.u32 %v3946_v20, %v3544_v19  ;;  %v904_v41 = vadd.f32 %v4795_v40, %v4874_v31 }
  0xfc   : > { %v4817_v28 = vpop.f32.mrf.mxu2  ;;  %v4819_v33 = vpop.f32.mrf.mxu0 }
  0xfd   : > { %v1261_v36 = vmax.f32 %v877_v27, 0.0  ;;  %v4821_v37 = vpop.f32.mrf.mxu1  ;;  %v3609_v27 = vor.u32 %v3962_v23, %v3608_v22  ;;  %1749 = vmatpush.bf16.msrb.mxu0 %v3545_v21  ;;  %2010 = vmatpush.bf16.msra.mxu3 %v3785_v1  ;;  %v4863_v22 = vld [vmem:[%s4664_s11 + $0x58] sm:$0xff]  ;;  %v1162_v50 = vmax.f32 %v904_v41, 0.0 }
  0xff   : > { %858 = vmatmul.bf16.gmra.mxu0 %v4814_v9  ;;  %1056 = vmatmul.bf16.gmra.mxu3 %v4730_v13  ;;  %v4825_v48 = vpack.c.bf16 %v1261_v36, %v1257_v35  ;;  %v3689_v13 = vor.u32 %v3982_v55, %v3688_v54  ;;  %v3673_v36 = vor.u32 %v3978_v34, %v3672_v32  ;;  %v4877_v32 = vperm.slane %v4801_v46, 2 }
 0x100   : > { %947 = vmatmul.bf16.gmra.mxu1 %v4814_v9  ;;  %v3601_v54 = vor.u32 %v3960_v49, %v3600_v43  ;;  %v906_v43 = vadd.f32 %v4810_v61, %v4874_v31 }
 0x101   : > { %1036 = vmatmul.bf16.gmra.mxu2 %v4814_v9  ;;  %1838 = vmatpush.bf16.msrb.mxu1 %v3609_v27  ;;  %v993_v42 = vadd.f32 %v4803_v52, %v4877_v32 }
 0x102   : > { %v879_v56 = vpop.f32.mrf.mxu3  ;;  %1925 = vmatpush.bf16.msrb.mxu2 %v3689_v13  ;;  %1750 = vmatpush.bf16.msrb.mxu0 %v3537_v47 }
 0x103   : > { %v880_v29 = vadd.f32 %v879_v56, %v4808_v60  ;;  %v1163_v51 = vmax.f32 %v993_v42, 0.0 }
 0x104   : > { %v4829_v63 = vpop.f32.mrf.mxu2  ;;  %v4831_v4 = vpop.f32.mrf.mxu0 }
 0x105   : > { %v4833_v6 = vpop.f32.mrf.mxu1  ;;  %v1265_v55 = vmax.f32 %v880_v29, 0.0  ;;  %1839 = vmatpush.bf16.msrb.mxu1 %v3601_v54  ;;  %v1166_v54 = vmax.f32 %v906_v43, 0.0  ;;  %v998_v42 = vadd.f32 %v4829_v63, %v4877_v32 }
 0x106   : > { %1926 = vmatpush.bf16.msrb.mxu2 %v3681_v11  ;;  %v911_v43 = vadd.f32 %v4833_v6, %v4874_v31 }
 0x10a   : > { %v881_v35 = vpop.f32.mrf.mxu3  ;;  %1927 = vmatpush.bf16.msrb.mxu2 %v3673_v36  ;;  %v817_v36 = vadd.f32 %v4805_v57, %v4808_v60 }
 0x10b   : > { %v882_v44 = vadd.f32 %v881_v35, %v4808_v60  ;;  %v815_v35 = vadd.f32 %v4793_v39, %v4808_v60 }
 0x10c   : > { %v4840_v45 = vpop.f32.mrf.mxu2  ;;  %v4842_v53 = vpop.f32.mrf.mxu0  ;;  %v1165_v57 = vmax.f32 %v817_v36, 0.0  ;;  %v822_v36 = vadd.f32 %v4831_v4, %v4808_v60 }
 0x10d   : > { %v1269_v56 = vmax.f32 %v882_v44, 0.0  ;;  %v4844_v13 = vpop.f32.mrf.mxu1  ;;  %v995_v44 = vadd.f32 %v4817_v28, %v4877_v32  ;;  %v1161_v49 = vmax.f32 %v815_v35, 0.0  ;;  %v4905_v28 = vpack.c.bf16 %v1166_v54, %v1162_v50 }
 0x10e   : > { %1928 = vmatpush.bf16.msrb.mxu2 %v3665_v58  ;;  %v820_v35 = vadd.f32 %v4819_v33, %v4808_v60  ;;  %v1174_v54 = vmax.f32 %v911_v43, 0.0 }
 0x10f   : > { %863 = vmatmul.bf16.gmra.mxu0 %v4837_v30  ;;  %1061 = vmatmul.bf16.gmra.mxu3 %v4740_v14  ;;  %v4848_v59 = vpack.c.bf16 %v1269_v56, %v1265_v55  ;;  %v1167_v55 = vmax.f32 %v995_v44, 0.0  ;;  %v4900_v52 = vpack.c.bf16 %v1165_v57, %v1161_v49  ;;  %v1000_v44 = vadd.f32 %v4840_v45, %v4877_v32 }
 0x110   : > { %952 = vmatmul.bf16.gmra.mxu1 %v4837_v30  ;;  %v1169_v4 = vmax.f32 %v820_v35, 0.0  ;;  %v1173_v57 = vmax.f32 %v822_v36, 0.0  ;;  %v825_v35 = vadd.f32 %v4842_v53, %v4808_v60 }
 0x111   : > { %6104 = vst [vmem:[#allocation22_spill] sm:$0xff] %v4848_v59  ;;  %1041 = vmatmul.bf16.gmra.mxu2 %v4837_v30  ;;  %v4907_v62 = vpack.c.bf16 %v1167_v55, %v1163_v51  ;;  %v1171_v51 = vmax.f32 %v998_v42, 0.0  ;;  %v1175_v55 = vmax.f32 %v1000_v44, 0.0 }
 0x112   : > { %v884_v2 = vpop.f32.mrf.mxu3  ;;  %v4941_v6 = vpack.c.bf16 %v1173_v57, %v1169_v4  ;;  %v1177_v57 = vmax.f32 %v825_v35, 0.0 }
 0x113   : > { %v885_v14 = vadd.f32 %v884_v2, %v4808_v60 }
 0x114   : > { %v4852_v3 = vpop.f32.mrf.mxu2  ;;  %v4854_v5 = vpop.f32.mrf.mxu0 }
 0x115   : > { %v4856_v11 = vpop.f32.mrf.mxu1  ;;  %v1273_v25 = vmax.f32 %v885_v14, 0.0  ;;  %v827_v36 = vadd.f32 %v4854_v5, %v4808_v60  ;;  %v1003_v42 = vadd.f32 %v4852_v3, %v4877_v32 }
 0x116   : > { %v916_v43 = vadd.f32 %v4856_v11, %v4874_v31 }
 0x117   : > { %v1181_v5 = vmax.f32 %v827_v36, 0.0 }
 0x119   : > { %v4979_v11 = vpack.c.bf16 %v1181_v5, %v1177_v57 }
 0x11a   : > { %v886_v19 = vpop.f32.mrf.mxu3 }
 0x11b   : > { %v887_v20 = vadd.f32 %v886_v19, %v4808_v60  ;;  %6105 = vst [vmem:[#allocation23_spill] sm:$0xff] %v4979_v11 }
 0x11c   : > { %v4860_v21 = vpop.f32.mrf.mxu2  ;;  %v4865_v23 = vpop.f32.mrf.mxu0 }
 0x11d   : > { %v1277_v26 = vmax.f32 %v887_v20, 0.0  ;;  %v4867_v27 = vpop.f32.mrf.mxu1  ;;  %v3776_v20 = vld [vmem:[#allocation8 + $0x1e0] sm:$0xf]  ;;  %v1005_v44 = vadd.f32 %v4860_v21, %v4877_v32  ;;  %v830_v57 = vadd.f32 %v4865_v23, %v4808_v60 }
 0x11f   : > { %868 = vmatmul.bf16.gmra.mxu0 %v4863_v22  ;;  %1066 = vmatmul.bf16.gmra.mxu3 %v4754_v16  ;;  %v4871_v29 = vpack.c.bf16 %v1277_v26, %v1273_v25  ;;  %v4004_v25 = vld [vmem:[#allocation8 + $0x1e4] sm:$0xf0] }
 0x120   : > { %957 = vmatmul.bf16.gmra.mxu1 %v4863_v22  ;;  %v3777_v26 = vor.u32 %v4004_v25, %v3776_v20 }
 0x121   : > { %1046 = vmatmul.bf16.gmra.mxu2 %v4863_v22 }
 0x122   : > { %v889_v34 = vpop.f32.mrf.mxu3  ;;  %2011 = vmatpush.bf16.msra.mxu3 %v3777_v26 }
 0x123   : > { %v890_v40 = vadd.f32 %v889_v34, %v4808_v60 }
 0x124   : > { %v4885_v16 = vpop.f32.mrf.mxu2  ;;  %v4895_v47 = vpop.f32.mrf.mxu0 }
 0x125   : > { %v4897_v39 = vpop.f32.mrf.mxu1  ;;  %v1281_v1 = vmax.f32 %v890_v40, 0.0  ;;  %v832_v5 = vadd.f32 %v4895_v47, %v4808_v60  ;;  %v1185_v47 = vmax.f32 %v830_v57, 0.0 }
 0x12a   : > { %v891_v56 = vpop.f32.mrf.mxu3 }
 0x12b   : > { %v892_v61 = vadd.f32 %v891_v56, %v4808_v60 }
 0x12c   : > { %v4903_v58 = vpop.f32.mrf.mxu2  ;;  %v4909_v0 = vpop.f32.mrf.mxu0 }
 0x12d   : > { %v1285_v2 = vmax.f32 %v892_v61, 0.0  ;;  %v4911_v14 = vpop.f32.mrf.mxu1 }
 0x12f   : > { %1080 = vmatmul.bf16.vlgmr.msrb.gmra.mxu3 %v4713_v10  ;;  %1751 = vmatmul.bf16.vlgmr.msrb.gmra.mxu0 %v4900_v52  ;;  %v4915_v19 = vpack.c.bf16 %v1285_v2, %v1281_v1  ;;  %v909_v10 = vadd.f32 %v4821_v37, %v4874_v31  ;;  %v4947_v1 = vpack.c.bf16 %v1175_v55, %v1171_v51  ;;  %v1179_v51 = vmax.f32 %v1003_v42, 0.0  ;;  %v4002_v42 = vld [vmem:[#allocation8 + $0x1d4] sm:$0xf0] }
 0x130   : > { %1840 = vmatmul.bf16.vlgmr.msrb.gmra.mxu1 %v4905_v28  ;;  %v1183_v55 = vmax.f32 %v1005_v44, 0.0 }
 0x131   : > { %1929 = vmatmul.bf16.vlgmr.msrb.gmra.mxu2 %v4907_v62  ;;  %v1170_v50 = vmax.f32 %v909_v10, 0.0 }
 0x132   : > { %v963_v34 = vpop.f32.mrf.mxu3 }
 0x133   : > { %v964_v37 = vadd.f32 %v963_v34, %v4874_v31  ;;  %v4945_v61 = vpack.c.bf16 %v1174_v54, %v1170_v50  ;;  %v1182_v54 = vmax.f32 %v916_v43, 0.0 }
 0x134   : > { %v4923_v41 = vpop.f32.mrf.mxu2  ;;  %v4933_v49 = vpop.f32.mrf.mxu0 }
 0x135   : > { %v4935_v33 = vpop.f32.mrf.mxu1  ;;  %v1258_v2 = vmax.f32 %v964_v37, 0.0 }
 0x13a   : > { %v965_v40 = vpop.f32.mrf.mxu3 }
 0x13b   : > { %v966_v63 = vadd.f32 %v965_v40, %v4874_v31 }
 0x13c   : > { %v4939_v56 = vpop.f32.mrf.mxu2  ;;  %v4943_v45 = vpop.f32.mrf.mxu0 }
 0x13d   : > { %v1262_v20 = vmax.f32 %v966_v63, 0.0  ;;  %v4949_v25 = vpop.f32.mrf.mxu1 }
 0x13f   : > { %1085 = vmatmul.bf16.gmra.mxu3 %v4727_v12  ;;  %1756 = vmatmul.bf16.gmra.mxu0 %v4941_v6  ;;  %v4953_v26 = vpack.c.bf16 %v1262_v20, %v1258_v2  ;;  %v914_v12 = vadd.f32 %v4844_v13, %v4874_v31  ;;  %v4985_v2 = vpack.c.bf16 %v1183_v55, %v1179_v51 }
 0x140   : > { %1845 = vmatmul.bf16.gmra.mxu1 %v4945_v61  ;;  %v1008_v51 = vadd.f32 %v4885_v16, %v4877_v32  ;;  %v1010_v55 = vadd.f32 %v4903_v58, %v4877_v32 }
 0x141   : > { %1934 = vmatmul.bf16.gmra.mxu2 %v4947_v1  ;;  %v1178_v50 = vmax.f32 %v914_v12, 0.0  ;;  %6107 = vst [vmem:[#allocation25_spill] sm:$0xff] %v4985_v2  ;;  %v3768_v12 = vld [vmem:[#allocation8 + $0x1d0] sm:$0xf] }
 0x142   : > { %v968_v34 = vpop.f32.mrf.mxu3  ;;  %v3769_v43 = vor.u32 %v4002_v42, %v3768_v12  ;;  %v1191_v12 = vmax.f32 %v1010_v55, 0.0  ;;  %v837_v55 = vadd.f32 %v4933_v49, %v4808_v60 }
 0x143   : > { %v969_v13 = vadd.f32 %v968_v34, %v4874_v31  ;;  %v4983_v63 = vpack.c.bf16 %v1182_v54, %v1178_v50  ;;  %v921_v54 = vadd.f32 %v4897_v39, %v4874_v31 }
 0x144   : > { %v4961_v10 = vpop.f32.mrf.mxu2  ;;  %v4971_v4 = vpop.f32.mrf.mxu0  ;;  %2012 = vmatpush.bf16.msra.mxu3 %v3769_v43  ;;  %v1197_v49 = vmax.f32 %v837_v55, 0.0 }
 0x145   : > { %v4973_v53 = vpop.f32.mrf.mxu1  ;;  %6106 = vst [vmem:[#allocation24_spill] sm:$0xff] %v4983_v63  ;;  %v1266_v20 = vmax.f32 %v969_v13, 0.0 }
 0x14a   : > { %v970_v37 = vpop.f32.mrf.mxu3 }
 0x14b   : > { %v971_v3 = vadd.f32 %v970_v37, %v4874_v31  ;;  %v1189_v37 = vmax.f32 %v832_v5, 0.0 }
 0x14c   : > { %v4977_v40 = vpop.f32.mrf.mxu2  ;;  %v4981_v21 = vpop.f32.mrf.mxu0 }
 0x14d   : > { %v1270_v35 = vmax.f32 %v971_v3, 0.0  ;;  %v4987_v36 = vpop.f32.mrf.mxu1  ;;  %v5017_v39 = vpack.c.bf16 %v1189_v37, %v1185_v47  ;;  %v1013_v37 = vadd.f32 %v4923_v41, %v4877_v32 }
 0x14f   : > { %1090 = vmatmul.bf16.gmra.mxu3 %v4737_v7  ;;  %1761 = vmatmul.bf16.gmra.mxu0 %v4979_v11  ;;  %v4991_v34 = vpack.c.bf16 %v1270_v35, %v1266_v20  ;;  %v919_v7 = vadd.f32 %v4867_v27, %v4874_v31  ;;  %v1187_v20 = vmax.f32 %v1008_v51, 0.0  ;;  %v1190_v35 = vmax.f32 %v921_v54, 0.0  ;;  %6109 = vst [vmem:[#allocation27_spill] sm:$0xff] %v5017_v39 }
 0x150   : > { %1850 = vmatmul.bf16.gmra.mxu1 %v4983_v63  ;;  %v835_v54 = vadd.f32 %v4909_v0, %v4808_v60 }
 0x151   : > { %6108 = vst [vmem:[#allocation26_spill] sm:$0xff] %v4991_v34  ;;  %1939 = vmatmul.bf16.gmra.mxu2 %v4985_v2  ;;  %v1186_v3 = vmax.f32 %v919_v7, 0.0  ;;  %v5023_v63 = vpack.c.bf16 %v1191_v12, %v1187_v20  ;;  %v1015_v20 = vadd.f32 %v4939_v56, %v4877_v32 }
 0x152   : > { %v973_v44 = vpop.f32.mrf.mxu3  ;;  %v1193_v12 = vmax.f32 %v835_v54, 0.0 }
 0x153   : > { %v974_v27 = vadd.f32 %v973_v44, %v4874_v31  ;;  %v5021_v2 = vpack.c.bf16 %v1190_v35, %v1186_v3  ;;  %6111 = vst [vmem:[#allocation29_spill] sm:$0xff] %v5023_v63  ;;  %v926_v3 = vadd.f32 %v4935_v33, %v4874_v31 }
 0x154   : > { %v4999_v50 = vpop.f32.mrf.mxu2  ;;  %v5009_v13 = vpop.f32.mrf.mxu0  ;;  %v5055_v33 = vpack.c.bf16 %v1197_v49, %v1193_v12  ;;  %v840_v49 = vadd.f32 %v4943_v45, %v4808_v60 }
 0x155   : > { %v5011_v23 = vpop.f32.mrf.mxu1  ;;  %6110 = vst [vmem:[#allocation28_spill] sm:$0xff] %v5021_v2  ;;  %v1274_v57 = vmax.f32 %v974_v27, 0.0 }
 0x156   : > { %6112 = vst [vmem:[#allocation30_spill] sm:$0xff] %v5055_v33 }
 0x15a   : > { %v975_v42 = vpop.f32.mrf.mxu3 }
 0x15b   : > { %v976_v16 = vadd.f32 %v975_v42, %v4874_v31  ;;  %v1195_v42 = vmax.f32 %v1013_v37, 0.0  ;;  %v3760_v37 = vld [vmem:[#allocation8 + $0x1c0] sm:$0xf] }
 0x15c   : > { %v5015_v43 = vpop.f32.mrf.mxu2  ;;  %v5019_v58 = vpop.f32.mrf.mxu0 }
 0x15d   : > { %v1278_v5 = vmax.f32 %v976_v16, 0.0  ;;  %v5025_v7 = vpop.f32.mrf.mxu1  ;;  %v1198_v16 = vmax.f32 %v926_v3, 0.0  ;;  %v4000_v3 = vld [vmem:[#allocation8 + $0x1c4] sm:$0xf0] }
 0x15f   : > { %1095 = vmatmul.bf16.gmra.mxu3 %v4751_v15  ;;  %1766 = vmatmul.bf16.gmra.mxu0 %v5017_v39  ;;  %v5029_v44 = vpack.c.bf16 %v1278_v5, %v1274_v57  ;;  %v924_v15 = vadd.f32 %v4911_v14, %v4874_v31  ;;  %v1199_v57 = vmax.f32 %v1015_v20, 0.0  ;;  %v3761_v20 = vor.u32 %v4000_v3, %v3760_v37 }
 0x160   : > { %1855 = vmatmul.bf16.gmra.mxu1 %v5021_v2 }
 0x161   : > { %1944 = vmatmul.bf16.gmra.mxu2 %v5023_v63  ;;  %v1194_v27 = vmax.f32 %v924_v15, 0.0  ;;  %v5061_v39 = vpack.c.bf16 %v1199_v57, %v1195_v42  ;;  %2013 = vmatpush.bf16.msra.mxu3 %v3761_v20  ;;  %v931_v57 = vadd.f32 %v4973_v53, %v4874_v31 }
 0x162   : > { %v978_v51 = vpop.f32.mrf.mxu3 }
 0x163   : > { %v979_v14 = vadd.f32 %v978_v51, %v4874_v31  ;;  %v5059_v2 = vpack.c.bf16 %v1198_v16, %v1194_v27  ;;  %6114 = vst [vmem:[#allocation32_spill] sm:$0xff] %v5061_v39  ;;  %v842_v27 = vadd.f32 %v4971_v4, %v4808_v60  ;;  %v1018_v16 = vadd.f32 %v4961_v10, %v4877_v32 }
 0x164   : > { %v5037_v47 = vpop.f32.mrf.mxu2  ;;  %v5047_v35 = vpop.f32.mrf.mxu0  ;;  %v1201_v4 = vmax.f32 %v840_v49, 0.0  ;;  %v1206_v37 = vmax.f32 %v931_v57, 0.0  ;;  %v845_v57 = vadd.f32 %v4981_v21, %v4808_v60 }
 0x165   : > { %v5049_v0 = vpop.f32.mrf.mxu1  ;;  %6113 = vst [vmem:[#allocation31_spill] sm:$0xff] %v5059_v2  ;;  %v1282_v54 = vmax.f32 %v979_v14, 0.0  ;;  %v1020_v14 = vadd.f32 %v4977_v40, %v4877_v32 }
 0x167   : > { %v1207_v3 = vmax.f32 %v1020_v14, 0.0  ;;  %v847_v14 = vadd.f32 %v5009_v13, %v4808_v60 }
 0x169   : > { %v1213_v13 = vmax.f32 %v847_v14, 0.0 }
 0x16a   : > { %v980_v5 = vpop.f32.mrf.mxu3 }
 0x16b   : > { %v981_v41 = vadd.f32 %v980_v5, %v4874_v31 }
 0x16c   : > { %v5053_v63 = vpop.f32.mrf.mxu2  ;;  %v5057_v56 = vpop.f32.mrf.mxu0 }
 0x16d   : > { %v1286_v55 = vmax.f32 %v981_v41, 0.0  ;;  %v5063_v15 = vpop.f32.mrf.mxu1  ;;  %v1205_v41 = vmax.f32 %v842_v27, 0.0 }
 0x16f   : > { %1100 = vmatmul.bf16.gmra.mxu3 %v4763_v8  ;;  %1771 = vmatmul.bf16.gmra.mxu0 %v5055_v33  ;;  %v5067_v51 = vpack.c.bf16 %v1286_v55, %v1282_v54  ;;  %v929_v8 = vadd.f32 %v4949_v25, %v4874_v31  ;;  %v1203_v55 = vmax.f32 %v1018_v16, 0.0 }
 0x170   : > { %1860 = vmatmul.bf16.gmra.mxu1 %v5059_v2 }
 0x171   : > { %1949 = vmatmul.bf16.gmra.mxu2 %v5061_v39  ;;  %v1202_v54 = vmax.f32 %v929_v8, 0.0  ;;  %v5093_v39 = vpack.c.bf16 %v1205_v41, %v1201_v4  ;;  %v5099_v33 = vpack.c.bf16 %v1207_v3, %v1203_v55  ;;  %v1023_v41 = vadd.f32 %v4999_v50, %v4877_v32 }
 0x172   : > { %v1052_v12 = vpop.f32.mrf.mxu3  ;;  %v1025_v55 = vadd.f32 %v5015_v43, %v4877_v32  ;;  %v1209_v3 = vmax.f32 %v845_v57, 0.0 }
 0x173   : > { %v1053_v25 = vadd.f32 %v1052_v12, %v4877_v32  ;;  %6115 = vst [vmem:[#allocation33_spill] sm:$0xff] %v5093_v39  ;;  %v5097_v2 = vpack.c.bf16 %v1206_v37, %v1202_v54  ;;  %v936_v54 = vadd.f32 %v5011_v23, %v4874_v31 }
 0x174   : > { %v5075_v42 = vpop.f32.mrf.mxu2  ;;  %v5085_v5 = vpop.f32.mrf.mxu0  ;;  %6117 = vst [vmem:[#allocation35_spill] sm:$0xff] %v5099_v33 }
 0x175   : > { %v5087_v45 = vpop.f32.mrf.mxu1  ;;  %6116 = vst [vmem:[#allocation34_spill] sm:$0xff] %v5097_v2  ;;  %v1259_v49 = vmax.f32 %v1053_v25, 0.0 }
 0x17a   : > { %v1054_v20 = vpop.f32.mrf.mxu3 }
 0x17b   : > { %v1055_v53 = vadd.f32 %v1054_v20, %v4877_v32  ;;  %v1211_v20 = vmax.f32 %v1023_v41, 0.0  ;;  %v3752_v41 = vld [vmem:[#allocation8 + $0x1b0] sm:$0xf] }
 0x17c   : > { %v5090_v10 = vpop.f32.mrf.mxu2  ;;  %v5095_v40 = vpop.f32.mrf.mxu0 }
 0x17d   : > { %v1263_v27 = vmax.f32 %v1055_v53, 0.0  ;;  %v5101_v8 = vpop.f32.mrf.mxu1  ;;  %v1214_v53 = vmax.f32 %v936_v54, 0.0  ;;  %v3998_v54 = vld [vmem:[#allocation8 + $0x1b4] sm:$0xf0] }
 0x17f   : > { %1105 = vmatmul.bf16.gmra.mxu3 %v4770_v17  ;;  %1776 = vmatmul.bf16.gmra.mxu0 %v5093_v39  ;;  %v5105_v12 = vpack.c.bf16 %v1263_v27, %v1259_v49  ;;  %v934_v17 = vadd.f32 %v4987_v36, %v4874_v31  ;;  %v1215_v49 = vmax.f32 %v1025_v55, 0.0  ;;  %v3753_v55 = vor.u32 %v3998_v54, %v3752_v41 }
 0x180   : > { %1865 = vmatmul.bf16.gmra.mxu1 %v5097_v2 }
 0x181   : > { %1954 = vmatmul.bf16.gmra.mxu2 %v5099_v33  ;;  %v1210_v25 = vmax.f32 %v934_v17, 0.0  ;;  %v5131_v33 = vpack.c.bf16 %v1213_v13, %v1209_v3  ;;  %v5137_v39 = vpack.c.bf16 %v1215_v49, %v1211_v20  ;;  %v850_v13 = vadd.f32 %v5019_v58, %v4808_v60  ;;  %2014 = vmatpush.bf16.msra.mxu3 %v3753_v55 }
 0x182   : > { %v1057_v16 = vpop.f32.mrf.mxu3  ;;  %v941_v49 = vadd.f32 %v5049_v0, %v4874_v31 }
 0x183   : > { %v1058_v36 = vadd.f32 %v1057_v16, %v4877_v32  ;;  %6118 = vst [vmem:[#allocation36_spill] sm:$0xff] %v5131_v33  ;;  %v5135_v2 = vpack.c.bf16 %v1214_v53, %v1210_v25  ;;  %v852_v25 = vadd.f32 %v5047_v35, %v4808_v60  ;;  %v1028_v53 = vadd.f32 %v5037_v47, %v4877_v32 }
 0x184   : > { %v5113_v4 = vpop.f32.mrf.mxu2  ;;  %v5123_v37 = vpop.f32.mrf.mxu0  ;;  %6120 = vst [vmem:[#allocation38_spill] sm:$0xff] %v5137_v39  ;;  %v1217_v35 = vmax.f32 %v850_v13, 0.0  ;;  %v1222_v41 = vmax.f32 %v941_v49, 0.0  ;;  %v3594_v49 = vld [vmem:[#allocation8 + $0x78] sm:$0xf0] }
 0x185   : > { %v5125_v21 = vpop.f32.mrf.mxu1  ;;  %6119 = vst [vmem:[#allocation37_spill] sm:$0xff] %v5135_v2  ;;  %v1267_v57 = vmax.f32 %v1058_v36, 0.0  ;;  %v1030_v36 = vadd.f32 %v5053_v63, %v4877_v32 }
 0x187   : > { %v1223_v54 = vmax.f32 %v1030_v36, 0.0 }
 0x18a   : > { %v1059_v27 = vpop.f32.mrf.mxu3 }
 0x18b   : > { %v1060_v23 = vadd.f32 %v1059_v27, %v4877_v32 }
 0x18c   : > { %v5128_v50 = vpop.f32.mrf.mxu2  ;;  %v5133_v43 = vpop.f32.mrf.mxu0 }
 0x18d   : > { %v1271_v14 = vmax.f32 %v1060_v23, 0.0  ;;  %v5139_v17 = vpop.f32.mrf.mxu1  ;;  %v1221_v23 = vmax.f32 %v852_v25, 0.0 }
 0x18f   : > { %1110 = vmatmul.bf16.gmra.mxu3 %v4777_v18  ;;  %1781 = vmatmul.bf16.gmra.mxu0 %v5131_v33  ;;  %v5143_v16 = vpack.c.bf16 %v1271_v14, %v1267_v57  ;;  %v939_v18 = vadd.f32 %v5025_v7, %v4874_v31  ;;  %v1219_v14 = vmax.f32 %v1028_v53, 0.0  ;;  %v3957_v53 = vld [vmem:[#allocation8 + $0x74] sm:$0xf] }
 0x190   : > { %1870 = vmatmul.bf16.gmra.mxu1 %v5135_v2  ;;  %v3597_v36 = vor.u32 %v3957_v53, %v3594_v49 }
 0x191   : > { %6121 = vst [vmem:[#allocation39_spill] sm:$0xff] %v5143_v16  ;;  %1959 = vmatmul.bf16.gmra.mxu2 %v5137_v39  ;;  %v1218_v57 = vmax.f32 %v939_v18, 0.0  ;;  %v5169_v39 = vpack.c.bf16 %v1221_v23, %v1217_v35  ;;  %v5175_v33 = vpack.c.bf16 %v1223_v54, %v1219_v14  ;;  %v3973_v35 = vld [vmem:[#allocation8 + $0xf4] sm:$0xf]  ;;  %v3658_v23 = vld [vmem:[#allocation8 + $0xf8] sm:$0xf0] }
 0x192   : > { %v1062_v3 = vpop.f32.mrf.mxu3  ;;  %v3661_v14 = vor.u32 %v3973_v35, %v3658_v23  ;;  %2099 = vmatpush.bf16.msra.mxu0 %v3597_v36 }
 0x193   : > { %v1063_v7 = vadd.f32 %v1062_v3, %v4877_v32  ;;  %6122 = vst [vmem:[#allocation40_spill] sm:$0xff] %v5169_v39  ;;  %v5173_v2 = vpack.c.bf16 %v1222_v41, %v1218_v57  ;;  %v855_v41 = vadd.f32 %v5057_v56, %v4808_v60 }
 0x194   : > { %v5151_v20 = vpop.f32.mrf.mxu2  ;;  %v5161_v27 = vpop.f32.mrf.mxu0  ;;  %6124 = vst [vmem:[#allocation42_spill] sm:$0xff] %v5175_v33  ;;  %2188 = vmatpush.bf16.msra.mxu1 %v3661_v14 }
 0x195   : > { %v5163_v58 = vpop.f32.mrf.mxu1  ;;  %6123 = vst [vmem:[#allocation41_spill] sm:$0xff] %v5173_v2  ;;  %v1275_v13 = vmax.f32 %v1063_v7, 0.0  ;;  %v944_v7 = vadd.f32 %v5063_v15, %v4874_v31  ;;  %v1225_v53 = vmax.f32 %v855_v41, 0.0 }
 0x197   : > { %v1226_v49 = vmax.f32 %v944_v7, 0.0 }
 0x19a   : > { %v1064_v55 = vpop.f32.mrf.mxu3 }
 0x19b   : > { %v1065_v0 = vadd.f32 %v1064_v55, %v4877_v32  ;;  %v1033_v55 = vadd.f32 %v5075_v42, %v4877_v32 }
 0x19c   : > { %v5166_v47 = vpop.f32.mrf.mxu2  ;;  %v5171_v63 = vpop.f32.mrf.mxu0 }
 0x19d   : > { %v1279_v25 = vmax.f32 %v1065_v0, 0.0  ;;  %v5177_v18 = vpop.f32.mrf.mxu1  ;;  %v946_v0 = vadd.f32 %v5087_v45, %v4874_v31  ;;  %v1227_v36 = vmax.f32 %v1033_v55, 0.0 }
 0x19f   : > { %1115 = vmatmul.bf16.gmra.mxu3 %v4784_v24  ;;  %1786 = vmatmul.bf16.gmra.mxu0 %v5169_v39  ;;  %v5181_v3 = vpack.c.bf16 %v1279_v25, %v1275_v13  ;;  %v857_v24 = vadd.f32 %v5085_v5, %v4808_v60  ;;  %v1035_v13 = vadd.f32 %v5090_v10, %v4877_v32  ;;  %v1417_v5 = vld [vmem:[%s6050_s4] sm:$0x3]  ;;  %v1230_v42 = vmax.f32 %v946_v0, 0.0 }
 0x1a0   : > { %1875 = vmatmul.bf16.gmra.mxu1 %v5173_v2  ;;  %v5207_v23 = vperm.slane %v1417_v5, 0  ;;  %v3744_v5 = vld [vmem:[#allocation8 + $0x1a0] sm:$0xf] }
 0x1a1   : > { %1964 = vmatmul.bf16.gmra.mxu2 %v5175_v33  ;;  %v1229_v15 = vmax.f32 %v857_v24, 0.0  ;;  %v1231_v35 = vmax.f32 %v1035_v13, 0.0  ;;  %v5214_v11 = vpack.c.bf16 %v1230_v42, %v1226_v49 }
 0x1a2   : > { %v1067_v57 = vpop.f32.mrf.mxu3 }
 0x1a3   : > { %v1068_v45 = vadd.f32 %v1067_v57, %v4877_v32  ;;  %v5212_v2 = vpack.c.bf16 %v1229_v15, %v1225_v53  ;;  %v5216_v41 = vpack.c.bf16 %v1231_v35, %v1227_v36  ;;  %v3996_v53 = vld [vmem:[#allocation8 + $0x1a4] sm:$0xf0]  ;;  %v860_v36 = vadd.f32 %v5095_v40, %v4808_v60 }
 0x1a4   : > { %v5189_v54 = vpop.f32.mrf.mxu2  ;;  %v5199_v25 = vpop.f32.mrf.mxu0  ;;  %v3745_v15 = vor.u32 %v3996_v53, %v3744_v5  ;;  %v1038_v35 = vadd.f32 %v5113_v4, %v4877_v32 }
 0x1a5   : > { %v5201_v56 = vpop.f32.mrf.mxu1  ;;  %6125 = vst [vmem:[#allocation43_spill] sm:$0xff] %v5216_v41  ;;  %v1283_v24 = vmax.f32 %v1068_v45, 0.0  ;;  %v951_v45 = vadd.f32 %v5125_v21, %v4874_v31 }
 0x1a6   : > { %2015 = vmatpush.bf16.msra.mxu3 %v3745_v15  ;;  %v1235_v4 = vmax.f32 %v1038_v35, 0.0 }
 0x1a7   : > { %v1238_v53 = vmax.f32 %v951_v45, 0.0 }
 0x1aa   : > { %v1069_v10 = vpop.f32.mrf.mxu3 }
 0x1ab   : > { %v1070_v14 = vadd.f32 %v1069_v10, %v4877_v32  ;;  %v1040_v10 = vadd.f32 %v5128_v50, %v4877_v32 }
 0x1ac   : > { %v5209_v33 = vpop.f32.mrf.mxu2  ;;  %v1752_v39 = vpop.f32.mrf.mxu0 }
 0x1ad   : > { %v1287_v7 = vmax.f32 %v1070_v14, 0.0  ;;  %v1753_v55 = vadd.f32 %v1752_v39, %v5207_v23  ;;  %v1841_v0 = vpop.f32.mrf.mxu1  ;;  %v949_v39 = vadd.f32 %v5101_v8, %v4874_v31  ;;  %v1239_v15 = vmax.f32 %v1040_v10, 0.0 }
 0x1af   : > { %v1842_v57 = vadd.f32 %v1841_v0, %v1753_v55  ;;  %1120 = vmatmul.bf16.gmra.mxu3 %v4791_v38  ;;  %1791 = vmatmul.bf16.gmra.mxu0 %v5212_v2  ;;  %v5221_v13 = vpack.c.bf16 %v1287_v7, %v1283_v24  ;;  %v862_v38 = vadd.f32 %v5123_v37, %v4808_v60  ;;  %v5240_v24 = vperm.slane %v4801_v46, 3 }
 0x1b0   : > { %1880 = vmatmul.bf16.gmra.mxu1 %v5214_v11  ;;  %v1233_v7 = vmax.f32 %v860_v36, 0.0  ;;  %v1234_v5 = vmax.f32 %v949_v39, 0.0  ;;  %v5251_v36 = vpack.c.bf16 %v1239_v15, %v1235_v4  ;;  %v954_v4 = vadd.f32 %v5139_v17, %v4874_v31 }
 0x1b1   : > { %1969 = vmatmul.bf16.gmra.mxu2 %v5216_v41  ;;  %v1237_v55 = vmax.f32 %v862_v38, 0.0  ;;  %v1043_v15 = vadd.f32 %v5151_v20, %v4877_v32 }
 0x1b2   : > { %v1081_v49 = vpop.f32.mrf.mxu3 }
 0x1b3   : > { %v1082_v21 = vadd.f32 %v1081_v49, %v5240_v24 }
 0x1b4   : > { %v1930_v42 = vpop.f32.mrf.mxu2  ;;  %v1754_v40 = vpop.f32.mrf.mxu0 }
 0x1b5   : > { %v5237_v14 = vadd.f32 %v1930_v42, %v1842_v57  ;;  %v1755_v8 = vadd.f32 %v1754_v40, %v5207_v23  ;;  %v1843_v37 = vpop.f32.mrf.mxu1  ;;  %v5245_v42 = vpack.c.bf16 %v1237_v55, %v1233_v7  ;;  %v5249_v40 = vpack.c.bf16 %v1238_v53, %v1234_v5  ;;  %v3650_v55 = vld [vmem:[#allocation8 + $0xe8] sm:$0xf0] }
 0x1b6   : > { %v1164_v38 = vmax.f32 %v1082_v21, 0.0  ;;  %v956_v21 = vadd.f32 %v5163_v58, %v4874_v31 }
 0x1b7   : > { %6126 = vst [vmem:[#allocation44_spill] sm:$0xff] %v5237_v14  ;;  %v1844_v0 = vadd.f32 %v1843_v37, %v1755_v8  ;;  %v3586_v8 = vld [vmem:[#allocation8 + $0x68] sm:$0xf0]  ;;  %v3971_v37 = vld [vmem:[#allocation8 + $0xe4] sm:$0xf] }
 0x1b8   : > { %v3653_v5 = vor.u32 %v3971_v37, %v3650_v55 }
 0x1ba   : > { %v1083_v41 = vpop.f32.mrf.mxu3  ;;  %2189 = vmatpush.bf16.msra.mxu1 %v3653_v5 }
 0x1bb   : > { %v1084_v50 = vadd.f32 %v1083_v41, %v5240_v24  ;;  %v3955_v41 = vld [vmem:[#allocation8 + $0x64] sm:$0xf] }
 0x1bc   : > { %v1932_v57 = vpop.f32.mrf.mxu2  ;;  %v1757_v14 = vpop.f32.mrf.mxu0  ;;  %v3589_v7 = vor.u32 %v3955_v41, %v3586_v8  ;;  %v1243_v41 = vmax.f32 %v1043_v15, 0.0  ;;  %v1246_v8 = vmax.f32 %v956_v21, 0.0 }
 0x1bd   : > { %v5247_v46 = vadd.f32 %v1932_v57, %v1844_v0  ;;  %v1168_v39 = vmax.f32 %v1084_v50, 0.0  ;;  %v1758_v35 = vadd.f32 %v1757_v14, %v5207_v23  ;;  %v1846_v45 = vpop.f32.mrf.mxu1  ;;  %v865_v14 = vadd.f32 %v5133_v43, %v4808_v60 }
 0x1be   : > { %2100 = vmatpush.bf16.msra.mxu0 %v3589_v7  ;;  %v1045_v50 = vadd.f32 %v5166_v47, %v4877_v32 }
 0x1bf   : > { %v5254_v10 = vpack.c.bf16 %v1168_v39, %v1164_v38  ;;  %v1847_v49 = vadd.f32 %v1846_v45, %v1758_v35  ;;  %1125 = vmatmul.bf16.gmra.mxu3 %v4814_v9  ;;  %1796 = vmatmul.bf16.gmra.mxu0 %v5245_v42  ;;  %v867_v9 = vadd.f32 %v5161_v27, %v4808_v60  ;;  %v1241_v39 = vmax.f32 %v865_v14, 0.0 }
 0x1c0   : > { %1885 = vmatmul.bf16.gmra.mxu1 %v5249_v40  ;;  %v1242_v45 = vmax.f32 %v954_v4, 0.0  ;;  %v1247_v20 = vmax.f32 %v1045_v50, 0.0 }
 0x1c1   : > { %1974 = vmatmul.bf16.gmra.mxu2 %v5251_v36  ;;  %v1245_v27 = vmax.f32 %v867_v9, 0.0 }
 0x1c2   : > { %v1086_v0 = vpop.f32.mrf.mxu3  ;;  %v5283_v14 = vpack.c.bf16 %v1247_v20, %v1243_v41  ;;  %v1048_v41 = vadd.f32 %v5189_v54, %v4877_v32  ;;  %v1050_v20 = vadd.f32 %v5209_v33, %v4877_v32 }
 0x1c3   : > { %v1087_v37 = vadd.f32 %v1086_v0, %v5240_v24 }
 0x1c4   : > { %v1935_v53 = vpop.f32.mrf.mxu2  ;;  %v1759_v43 = vpop.f32.mrf.mxu0 }
 0x1c5   : > { %v5272_v57 = vadd.f32 %v1935_v53, %v1847_v49  ;;  %v1760_v17 = vadd.f32 %v1759_v43, %v5207_v23  ;;  %v1848_v38 = vpop.f32.mrf.mxu1  ;;  %v5277_v49 = vpack.c.bf16 %v1245_v27, %v1241_v39  ;;  %v5281_v53 = vpack.c.bf16 %v1246_v8, %v1242_v45  ;;  %v3736_v43 = vld [vmem:[#allocation8 + $0x190] sm:$0xf] }
 0x1c6   : > { %v1172_v9 = vmax.f32 %v1087_v37, 0.0  ;;  %v870_v27 = vadd.f32 %v5171_v63, %v4808_v60  ;;  %v961_v8 = vadd.f32 %v5201_v56, %v4874_v31 }
 0x1c7   : > { %v1849_v35 = vadd.f32 %v1848_v38, %v1760_v17  ;;  %v3994_v17 = vld [vmem:[#allocation8 + $0x194] sm:$0xf0] }
 0x1c8   : > { %v3737_v38 = vor.u32 %v3994_v17, %v3736_v43 }
 0x1ca   : > { %v1088_v58 = vpop.f32.mrf.mxu3  ;;  %2016 = vmatpush.bf16.msra.mxu3 %v3737_v38 }
 0x1cb   : > { %v1089_v7 = vadd.f32 %v1088_v58, %v5240_v24 }
 0x1cc   : > { %v1937_v47 = vpop.f32.mrf.mxu2  ;;  %v1762_v5 = vpop.f32.mrf.mxu0 }
 0x1cd   : > { %v5279_v55 = vadd.f32 %v1937_v47, %v1849_v35  ;;  %v1176_v4 = vmax.f32 %v1089_v7, 0.0  ;;  %v1763_v15 = vadd.f32 %v1762_v5, %v5207_v23  ;;  %v1851_v21 = vpop.f32.mrf.mxu1  ;;  %v959_v35 = vadd.f32 %v5177_v18, %v4874_v31 }
 0x1ce   : > { %v1249_v7 = vmax.f32 %v870_v27, 0.0  ;;  %v1251_v5 = vmax.f32 %v1048_v41, 0.0  ;;  %v3578_v41 = vld [vmem:[#allocation8 + $0x58] sm:$0xf0] }
 0x1cf   : > { %v1852_v50 = vadd.f32 %v1851_v21, %v1763_v15  ;;  %1130 = vmatmul.bf16.gmra.mxu3 %v4837_v30  ;;  %1801 = vmatmul.bf16.gmra.mxu0 %v5277_v49  ;;  %v5288_v0 = vpack.c.bf16 %v1176_v4, %v1172_v9  ;;  %v872_v30 = vadd.f32 %v5199_v25, %v4808_v60  ;;  %v1250_v25 = vmax.f32 %v959_v35, 0.0 }
 0x1d0   : > { %1890 = vmatmul.bf16.gmra.mxu1 %v5281_v53  ;;  %v1254_v9 = vmax.f32 %v961_v8, 0.0  ;;  %v1255_v4 = vmax.f32 %v1050_v20, 0.0  ;;  %v3969_v8 = vld [vmem:[#allocation8 + $0xd4] sm:$0xf] }
 0x1d1   : > { %1979 = vmatmul.bf16.gmra.mxu2 %v5283_v14  ;;  %v1253_v47 = vmax.f32 %v872_v30, 0.0 }
 0x1d2   : > { %v1091_v39 = vpop.f32.mrf.mxu3  ;;  %v5315_v43 = vpack.c.bf16 %v1255_v4, %v1251_v5 }
 0x1d3   : > { %v1092_v54 = vadd.f32 %v1091_v39, %v5240_v24  ;;  %v5309_v32 = vpack.c.bf16 %v1253_v47, %v1249_v7 }
 0x1d4   : > { %v1940_v45 = vpop.f32.mrf.mxu2  ;;  %v1764_v63 = vpop.f32.mrf.mxu0 }
 0x1d5   : > { %v5304_v37 = vadd.f32 %v1940_v45, %v1852_v50  ;;  %v1765_v58 = vadd.f32 %v1764_v63, %v5207_v23  ;;  %v1853_v18 = vpop.f32.mrf.mxu1  ;;  %v5313_v50 = vpack.c.bf16 %v1254_v9, %v1250_v25  ;;  %v1180_v17 = vmax.f32 %v1092_v54, 0.0  ;;  %v3953_v45 = vld [vmem:[#allocation8 + $0x54] sm:$0xf]  ;;  %v3642_v63 = vld [vmem:[#allocation8 + $0xd8] sm:$0xf0] }
 0x1d6   : > { %v3581_v20 = vor.u32 %v3953_v45, %v3578_v41  ;;  %v4169_v41 = vld [vmem:[%s4664_s11 + $0x60] sm:$0xff] }
 0x1d7   : > { %v1854_v60 = vadd.f32 %v1853_v18, %v1765_v58  ;;  %v3645_v18 = vor.u32 %v3969_v8, %v3642_v63  ;;  %v3728_v63 = vld [vmem:[#allocation8 + $0x180] sm:$0xf] }
 0x1d8   : > { %2101 = vmatpush.bf16.msra.mxu0 %v3581_v20 }
 0x1d9   : > { %2190 = vmatpush.bf16.msra.mxu1 %v3645_v18 }
 0x1da   : > { %v1093_v15 = vpop.f32.mrf.mxu3 }
 0x1db   : > { %v1094_v31 = vadd.f32 %v1093_v15, %v5240_v24 }
 0x1dc   : > { %v1942_v56 = vpop.f32.mrf.mxu2  ;;  %v1767_v21 = vpop.f32.mrf.mxu0 }
 0x1dd   : > { %v5311_v33 = vadd.f32 %v1942_v56, %v1854_v60  ;;  %v1184_v38 = vmax.f32 %v1094_v31, 0.0  ;;  %v1768_v27 = vadd.f32 %v1767_v21, %v5207_v23  ;;  %v1856_v35 = vpop.f32.mrf.mxu1 }
 0x1df   : > { %v1857_v30 = vadd.f32 %v1856_v35, %v1768_v27  ;;  %1135 = vmatmul.bf16.gmra.mxu3 %v4863_v22  ;;  %1806 = vmatmul.bf16.gmra.mxu0 %v5309_v32  ;;  %v5320_v39 = vpack.c.bf16 %v1184_v38, %v1180_v17  ;;  %v3989_v35 = vld [vmem:[#allocation8 + $0x174] sm:$0xf] }
 0x1e0   : > { %1895 = vmatmul.bf16.gmra.mxu1 %v5313_v50 }
 0x1e1   : > { %6127 = vst [vmem:[#allocation45_spill] sm:$0xff] %v5320_v39  ;;  %1984 = vmatmul.bf16.gmra.mxu2 %v5315_v43 }
 0x1e2   : > { %v1096_v58 = vpop.f32.mrf.mxu3 }
 0x1e3   : > { %v1097_v9 = vadd.f32 %v1096_v58, %v5240_v24  ;;  %v3992_v58 = vld [vmem:[#allocation8 + $0x184] sm:$0xf0] }
 0x1e4   : > { %v1945_v7 = vpop.f32.mrf.mxu2  ;;  %v1769_v22 = vpop.f32.mrf.mxu0  ;;  %v3729_v18 = vor.u32 %v3992_v58, %v3728_v63 }
 0x1e5   : > { %v5324_v47 = vadd.f32 %v1945_v7, %v1857_v30  ;;  %v1770_v60 = vadd.f32 %v1769_v22, %v5207_v23  ;;  %v1858_v25 = vpop.f32.mrf.mxu1  ;;  %v1188_v21 = vmax.f32 %v1097_v9, 0.0  ;;  %v3722_v30 = vld [vmem:[#allocation8 + $0x178] sm:$0xf0]  ;;  %v3987_v22 = vld [vmem:[#allocation8 + $0x164] sm:$0xf] }
 0x1e6   : > { %v3725_v8 = vor.u32 %v3989_v35, %v3722_v30  ;;  %2017 = vmatpush.bf16.msra.mxu3 %v3729_v18  ;;  %v3951_v30 = vld [vmem:[#allocation8 + $0x44] sm:$0xf]  ;;  %v3634_v18 = vld [vmem:[#allocation8 + $0xc8] sm:$0xf0] }
 0x1e7   : > { %v1859_v5 = vadd.f32 %v1858_v25, %v1770_v60  ;;  %v3714_v60 = vld [vmem:[#allocation8 + $0x168] sm:$0xf0] }
 0x1e8   : > { %2277 = vmatpush.bf16.msra.mxu2 %v3725_v8  ;;  %v3967_v8 = vld [vmem:[#allocation8 + $0xc4] sm:$0xf] }
 0x1ea   : > { %v1098_v4 = vpop.f32.mrf.mxu3 }
 0x1eb   : > { %v1099_v54 = vadd.f32 %v1098_v4, %v5240_v24 }
 0x1ec   : > { %v1947_v15 = vpop.f32.mrf.mxu2  ;;  %v1772_v56 = vpop.f32.mrf.mxu0 }
 0x1ed   : > { %v5329_v31 = vadd.f32 %v1947_v15, %v1859_v5  ;;  %v1192_v17 = vmax.f32 %v1099_v54, 0.0  ;;  %v1773_v38 = vadd.f32 %v1772_v56, %v5207_v23  ;;  %v1861_v27 = vpop.f32.mrf.mxu1  ;;  %v3717_v5 = vor.u32 %v3987_v22, %v3714_v60  ;;  %v3985_v56 = vld [vmem:[#allocation8 + $0x154] sm:$0xf]  ;;  %v3983_v22 = vld [vmem:[#allocation8 + $0x144] sm:$0xf] }
 0x1ee   : > { %v3698_v60 = vld [vmem:[#allocation8 + $0x148] sm:$0xf0] }
 0x1ef   : > { %v1862_v45 = vadd.f32 %v1861_v27, %v1773_v38  ;;  %1140 = vmatmul.bf16.gmra.mxu3 %v4169_v41  ;;  %1811 = vmatmul.bf16.gmra.mxu0 %v4825_v48  ;;  %v5334_v20 = vpack.c.bf16 %v1192_v17, %v1188_v21  ;;  %v3706_v21 = vld [vmem:[#allocation8 + $0x158] sm:$0xf0]  ;;  %v3570_v41 = vld [vmem:[#allocation8 + $0x48] sm:$0xf0] }
 0x1f0   : > { %1900 = vmatmul.bf16.gmra.mxu1 %v4953_v26  ;;  %2278 = vmatpush.bf16.msra.mxu2 %v3717_v5  ;;  %v3709_v38 = vor.u32 %v3985_v56, %v3706_v21  ;;  %v3573_v58 = vor.u32 %v3951_v30, %v3570_v41  ;;  %v3965_v30 = vld [vmem:[#allocation8 + $0xb4] sm:$0xf] }
 0x1f1   : > { %6128 = vst [vmem:[#allocation46_spill] sm:$0xff] %v5334_v20  ;;  %1989 = vmatmul.bf16.gmra.mxu2 %v5105_v12 }
 0x1f2   : > { %v1101_v7 = vpop.f32.mrf.mxu3  ;;  %2102 = vmatpush.bf16.msra.mxu0 %v3573_v58 }
 0x1f3   : > { %v1102_v27 = vadd.f32 %v1101_v7, %v5240_v24 }
 0x1f4   : > { %v1950_v25 = vpop.f32.mrf.mxu2  ;;  %v1774_v4 = vpop.f32.mrf.mxu0  ;;  %2279 = vmatpush.bf16.msra.mxu2 %v3709_v38  ;;  %v3949_v38 = vld [vmem:[#allocation8 + $0x34] sm:$0xf] }
 0x1f5   : > { %v5338_v9 = vadd.f32 %v1950_v25, %v1862_v45  ;;  %v1775_v54 = vadd.f32 %v1774_v4, %v5207_v23  ;;  %v1863_v15 = vpop.f32.mrf.mxu1  ;;  %v3637_v4 = vor.u32 %v3967_v8, %v3634_v18  ;;  %v3981_v8 = vld [vmem:[#allocation8 + $0x134] sm:$0xf]  ;;  %v3690_v18 = vld [vmem:[#allocation8 + $0x138] sm:$0xf0] }
 0x1f6   : > { %v3693_v58 = vor.u32 %v3981_v8, %v3690_v18  ;;  %v3546_v8 = vld [vmem:[#allocation8 + $0x18] sm:$0xf0]  ;;  %v3961_v18 = vld [vmem:[#allocation8 + $0x94] sm:$0xf] }
 0x1f7   : > { %6129 = vst [vmem:[#allocation47_spill] sm:$0xff] %v5338_v9  ;;  %v1864_v17 = vadd.f32 %v1863_v15, %v1775_v54  ;;  %v3701_v54 = vor.u32 %v3983_v22, %v3698_v60  ;;  %v1196_v15 = vmax.f32 %v1102_v27, 0.0  ;;  %2191 = vmatpush.bf16.msra.mxu1 %v3637_v4  ;;  %v4170_v9 = vld [vmem:[%s4664_s11 + $0x68] sm:$0xff] }
 0x1f8   : > { %v3947_v60 = vld [vmem:[#allocation8 + $0x24] sm:$0xf] }
 0x1f9   : > { %2280 = vmatpush.bf16.msra.mxu2 %v3701_v54 }
 0x1fa   : > { %v1103_v35 = vpop.f32.mrf.mxu3 }
 0x1fb   : > { %v1104_v63 = vadd.f32 %v1103_v35, %v5240_v24  ;;  %v3562_v35 = vld [vmem:[#allocation8 + $0x38] sm:$0xf0] }
 0x1fc   : > { %v1952_v45 = vpop.f32.mrf.mxu2  ;;  %v1777_v5 = vpop.f32.mrf.mxu0 }
 0x1fd   : > { %v5343_v25 = vadd.f32 %v1952_v45, %v1864_v17  ;;  %v1200_v7 = vmax.f32 %v1104_v63, 0.0  ;;  %v1778_v56 = vadd.f32 %v1777_v5, %v5207_v23  ;;  %v1866_v21 = vpop.f32.mrf.mxu1  ;;  %v3565_v17 = vor.u32 %v3949_v38, %v3562_v35  ;;  %v3626_v45 = vld [vmem:[#allocation8 + $0xb8] sm:$0xf0]  ;;  %2281 = vmatpush.bf16.msra.mxu2 %v3693_v58  ;;  %v3963_v5 = vld [vmem:[#allocation8 + $0xa4] sm:$0xf] }
 0x1fe   : > { %v3629_v63 = vor.u32 %v3965_v30, %v3626_v45  ;;  %v3682_v38 = vld [vmem:[#allocation8 + $0x128] sm:$0xf0] }
 0x1ff   : > { %v1867_v41 = vadd.f32 %v1866_v21, %v1778_v56  ;;  %1145 = vmatmul.bf16.gmra.mxu3 %v4170_v9  ;;  %1816 = vmatmul.bf16.gmra.mxu0 %v4848_v59  ;;  %v5348_v27 = vpack.c.bf16 %v1200_v7, %v1196_v15  ;;  %v3554_v9 = vld [vmem:[#allocation8 + $0x28] sm:$0xf0]  ;;  %v3979_v21 = vld [vmem:[#allocation8 + $0x124] sm:$0xf] }
 0x200   : > { %1905 = vmatmul.bf16.gmra.mxu1 %v4991_v34  ;;  %2103 = vmatpush.bf16.msra.mxu0 %v3565_v17  ;;  %v3557_v54 = vor.u32 %v3947_v60, %v3554_v9  ;;  %v3618_v56 = vld [vmem:[#allocation8 + $0xa8] sm:$0xf0]  ;;  %v3685_v34 = vor.u32 %v3979_v21, %v3682_v38  ;;  %v3945_v17 = vld [vmem:[#allocation8 + $0x14] sm:$0xf]  ;;  %v3610_v60 = vld [vmem:[#allocation8 + $0x98] sm:$0xf0] }
 0x201   : > { %6130 = vst [vmem:[#allocation48_spill] sm:$0xff] %v5348_v27  ;;  %1994 = vmatmul.bf16.gmra.mxu2 %v5143_v16  ;;  %2192 = vmatpush.bf16.msra.mxu1 %v3629_v63  ;;  %v3621_v35 = vor.u32 %v3963_v5, %v3618_v56  ;;  %v3549_v58 = vor.u32 %v3945_v17, %v3546_v8  ;;  %v3977_v9 = vld [vmem:[#allocation8 + $0x114] sm:$0xf]  ;;  %v3674_v16 = vld [vmem:[#allocation8 + $0x118] sm:$0xf0] }
 0x202   : > { %v1106_v22 = vpop.f32.mrf.mxu3  ;;  %2282 = vmatpush.bf16.msra.mxu2 %v3685_v34  ;;  %v3613_v59 = vor.u32 %v3961_v18, %v3610_v60  ;;  %v3943_v56 = vld [vmem:[#allocation8 + $0x4] sm:$0xf] }
 0x203   : > { %v3959_v21 = vld [vmem:[#allocation8 + $0x84] sm:$0xf] }
 0x204   : > { %v1955_v4 = vpop.f32.mrf.mxu2  ;;  %v1779_v7 = vpop.f32.mrf.mxu0  ;;  %2104 = vmatpush.bf16.msra.mxu0 %v3557_v54  ;;  %v3538_v54 = vld [vmem:[#allocation8 + $0x8] sm:$0xf0] }
 0x205   : > { %v5352_v15 = vadd.f32 %v1955_v4, %v1867_v41  ;;  %v1780_v30 = vadd.f32 %v1779_v7, %v5207_v23  ;;  %v1868_v45 = vpop.f32.mrf.mxu1  ;;  %2193 = vmatpush.bf16.msra.mxu1 %v3621_v35  ;;  %v3677_v41 = vor.u32 %v3977_v9, %v3674_v16  ;;  %v1107_v4 = vadd.f32 %v1106_v22, %v5240_v24  ;;  %v3602_v35 = vld [vmem:[#allocation8 + $0x88] sm:$0xf0] }
 0x206   : > { %v3541_v7 = vor.u32 %v3943_v56, %v3538_v54  ;;  %v3605_v8 = vor.u32 %v3959_v21, %v3602_v35 }
 0x207   : > { %v1869_v63 = vadd.f32 %v1868_v45, %v1780_v30  ;;  %2283 = vmatpush.bf16.msra.mxu2 %v3677_v41  ;;  %v3975_v30 = vld [vmem:[#allocation8 + $0x104] sm:$0xf]  ;;  %v3666_v45 = vld [vmem:[#allocation8 + $0x108] sm:$0xf0]  ;;  %v1204_v18 = vmax.f32 %v1107_v4, 0.0 }
 0x208   : > { %2105 = vmatpush.bf16.msra.mxu0 %v3549_v58  ;;  %v3669_v22 = vor.u32 %v3975_v30, %v3666_v45  ;;  %v4171_v41 = vld [vmem:[%s4664_s11 + $0x70] sm:$0xff]  ;;  %v3786_v4 = vld [vmem:[#allocation8 + $0x1f8] sm:$0xf0] }
 0x209   : > { %2194 = vmatpush.bf16.msra.mxu1 %v3613_v59 }
 0x20a   : > { %v1108_v5 = vpop.f32.mrf.mxu3 }
 0x20b   : > { %v1109_v34 = vadd.f32 %v1108_v5, %v5240_v24  ;;  %2284 = vmatpush.bf16.msra.mxu2 %v3669_v22 }
 0x20c   : > { %v1957_v38 = vpop.f32.mrf.mxu2  ;;  %v1782_v16 = vpop.f32.mrf.mxu0  ;;  %2106 = vmatpush.bf16.msra.mxu0 %v3541_v7 }
 0x20d   : > { %v5357_v17 = vadd.f32 %v1957_v38, %v1869_v63  ;;  %v1208_v58 = vmax.f32 %v1109_v34, 0.0  ;;  %v1783_v59 = vadd.f32 %v1782_v16, %v5207_v23  ;;  %v1871_v60 = vpop.f32.mrf.mxu1  ;;  %2195 = vmatpush.bf16.msra.mxu1 %v3605_v8  ;;  %v4005_v63 = vld [vmem:[#allocation8 + $0x1f4] sm:$0xf] }
 0x20e   : > { %v3789_v56 = vor.u32 %v4005_v63, %v3786_v4  ;;  %v4172_v4 = vld [vmem:[%s4664_s11 + $0x78] sm:$0xff] }
 0x20f   : > { %v1872_v9 = vadd.f32 %v1871_v60, %v1783_v59  ;;  %1150 = vmatmul.bf16.gmra.mxu3 %v4171_v41  ;;  %1821 = vmatmul.bf16.gmra.mxu0 %v4871_v29  ;;  %v5362_v5 = vpack.c.bf16 %v1208_v58, %v1204_v18 }
 0x210   : > { %1910 = vmatmul.bf16.gmra.mxu1 %v5029_v44  ;;  %2366 = vmatpush.bf16.msrb.mxu3 %v3789_v56 }
 0x211   : > { %6131 = vst [vmem:[#allocation49_spill] sm:$0xff] %v5362_v5  ;;  %1999 = vmatmul.bf16.gmra.mxu2 %v5181_v3 }
 0x212   : > { %v1111_v54 = vpop.f32.mrf.mxu3 }
 0x213   : > { %v1112_v45 = vadd.f32 %v1111_v54, %v5240_v24 }
 0x214   : > { %v1960_v21 = vpop.f32.mrf.mxu2  ;;  %v1784_v38 = vpop.f32.mrf.mxu0 }
 0x215   : > { %v5366_v34 = vadd.f32 %v1960_v21, %v1872_v9  ;;  %v1785_v7 = vadd.f32 %v1784_v38, %v5207_v23  ;;  %v1873_v35 = vpop.f32.mrf.mxu1  ;;  %v1212_v59 = vmax.f32 %v1112_v45, 0.0 }
 0x217   : > { %v1874_v30 = vadd.f32 %v1873_v35, %v1785_v7 }
 0x21a   : > { %v1113_v16 = vpop.f32.mrf.mxu3 }
 0x21b   : > { %v1114_v8 = vadd.f32 %v1113_v16, %v5240_v24 }
 0x21c   : > { %v1962_v22 = vpop.f32.mrf.mxu2  ;;  %v1787_v58 = vpop.f32.mrf.mxu0 }
 0x21d   : > { %v5371_v18 = vadd.f32 %v1962_v22, %v1874_v30  ;;  %v1216_v60 = vmax.f32 %v1114_v8, 0.0  ;;  %v1788_v9 = vadd.f32 %v1787_v58, %v5207_v23  ;;  %v1876_v41 = vpop.f32.mrf.mxu1 }
 0x21f   : > { %v1877_v63 = vadd.f32 %v1876_v41, %v1788_v9  ;;  %1155 = vmatmul.bf16.gmra.mxu3 %v4172_v4  ;;  %1826 = vmatmul.bf16.gmra.mxu0 %v4915_v19  ;;  %v5376_v56 = vpack.c.bf16 %v1216_v60, %v1212_v59 }
 0x220   : > { %1915 = vmatmul.bf16.gmra.mxu1 %v5067_v51 }
 0x221   : > { %6132 = vst [vmem:[#allocation50_spill] sm:$0xff] %v5376_v56  ;;  %2004 = vmatmul.bf16.gmra.mxu2 %v5221_v13 }
 0x222   : > { %v1116_v54 = vpop.f32.mrf.mxu3 }
 0x223   : > { %v1117_v16 = vadd.f32 %v1116_v54, %v5240_v24  ;;  %v4003_v54 = vld [vmem:[#allocation8 + $0x1e4] sm:$0xf] }
 0x224   : > { %v1965_v21 = vpop.f32.mrf.mxu2  ;;  %v1789_v7 = vpop.f32.mrf.mxu0 }
 0x225   : > { %v5380_v38 = vadd.f32 %v1965_v21, %v1877_v63  ;;  %v1790_v35 = vadd.f32 %v1789_v7, %v5207_v23  ;;  %v1878_v30 = vpop.f32.mrf.mxu1  ;;  %v1220_v9 = vmax.f32 %v1117_v16, 0.0 }
 0x227   : > { %v1879_v45 = vadd.f32 %v1878_v30, %v1790_v35  ;;  %v3778_v35 = vld [vmem:[#allocation8 + $0x1e8] sm:$0xf0] }
 0x228   : > { %v3781_v30 = vor.u32 %v4003_v54, %v3778_v35 }
 0x22a   : > { %v1118_v8 = vpop.f32.mrf.mxu3  ;;  %2367 = vmatpush.bf16.msrb.mxu3 %v3781_v30 }
 0x22b   : > { %v1119_v22 = vadd.f32 %v1118_v8, %v5240_v24 }
 0x22c   : > { %v1967_v58 = vpop.f32.mrf.mxu2  ;;  %v1792_v60 = vpop.f32.mrf.mxu0 }
 0x22d   : > { %v5385_v59 = vadd.f32 %v1967_v58, %v1879_v45  ;;  %v1224_v41 = vmax.f32 %v1119_v22, 0.0  ;;  %v1793_v4 = vadd.f32 %v1792_v60, %v5207_v23  ;;  %v1881_v63 = vpop.f32.mrf.mxu1 }
 0x22f   : > { %v1882_v21 = vadd.f32 %v1881_v63, %v1793_v4  ;;  %2018 = vmatmul.bf16.vlgmr.msra.gmra.mxu3 %v5254_v10  ;;  %2107 = vmatmul.bf16.vlgmr.msra.gmra.mxu0 %v4900_v52  ;;  %v5390_v7 = vpack.c.bf16 %v1224_v41, %v1220_v9 }
 0x230   : > { %2196 = vmatmul.bf16.vlgmr.msra.gmra.mxu1 %v4905_v28 }
 0x231   : > { %6133 = vst [vmem:[#allocation51_spill] sm:$0xff] %v5390_v7  ;;  %2285 = vmatmul.bf16.vlgmr.msra.gmra.mxu2 %v4907_v62 }
 0x232   : > { %v1121_v45 = vpop.f32.mrf.mxu3 }
 0x233   : > { %v1122_v52 = vadd.f32 %v1121_v45, %v5240_v24 }
 0x234   : > { %v1970_v16 = vpop.f32.mrf.mxu2  ;;  %v1794_v22 = vpop.f32.mrf.mxu0 }
 0x235   : > { %v5394_v8 = vadd.f32 %v1970_v16, %v1882_v21  ;;  %v1795_v58 = vadd.f32 %v1794_v22, %v5207_v23  ;;  %v1883_v60 = vpop.f32.mrf.mxu1  ;;  %v1228_v54 = vmax.f32 %v1122_v52, 0.0 }
 0x237   : > { %v1884_v4 = vadd.f32 %v1883_v60, %v1795_v58 }
 0x23a   : > { %v1123_v9 = vpop.f32.mrf.mxu3 }
 0x23b   : > { %v1124_v28 = vadd.f32 %v1123_v9, %v5240_v24 }
 0x23c   : > { %v1972_v41 = vpop.f32.mrf.mxu2  ;;  %v1797_v63 = vpop.f32.mrf.mxu0 }
 0x23d   : > { %v5399_v62 = vadd.f32 %v1972_v41, %v1884_v4  ;;  %v1232_v35 = vmax.f32 %v1124_v28, 0.0  ;;  %v1798_v30 = vadd.f32 %v1797_v63, %v5207_v23  ;;  %v1886_v21 = vpop.f32.mrf.mxu1 }
 0x23f   : > { %v1887_v16 = vadd.f32 %v1886_v21, %v1798_v30  ;;  %2023 = vmatmul.bf16.gmra.mxu3 %v5288_v0  ;;  %2112 = vmatmul.bf16.gmra.mxu0 %v4941_v6  ;;  %v5404_v22 = vpack.c.bf16 %v1232_v35, %v1228_v54 }
 0x240   : > { %2201 = vmatmul.bf16.gmra.mxu1 %v4945_v61 }
 0x241   : > { %6134 = vst [vmem:[#allocation52_spill] sm:$0xff] %v5404_v22  ;;  %2290 = vmatmul.bf16.gmra.mxu2 %v4947_v1 }
 0x242   : > { %v1126_v45 = vpop.f32.mrf.mxu3 }
 0x243   : > { %v1127_v41 = vadd.f32 %v1126_v45, %v5240_v24  ;;  %v6138_v45 = vld [vmem:[#allocation24_spill] sm:$0xff] }
 0x244   : > { %v1975_v58 = vpop.f32.mrf.mxu2  ;;  %v1799_v4 = vpop.f32.mrf.mxu0 }
 0x245   : > { %v5408_v60 = vadd.f32 %v1975_v58, %v1887_v16  ;;  %v1800_v52 = vadd.f32 %v1799_v4, %v5207_v23  ;;  %v1888_v9 = vpop.f32.mrf.mxu1  ;;  %v1236_v30 = vmax.f32 %v1127_v41, 0.0  ;;  %v6137_v4 = vld [vmem:[#allocation23_spill] sm:$0xff] }
 0x247   : > { %6135 = vst [vmem:[#allocation53_spill] sm:$0xff] %v5408_v60  ;;  %v1889_v28 = vadd.f32 %v1888_v9, %v1800_v52  ;;  %v6139_v9 = vld [vmem:[#allocation25_spill] sm:$0xff] }
 0x24a   : > { %v1128_v63 = vpop.f32.mrf.mxu3 }
 0x24b   : > { %v1129_v6 = vadd.f32 %v1128_v63, %v5240_v24  ;;  %v4001_v63 = vld [vmem:[#allocation8 + $0x1d4] sm:$0xf] }
 0x24c   : > { %v1977_v54 = vpop.f32.mrf.mxu2  ;;  %v1802_v61 = vpop.f32.mrf.mxu0 }
 0x24d   : > { %v5413_v35 = vadd.f32 %v1977_v54, %v1889_v28  ;;  %v1240_v1 = vmax.f32 %v1129_v6, 0.0  ;;  %v1803_v21 = vadd.f32 %v1802_v61, %v5207_v23  ;;  %v1891_v16 = vpop.f32.mrf.mxu1  ;;  %v3770_v28 = vld [vmem:[#allocation8 + $0x1d8] sm:$0xf0] }
 0x24e   : > { %v3773_v54 = vor.u32 %v4001_v63, %v3770_v28 }
 0x24f   : > { %6136 = vst [vmem:[#allocation54_spill] sm:$0xff] %v5413_v35  ;;  %v1892_v58 = vadd.f32 %v1891_v16, %v1803_v21  ;;  %2028 = vmatmul.bf16.gmra.mxu3 %v5320_v39  ;;  %2117 = vmatmul.bf16.gmra.mxu0 %v6137_v4  ;;  %v5418_v52 = vpack.c.bf16 %v1240_v1, %v1236_v30 }
 0x250   : > { %2206 = vmatmul.bf16.gmra.mxu1 %v6138_v45  ;;  %2368 = vmatpush.bf16.msrb.mxu3 %v3773_v54 }
 0x251   : > { %2295 = vmatmul.bf16.gmra.mxu2 %v6139_v9 }
 0x252   : > { %v1131_v35 = vpop.f32.mrf.mxu3 }
 0x253   : > { %v1132_v30 = vadd.f32 %v1131_v35, %v5240_v24  ;;  %v6143_v35 = vld [vmem:[#allocation28_spill] sm:$0xff] }
 0x254   : > { %v1980_v41 = vpop.f32.mrf.mxu2  ;;  %v1804_v61 = vpop.f32.mrf.mxu0 }
 0x255   : > { %v5422_v6 = vadd.f32 %v1980_v41, %v1892_v58  ;;  %v1805_v21 = vadd.f32 %v1804_v61, %v5207_v23  ;;  %v1893_v16 = vpop.f32.mrf.mxu1  ;;  %v1244_v63 = vmax.f32 %v1132_v30, 0.0  ;;  %v6142_v61 = vld [vmem:[#allocation27_spill] sm:$0xff] }
 0x257   : > { %6140 = vst [vmem:[#allocation23_spill] sm:$0xff] %v5422_v6  ;;  %v1894_v39 = vadd.f32 %v1893_v16, %v1805_v21  ;;  %v6144_v16 = vld [vmem:[#allocation29_spill] sm:$0xff] }
 0x25a   : > { %v1133_v1 = vpop.f32.mrf.mxu3 }
 0x25b   : > { %v1134_v4 = vadd.f32 %v1133_v1, %v5240_v24 }
 0x25c   : > { %v1982_v45 = vpop.f32.mrf.mxu2  ;;  %v1807_v60 = vpop.f32.mrf.mxu0 }
 0x25d   : > { %v5427_v9 = vadd.f32 %v1982_v45, %v1894_v39  ;;  %v1248_v28 = vmax.f32 %v1134_v4, 0.0  ;;  %v1808_v54 = vadd.f32 %v1807_v60, %v5207_v23  ;;  %v1896_v58 = vpop.f32.mrf.mxu1 }
 0x25f   : > { %6141 = vst [vmem:[#allocation24_spill] sm:$0xff] %v5427_v9  ;;  %v1897_v41 = vadd.f32 %v1896_v58, %v1808_v54  ;;  %2033 = vmatmul.bf16.gmra.mxu3 %v5334_v20  ;;  %2122 = vmatmul.bf16.gmra.mxu0 %v6142_v61  ;;  %v5432_v21 = vpack.c.bf16 %v1248_v28, %v1244_v63 }
 0x260   : > { %2211 = vmatmul.bf16.gmra.mxu1 %v6143_v35 }
 0x261   : > { %2300 = vmatmul.bf16.gmra.mxu2 %v6144_v16 }
 0x262   : > { %v1136_v1 = vpop.f32.mrf.mxu3 }
 0x263   : > { %v1137_v54 = vadd.f32 %v1136_v1, %v5240_v24  ;;  %v6148_v1 = vld [vmem:[#allocation31_spill] sm:$0xff] }
 0x264   : > { %v1985_v39 = vpop.f32.mrf.mxu2  ;;  %v1809_v30 = vpop.f32.mrf.mxu0 }
 0x265   : > { %v5436_v45 = vadd.f32 %v1985_v39, %v1897_v41  ;;  %v1810_v4 = vadd.f32 %v1809_v30, %v5207_v23  ;;  %v1898_v60 = vpop.f32.mrf.mxu1  ;;  %v1252_v20 = vmax.f32 %v1137_v54, 0.0  ;;  %v6147_v30 = vld [vmem:[#allocation30_spill] sm:$0xff] }
 0x267   : > { %6145 = vst [vmem:[#allocation25_spill] sm:$0xff] %v5436_v45  ;;  %v1899_v9 = vadd.f32 %v1898_v60, %v1810_v4  ;;  %v6149_v60 = vld [vmem:[#allocation32_spill] sm:$0xff] }
 0x26a   : > { %v1138_v58 = vpop.f32.mrf.mxu3 }
 0x26b   : > { %v1139_v61 = vadd.f32 %v1138_v58, %v5240_v24  ;;  %v3999_v58 = vld [vmem:[#allocation8 + $0x1c4] sm:$0xf] }
 0x26c   : > { %v1987_v63 = vpop.f32.mrf.mxu2  ;;  %v1812_v35 = vpop.f32.mrf.mxu0 }
 0x26d   : > { %v5441_v28 = vadd.f32 %v1987_v63, %v1899_v9  ;;  %v1256_v16 = vmax.f32 %v1139_v61, 0.0  ;;  %v1813_v6 = vadd.f32 %v1812_v35, %v5207_v23  ;;  %v1901_v41 = vpop.f32.mrf.mxu1  ;;  %v3762_v9 = vld [vmem:[#allocation8 + $0x1c8] sm:$0xf0] }
 0x26e   : > { %v3765_v63 = vor.u32 %v3999_v58, %v3762_v9 }
 0x26f   : > { %6146 = vst [vmem:[#allocation27_spill] sm:$0xff] %v5441_v28  ;;  %v1902_v39 = vadd.f32 %v1901_v41, %v1813_v6  ;;  %2038 = vmatmul.bf16.gmra.mxu3 %v5348_v27  ;;  %2127 = vmatmul.bf16.gmra.mxu0 %v6147_v30  ;;  %v5446_v4 = vpack.c.bf16 %v1256_v16, %v1252_v20 }
 0x270   : > { %2216 = vmatmul.bf16.gmra.mxu1 %v6148_v1  ;;  %2369 = vmatpush.bf16.msrb.mxu3 %v3765_v63 }
 0x271   : > { %2305 = vmatmul.bf16.gmra.mxu2 %v6149_v60 }
 0x272   : > { %v1141_v28 = vpop.f32.mrf.mxu3 }
 0x273   : > { %v1142_v20 = vadd.f32 %v1141_v28, %v5240_v24  ;;  %v6153_v28 = vld [vmem:[#allocation34_spill] sm:$0xff] }
 0x274   : > { %v1990_v54 = vpop.f32.mrf.mxu2  ;;  %v1814_v35 = vpop.f32.mrf.mxu0 }
 0x275   : > { %v5450_v61 = vadd.f32 %v1990_v54, %v1902_v39  ;;  %v1815_v6 = vadd.f32 %v1814_v35, %v5207_v23  ;;  %v1903_v41 = vpop.f32.mrf.mxu1  ;;  %v1260_v58 = vmax.f32 %v1142_v20, 0.0  ;;  %v6152_v35 = vld [vmem:[#allocation33_spill] sm:$0xff] }
 0x277   : > { %6150 = vst [vmem:[#allocation28_spill] sm:$0xff] %v5450_v61  ;;  %v1904_v27 = vadd.f32 %v1903_v41, %v1815_v6  ;;  %v6154_v41 = vld [vmem:[#allocation35_spill] sm:$0xff] }
 0x27a   : > { %v1143_v16 = vpop.f32.mrf.mxu3 }
 0x27b   : > { %v1144_v30 = vadd.f32 %v1143_v16, %v5240_v24 }
 0x27c   : > { %v1992_v1 = vpop.f32.mrf.mxu2  ;;  %v1817_v45 = vpop.f32.mrf.mxu0 }
 0x27d   : > { %v5455_v60 = vadd.f32 %v1992_v1, %v1904_v27  ;;  %v1264_v9 = vmax.f32 %v1144_v30, 0.0  ;;  %v1818_v63 = vadd.f32 %v1817_v45, %v5207_v23  ;;  %v1906_v39 = vpop.f32.mrf.mxu1 }
 0x27f   : > { %6151 = vst [vmem:[#allocation29_spill] sm:$0xff] %v5455_v60  ;;  %v1907_v54 = vadd.f32 %v1906_v39, %v1818_v63  ;;  %2043 = vmatmul.bf16.gmra.mxu3 %v5362_v5  ;;  %2132 = vmatmul.bf16.gmra.mxu0 %v6152_v35  ;;  %v5460_v6 = vpack.c.bf16 %v1264_v9, %v1260_v58 }
 0x280   : > { %2221 = vmatmul.bf16.gmra.mxu1 %v6153_v28 }
 0x281   : > { %2310 = vmatmul.bf16.gmra.mxu2 %v6154_v41 }
 0x282   : > { %v1146_v16 = vpop.f32.mrf.mxu3 }
 0x283   : > { %v1147_v63 = vadd.f32 %v1146_v16, %v5240_v24  ;;  %v6158_v16 = vld [vmem:[#allocation37_spill] sm:$0xff] }
 0x284   : > { %v1995_v27 = vpop.f32.mrf.mxu2  ;;  %v1819_v20 = vpop.f32.mrf.mxu0 }
 0x285   : > { %v5464_v1 = vadd.f32 %v1995_v27, %v1907_v54  ;;  %v1820_v30 = vadd.f32 %v1819_v20, %v5207_v23  ;;  %v1908_v45 = vpop.f32.mrf.mxu1  ;;  %v1268_v5 = vmax.f32 %v1147_v63, 0.0  ;;  %v6157_v20 = vld [vmem:[#allocation36_spill] sm:$0xff] }
 0x287   : > { %6155 = vst [vmem:[#allocation30_spill] sm:$0xff] %v5464_v1  ;;  %v1909_v60 = vadd.f32 %v1908_v45, %v1820_v30  ;;  %v6159_v45 = vld [vmem:[#allocation38_spill] sm:$0xff] }
 0x28a   : > { %v1148_v39 = vpop.f32.mrf.mxu3 }
 0x28b   : > { %v1149_v35 = vadd.f32 %v1148_v39, %v5240_v24  ;;  %v3997_v39 = vld [vmem:[#allocation8 + $0x1b4] sm:$0xf] }
 0x28c   : > { %v1997_v58 = vpop.f32.mrf.mxu2  ;;  %v1822_v28 = vpop.f32.mrf.mxu0 }
 0x28d   : > { %v5469_v9 = vadd.f32 %v1997_v58, %v1909_v60  ;;  %v1272_v41 = vmax.f32 %v1149_v35, 0.0  ;;  %v1823_v61 = vadd.f32 %v1822_v28, %v5207_v23  ;;  %v1911_v54 = vpop.f32.mrf.mxu1  ;;  %v3754_v60 = vld [vmem:[#allocation8 + $0x1b8] sm:$0xf0] }
 0x28e   : > { %v3757_v58 = vor.u32 %v3997_v39, %v3754_v60 }
 0x28f   : > { %6156 = vst [vmem:[#allocation31_spill] sm:$0xff] %v5469_v9  ;;  %v1912_v27 = vadd.f32 %v1911_v54, %v1823_v61  ;;  %2048 = vmatmul.bf16.gmra.mxu3 %v5376_v56  ;;  %2137 = vmatmul.bf16.gmra.mxu0 %v6157_v20  ;;  %v5474_v30 = vpack.c.bf16 %v1272_v41, %v1268_v5 }
 0x290   : > { %2226 = vmatmul.bf16.gmra.mxu1 %v6158_v16  ;;  %2370 = vmatpush.bf16.msrb.mxu3 %v3757_v58 }
 0x291   : > { %2315 = vmatmul.bf16.gmra.mxu2 %v6159_v45 }
 0x292   : > { %v1151_v9 = vpop.f32.mrf.mxu3 }
 0x293   : > { %v1152_v5 = vadd.f32 %v1151_v9, %v5240_v24  ;;  %v6161_v9 = vld [vmem:[#allocation41_spill] sm:$0xff] }
 0x294   : > { %v2000_v63 = vpop.f32.mrf.mxu2  ;;  %v1824_v28 = vpop.f32.mrf.mxu0 }
 0x295   : > { %v5478_v35 = vadd.f32 %v2000_v63, %v1912_v27  ;;  %v1825_v61 = vadd.f32 %v1824_v28, %v5207_v23  ;;  %v1913_v54 = vpop.f32.mrf.mxu1  ;;  %v1276_v39 = vmax.f32 %v1152_v5, 0.0  ;;  %v6160_v28 = vld [vmem:[#allocation40_spill] sm:$0xff] }
 0x297   : > { %v1914_v56 = vadd.f32 %v1913_v54, %v1825_v61  ;;  %v6162_v54 = vld [vmem:[#allocation42_spill] sm:$0xff] }
 0x29a   : > { %v1153_v41 = vpop.f32.mrf.mxu3 }
 0x29b   : > { %v1154_v20 = vadd.f32 %v1153_v41, %v5240_v24  ;;  %v4014_v41 = vld [vmem:[#allocation10 + $0x38] sm:$0xff] }
 0x29c   : > { %v2002_v16 = vpop.f32.mrf.mxu2  ;;  %v1827_v1 = vpop.f32.mrf.mxu0  ;;  %2683 = vmatpush.bf16.msrb.mxu0 %v4014_v41 }
 0x29d   : > { %v5483_v45 = vadd.f32 %v2002_v16, %v1914_v56  ;;  %v1280_v60 = vmax.f32 %v1154_v20, 0.0  ;;  %v1828_v58 = vadd.f32 %v1827_v1, %v5207_v23  ;;  %v1916_v27 = vpop.f32.mrf.mxu1  ;;  %v4022_v56 = vld [vmem:[#allocation10 + $0x78] sm:$0xff] }
 0x29e   : > { %2772 = vmatpush.bf16.msrb.mxu1 %v4022_v56 }
 0x29f   : > { %v1917_v63 = vadd.f32 %v1916_v27, %v1828_v58  ;;  %2053 = vmatmul.bf16.gmra.mxu3 %v5390_v7  ;;  %2142 = vmatmul.bf16.gmra.mxu0 %v6160_v28  ;;  %v5488_v61 = vpack.c.bf16 %v1280_v60, %v1276_v39  ;;  %v4173_v60 = vld [vmem:[%s6050_s4] sm:$0x3] }
 0x2a0   : > { %2231 = vmatmul.bf16.gmra.mxu1 %v6161_v9  ;;  %v5499_v28 = vperm.slane %v4173_v60, 1 }
 0x2a1   : > { %2320 = vmatmul.bf16.gmra.mxu2 %v6162_v54 }
 0x2a2   : > { %v1156_v16 = vpop.f32.mrf.mxu3 }
 0x2a3   : > { %v1157_v39 = vadd.f32 %v1156_v16, %v5240_v24 }
 0x2a4   : > { %v2005_v5 = vpop.f32.mrf.mxu2  ;;  %v1829_v1 = vpop.f32.mrf.mxu0 }
 0x2a5   : > { %v5492_v20 = vadd.f32 %v2005_v5, %v1917_v63  ;;  %v1830_v58 = vadd.f32 %v1829_v1, %v5207_v23  ;;  %v1918_v27 = vpop.f32.mrf.mxu1  ;;  %v1284_v5 = vmax.f32 %v1157_v39, 0.0  ;;  %v6166_v39 = vld [vmem:[#allocation44_spill] sm:$0xff] }
 0x2a7   : > { %6163 = vst [vmem:[#allocation32_spill] sm:$0xff] %v5492_v20  ;;  %v1919_v7 = vadd.f32 %v1918_v27, %v1830_v58  ;;  %v6165_v27 = vld [vmem:[#allocation43_spill] sm:$0xff] }
 0x2aa   : > { %v1158_v9 = vpop.f32.mrf.mxu3 }
 0x2ab   : > { %v1159_v54 = vadd.f32 %v1158_v9, %v5240_v24  ;;  %v3995_v24 = vld [vmem:[#allocation8 + $0x1a4] sm:$0xf] }
 0x2ac   : > { %v2007_v41 = vpop.f32.mrf.mxu2  ;;  %v2108_v63 = vpop.f32.mrf.mxu0 }
 0x2ad   : > { %v5502_v56 = vadd.f32 %v2007_v41, %v1919_v7  ;;  %v1288_v20 = vmax.f32 %v1159_v54, 0.0  ;;  %v2109_v23 = vadd.f32 %v2108_v63, %v5499_v28  ;;  %v2197_v1 = vpop.f32.mrf.mxu1  ;;  %v3746_v7 = vld [vmem:[#allocation8 + $0x1a8] sm:$0xf0] }
 0x2ae   : > { %v3749_v60 = vor.u32 %v3995_v24, %v3746_v7 }
 0x2af   : > { %6164 = vst [vmem:[#allocation33_spill] sm:$0xff] %v5502_v56  ;;  %v2198_v58 = vadd.f32 %v2197_v1, %v2109_v23  ;;  %2058 = vmatmul.bf16.gmra.mxu3 %v5404_v22  ;;  %2147 = vmatmul.bf16.gmra.mxu0 %v5212_v2  ;;  %v5507_v16 = vpack.c.bf16 %v1288_v20, %v1284_v5 }
 0x2b0   : > { %2236 = vmatmul.bf16.gmra.mxu1 %v5214_v11  ;;  %2371 = vmatpush.bf16.msrb.mxu3 %v3749_v60 }
 0x2b1   : > { %2325 = vmatmul.bf16.gmra.mxu2 %v6165_v27 }
 0x2b2   : > { %v2019_v9 = vpop.f32.mrf.mxu3 }
 0x2b3   : > { %v2020_v54 = vadd.f32 %v2019_v9, %v6166_v39 }
 0x2b4   : > { %v2286_v41 = vpop.f32.mrf.mxu2  ;;  %v2110_v23 = vpop.f32.mrf.mxu0 }
 0x2b5   : > { %v5512_v63 = vadd.f32 %v2286_v41, %v2198_v58  ;;  %v2111_v1 = vadd.f32 %v2110_v23, %v5499_v28  ;;  %v2199_v2 = vpop.f32.mrf.mxu1  ;;  %v2455_v24 = vmax.f32 %v2020_v54, 0.0 }
 0x2b7   : > { %v2200_v20 = vadd.f32 %v2199_v2, %v2111_v1 }
 0x2ba   : > { %v2021_v5 = vpop.f32.mrf.mxu3 }
 0x2bb   : > { %v2022_v11 = vadd.f32 %v2021_v5, %v5247_v46  ;;  %v4013_v46 = vld [vmem:[#allocation10 + $0x30] sm:$0xff] }
 0x2bc   : > { %v2288_v22 = vpop.f32.mrf.mxu2  ;;  %v2113_v56 = vpop.f32.mrf.mxu0  ;;  %2684 = vmatpush.bf16.msrb.mxu0 %v4013_v46 }
 0x2bd   : > { %v5516_v27 = vadd.f32 %v2288_v22, %v2200_v20  ;;  %v2457_v7 = vmax.f32 %v2022_v11, 0.0  ;;  %v2114_v9 = vadd.f32 %v2113_v56, %v5499_v28  ;;  %v2202_v39 = vpop.f32.mrf.mxu1  ;;  %v4021_v22 = vld [vmem:[#allocation10 + $0x70] sm:$0xff] }
 0x2be   : > { %2773 = vmatpush.bf16.msrb.mxu1 %v4021_v22  ;;  %v3738_v22 = vld [vmem:[#allocation8 + $0x198] sm:$0xf0] }
 0x2bf   : > { %v5519_v60 = vpack.c.bf16 %v2457_v7, %v2455_v24  ;;  %v2203_v58 = vadd.f32 %v2202_v39, %v2114_v9  ;;  %2063 = vmatmul.bf16.gmra.mxu3 %v5418_v52  ;;  %2152 = vmatmul.bf16.gmra.mxu0 %v5245_v42 }
 0x2c0   : > { %2241 = vmatmul.bf16.gmra.mxu1 %v5249_v40 }
 0x2c1   : > { %2330 = vmatmul.bf16.gmra.mxu2 %v5251_v36 }
 0x2c2   : > { %v2024_v41 = vpop.f32.mrf.mxu3 }
 0x2c3   : > { %v2025_v54 = vadd.f32 %v2024_v41, %v5272_v57 }
 0x2c4   : > { %v2291_v56 = vpop.f32.mrf.mxu2  ;;  %v2115_v1 = vpop.f32.mrf.mxu0 }
 0x2c5   : > { %v5526_v23 = vadd.f32 %v2291_v56, %v2203_v58  ;;  %v2116_v2 = vadd.f32 %v2115_v1, %v5499_v28  ;;  %v2204_v20 = vpop.f32.mrf.mxu1  ;;  %v2459_v7 = vmax.f32 %v2025_v54, 0.0 }
 0x2c7   : > { %v2205_v5 = vadd.f32 %v2204_v20, %v2116_v2 }
 0x2ca   : > { %v2026_v42 = vpop.f32.mrf.mxu3 }
 0x2cb   : > { %v2027_v40 = vadd.f32 %v2026_v42, %v5279_v55  ;;  %v3993_v55 = vld [vmem:[#allocation8 + $0x194] sm:$0xf] }
 0x2cc   : > { %v2293_v11 = vpop.f32.mrf.mxu2  ;;  %v2118_v24 = vpop.f32.mrf.mxu0  ;;  %v3741_v41 = vor.u32 %v3993_v55, %v3738_v22  ;;  %v4020_v55 = vld [vmem:[#allocation10 + $0x68] sm:$0xff] }
 0x2cd   : > { %v5530_v36 = vadd.f32 %v2293_v11, %v2205_v5  ;;  %v2461_v9 = vmax.f32 %v2027_v40, 0.0  ;;  %v2119_v39 = vadd.f32 %v2118_v24, %v5499_v28  ;;  %v2207_v57 = vpop.f32.mrf.mxu1  ;;  %2774 = vmatpush.bf16.msrb.mxu1 %v4020_v55 }
 0x2ce   : > { %2372 = vmatpush.bf16.msrb.mxu3 %v3741_v41 }
 0x2cf   : > { %v2208_v46 = vadd.f32 %v2207_v57, %v2119_v39  ;;  %2068 = vmatmul.bf16.gmra.mxu3 %v5432_v21  ;;  %2157 = vmatmul.bf16.gmra.mxu0 %v5277_v49  ;;  %v5535_v58 = vpack.c.bf16 %v2461_v9, %v2459_v7 }
 0x2d0   : > { %2246 = vmatmul.bf16.gmra.mxu1 %v5281_v53 }
 0x2d1   : > { %2335 = vmatmul.bf16.gmra.mxu2 %v5283_v14 }
 0x2d2   : > { %v2029_v56 = vpop.f32.mrf.mxu3 }
 0x2d3   : > { %v2030_v54 = vadd.f32 %v2029_v56, %v5304_v37 }
 0x2d4   : > { %v2296_v1 = vpop.f32.mrf.mxu2  ;;  %v2120_v20 = vpop.f32.mrf.mxu0 }
 0x2d5   : > { %v5540_v2 = vadd.f32 %v2296_v1, %v2208_v46  ;;  %v2121_v5 = vadd.f32 %v2120_v20, %v5499_v28  ;;  %v2209_v49 = vpop.f32.mrf.mxu1  ;;  %v2463_v7 = vmax.f32 %v2030_v54, 0.0 }
 0x2d7   : > { %v2210_v42 = vadd.f32 %v2209_v49, %v2121_v5 }
 0x2da   : > { %v2031_v40 = vpop.f32.mrf.mxu3 }
 0x2db   : > { %v2032_v53 = vadd.f32 %v2031_v40, %v5311_v33  ;;  %v4012_v33 = vld [vmem:[#allocation10 + $0x28] sm:$0xff] }
 0x2dc   : > { %v2298_v11 = vpop.f32.mrf.mxu2  ;;  %v2123_v24 = vpop.f32.mrf.mxu0  ;;  %2685 = vmatpush.bf16.msrb.mxu0 %v4012_v33  ;;  %v6167_v33 = vld [vmem:[#allocation47_spill] sm:$0xff] }
 0x2dd   : > { %v5544_v14 = vadd.f32 %v2298_v11, %v2210_v42  ;;  %v2465_v9 = vmax.f32 %v2032_v53, 0.0  ;;  %v2124_v37 = vadd.f32 %v2123_v24, %v5499_v28  ;;  %v2212_v39 = vpop.f32.mrf.mxu1 }
 0x2df   : > { %v2213_v57 = vadd.f32 %v2212_v39, %v2124_v37  ;;  %2073 = vmatmul.bf16.gmra.mxu3 %v5446_v4  ;;  %2162 = vmatmul.bf16.gmra.mxu0 %v5309_v32  ;;  %v5549_v46 = vpack.c.bf16 %v2465_v9, %v2463_v7  ;;  %v3730_v37 = vld [vmem:[#allocation8 + $0x188] sm:$0xf0] }
 0x2e0   : > { %2251 = vmatmul.bf16.gmra.mxu1 %v5313_v50 }
 0x2e1   : > { %2340 = vmatmul.bf16.gmra.mxu2 %v5315_v43 }
 0x2e2   : > { %v2034_v22 = vpop.f32.mrf.mxu3 }
 0x2e3   : > { %v2035_v41 = vadd.f32 %v2034_v22, %v5324_v47 }
 0x2e4   : > { %v2301_v56 = vpop.f32.mrf.mxu2  ;;  %v2125_v1 = vpop.f32.mrf.mxu0 }
 0x2e5   : > { %v5554_v54 = vadd.f32 %v2301_v56, %v2213_v57  ;;  %v2126_v20 = vadd.f32 %v2125_v1, %v5499_v28  ;;  %v2214_v32 = vpop.f32.mrf.mxu1  ;;  %v2467_v53 = vmax.f32 %v2035_v41, 0.0  ;;  %v4011_v1 = vld [vmem:[#allocation10 + $0x20] sm:$0xff] }
 0x2e6   : > { %2686 = vmatpush.bf16.msrb.mxu0 %v4011_v1 }
 0x2e7   : > { %v2215_v5 = vadd.f32 %v2214_v32, %v2126_v20 }
 0x2ea   : > { %v2036_v49 = vpop.f32.mrf.mxu3 }
 0x2eb   : > { %v2037_v50 = vadd.f32 %v2036_v49, %v5329_v31  ;;  %v3991_v31 = vld [vmem:[#allocation8 + $0x184] sm:$0xf] }
 0x2ec   : > { %v2303_v42 = vpop.f32.mrf.mxu2  ;;  %v2128_v40 = vpop.f32.mrf.mxu0  ;;  %v3733_v39 = vor.u32 %v3991_v31, %v3730_v37  ;;  %v4009_v31 = vld [vmem:[#allocation10 + $0x10] sm:$0xff] }
 0x2ed   : > { %v5558_v43 = vadd.f32 %v2303_v42, %v2215_v5  ;;  %v2469_v11 = vmax.f32 %v2037_v50, 0.0  ;;  %v2129_v24 = vadd.f32 %v2128_v40, %v5499_v28  ;;  %v2217_v47 = vpop.f32.mrf.mxu1  ;;  %v6168_v50 = vld [vmem:[#allocation22_spill] sm:$0xff]  ;;  %v4010_v42 = vld [vmem:[#allocation10 + $0x18] sm:$0xff] }
 0x2ee   : > { %2373 = vmatpush.bf16.msrb.mxu3 %v3733_v39  ;;  %2687 = vmatpush.bf16.msrb.mxu0 %v4010_v42 }
 0x2ef   : > { %v5561_v7 = vadd.f32 %v2217_v47, %v2129_v24  ;;  %2078 = vmatmul.bf16.gmra.mxu3 %v5460_v6  ;;  %2167 = vmatmul.bf16.gmra.mxu0 %v4825_v48  ;;  %v5565_v9 = vpack.c.bf16 %v2469_v11, %v2467_v53  ;;  %v6169_v53 = vld [vmem:[#allocation26_spill] sm:$0xff] }
 0x2f0   : > { %2256 = vmatmul.bf16.gmra.mxu1 %v4953_v26  ;;  %v4019_v11 = vld [vmem:[#allocation10 + $0x60] sm:$0xff] }
 0x2f1   : > { %2345 = vmatmul.bf16.gmra.mxu2 %v5105_v12  ;;  %2775 = vmatpush.bf16.msrb.mxu1 %v4019_v11 }
 0x2f2   : > { %v2039_v57 = vpop.f32.mrf.mxu3  ;;  %2688 = vmatpush.bf16.msrb.mxu0 %v4009_v31 }
 0x2f3   : > { %v2040_v55 = vadd.f32 %v2039_v57, %v6167_v33  ;;  %v4008_v57 = vld [vmem:[#allocation10 + $0x8] sm:$0xff] }
 0x2f4   : > { %v5570_v22 = vpop.f32.mrf.mxu0 }
 0x2f5   : > { %v5572_v41 = vpop.f32.mrf.mxu1  ;;  %v2471_v32 = vmax.f32 %v2040_v55, 0.0 }
 0x2f6   : > { %2689 = vmatpush.bf16.msrb.mxu0 %v4008_v57 }
 0x2fa   : > { %v2041_v56 = vpop.f32.mrf.mxu3 }
 0x2fb   : > { %v2042_v48 = vadd.f32 %v2041_v56, %v5343_v25  ;;  %v6170_v25 = vld [vmem:[#allocation39_spill] sm:$0xff]  ;;  %v4007_v56 = vld [vmem:[#allocation10] sm:$0xff] }
 0x2fc   : > { %v2133_v20 = vpop.f32.mrf.mxu0  ;;  %2690 = vmatpush.bf16.msrb.mxu0 %v4007_v56 }
 0x2fd   : > { %v2473_v26 = vmax.f32 %v2042_v48, 0.0  ;;  %v2134_v12 = vadd.f32 %v2133_v20, %v5499_v28  ;;  %v2222_v5 = vpop.f32.mrf.mxu1 }
 0x2ff   : > { %v5576_v49 = vadd.f32 %v2222_v5, %v2134_v12  ;;  %2083 = vmatmul.bf16.gmra.mxu3 %v5474_v30  ;;  %2172 = vmatmul.bf16.gmra.mxu0 %v6168_v50  ;;  %v5580_v40 = vpack.c.bf16 %v2473_v26, %v2471_v32 }
 0x300   : > { %2261 = vmatmul.bf16.gmra.mxu1 %v6169_v53 }
 0x301   : > { %2350 = vmatmul.bf16.gmra.mxu2 %v6170_v25 }
 0x302   : > { %v2044_v24 = vpop.f32.mrf.mxu3 }
 0x303   : > { %v2045_v47 = vadd.f32 %v2044_v24, %v5352_v15 }
 0x304   : > { %v5585_v37 = vpop.f32.mrf.mxu0 }
 0x305   : > { %v5587_v39 = vpop.f32.mrf.mxu1  ;;  %v2475_v1 = vmax.f32 %v2045_v47, 0.0 }
 0x30a   : > { %v2046_v33 = vpop.f32.mrf.mxu3 }
 0x30b   : > { %v2047_v55 = vadd.f32 %v2046_v33, %v5357_v17 }
 0x30c   : > { %v2138_v48 = vpop.f32.mrf.mxu0 }
 0x30d   : > { %v2477_v20 = vmax.f32 %v2047_v55, 0.0  ;;  %v2139_v32 = vadd.f32 %v2138_v48, %v5499_v28  ;;  %v2227_v26 = vpop.f32.mrf.mxu1 }
 0x30f   : > { %v5591_v15 = vadd.f32 %v2227_v26, %v2139_v32  ;;  %2088 = vmatmul.bf16.gmra.mxu3 %v5488_v61  ;;  %2177 = vmatmul.bf16.gmra.mxu0 %v4871_v29  ;;  %v5595_v12 = vpack.c.bf16 %v2477_v20, %v2475_v1 }
 0x310   : > { %2266 = vmatmul.bf16.gmra.mxu1 %v5029_v44  ;;  %v4018_v44 = vld [vmem:[#allocation10 + $0x58] sm:$0xff] }
 0x311   : > { %2355 = vmatmul.bf16.gmra.mxu2 %v5181_v3  ;;  %2776 = vmatpush.bf16.msrb.mxu1 %v4018_v44 }
 0x312   : > { %v2049_v17 = vpop.f32.mrf.mxu3 }
 0x313   : > { %v2050_v5 = vadd.f32 %v2049_v17, %v5366_v34 }
 0x314   : > { %v5600_v50 = vpop.f32.mrf.mxu0 }
 0x315   : > { %v5602_v42 = vpop.f32.mrf.mxu1  ;;  %v2479_v24 = vmax.f32 %v2050_v5, 0.0 }
 0x31a   : > { %v2051_v53 = vpop.f32.mrf.mxu3 }
 0x31b   : > { %v2052_v25 = vadd.f32 %v2051_v53, %v5371_v18 }
 0x31c   : > { %v2143_v11 = vpop.f32.mrf.mxu0 }
 0x31d   : > { %v2481_v47 = vmax.f32 %v2052_v25, 0.0  ;;  %v2144_v29 = vadd.f32 %v2143_v11, %v5499_v28  ;;  %v2232_v31 = vpop.f32.mrf.mxu1 }
 0x31f   : > { %v5606_v57 = vadd.f32 %v2232_v31, %v2144_v29  ;;  %2093 = vmatmul.bf16.gmra.mxu3 %v5507_v16  ;;  %2182 = vmatmul.bf16.gmra.mxu0 %v4915_v19  ;;  %v5610_v3 = vpack.c.bf16 %v2481_v47, %v2479_v24 }
 0x320   : > { %2271 = vmatmul.bf16.gmra.mxu1 %v5067_v51 }
 0x321   : > { %2360 = vmatmul.bf16.gmra.mxu2 %v5221_v13  ;;  %v4030_v13 = vld [vmem:[#allocation11 + $0x38] sm:$0xff] }
 0x322   : > { %v2054_v34 = vpop.f32.mrf.mxu3  ;;  %2977 = vmatpush.bf16.msrb.mxu2 %v4030_v13 }
 0x323   : > { %v2055_v18 = vadd.f32 %v2054_v34, %v5380_v38 }
 0x324   : > { %v5615_v33 = vpop.f32.mrf.mxu0 }
 0x325   : > { %v5617_v55 = vpop.f32.mrf.mxu1  ;;  %v2483_v19 = vmax.f32 %v2055_v18, 0.0  ;;  %v6171_v18 = vld [vmem:[#allocation53_spill] sm:$0xff] }
 0x32a   : > { %v2056_v56 = vpop.f32.mrf.mxu3 }
 0x32b   : > { %v2057_v48 = vadd.f32 %v2056_v56, %v5385_v59 }
 0x32c   : > { %v2148_v1 = vpop.f32.mrf.mxu0 }
 0x32d   : > { %v2485_v20 = vmax.f32 %v2057_v48, 0.0  ;;  %v2149_v32 = vadd.f32 %v2148_v1, %v5499_v28  ;;  %v2237_v26 = vpop.f32.mrf.mxu1 }
 0x32f   : > { %v5621_v51 = vadd.f32 %v2237_v26, %v2149_v32  ;;  %2374 = vmatmul.bf16.vlgmr.msrb.gmra.mxu3 %v5254_v10  ;;  %2691 = vmatmul.bf16.vlgmr.msrb.gmra.mxu0 %v5519_v60  ;;  %v5625_v38 = vpack.c.bf16 %v2485_v20, %v2483_v19  ;;  %v6172_v19 = vld [vmem:[#allocation54_spill] sm:$0xff] }
 0x332   : > { %v2059_v17 = vpop.f32.mrf.mxu3 }
 0x333   : > { %v2060_v5 = vadd.f32 %v2059_v17, %v5394_v8  ;;  %v4017_v8 = vld [vmem:[#allocation10 + $0x50] sm:$0xff] }
 0x334   : > { %v5628_v59 = vpop.f32.mrf.mxu0  ;;  %2777 = vmatpush.bf16.msrb.mxu1 %v4017_v8 }
 0x335   : > { %v5630_v53 = vpop.f32.mrf.mxu1  ;;  %v2487_v47 = vmax.f32 %v2060_v5, 0.0  ;;  %v6173_v5 = vld [vmem:[#allocation45_spill] sm:$0xff] }
 0x33a   : > { %v2061_v25 = vpop.f32.mrf.mxu3 }
 0x33b   : > { %v2062_v11 = vadd.f32 %v2061_v25, %v5399_v62  ;;  %v4029_v25 = vld [vmem:[#allocation11 + $0x30] sm:$0xff] }
 0x33c   : > { %v2153_v24 = vpop.f32.mrf.mxu0  ;;  %2978 = vmatpush.bf16.msrb.mxu2 %v4029_v25 }
 0x33d   : > { %v2489_v29 = vmax.f32 %v2062_v11, 0.0  ;;  %v2154_v10 = vadd.f32 %v2153_v24, %v5499_v28  ;;  %v2242_v60 = vpop.f32.mrf.mxu1 }
 0x33f   : > { %v5634_v31 = vadd.f32 %v2242_v60, %v2154_v10  ;;  %2379 = vmatmul.bf16.gmra.mxu3 %v5288_v0  ;;  %2696 = vmatmul.bf16.gmra.mxu0 %v5535_v58  ;;  %v5638_v44 = vpack.c.bf16 %v2489_v29, %v2487_v47  ;;  %v6174_v47 = vld [vmem:[#allocation23_spill] sm:$0xff] }
 0x342   : > { %v2064_v34 = vpop.f32.mrf.mxu3 }
 0x343   : > { %v2065_v56 = vadd.f32 %v2064_v34, %v6171_v18  ;;  %v6175_v34 = vld [vmem:[#allocation24_spill] sm:$0xff] }
 0x344   : > { %v5641_v62 = vpop.f32.mrf.mxu0 }
 0x345   : > { %v5643_v48 = vpop.f32.mrf.mxu1  ;;  %v2491_v26 = vmax.f32 %v2065_v56, 0.0 }
 0x34a   : > { %v2066_v1 = vpop.f32.mrf.mxu3 }
 0x34b   : > { %v2067_v20 = vadd.f32 %v2066_v1, %v6172_v19 }
 0x34c   : > { %v2158_v32 = vpop.f32.mrf.mxu0 }
 0x34d   : > { %v2493_v13 = vmax.f32 %v2067_v20, 0.0  ;;  %v2159_v0 = vadd.f32 %v2158_v32, %v5499_v28  ;;  %v2247_v58 = vpop.f32.mrf.mxu1 }
 0x34f   : > { %v5647_v17 = vadd.f32 %v2247_v58, %v2159_v0  ;;  %2384 = vmatmul.bf16.gmra.mxu3 %v6173_v5  ;;  %2701 = vmatmul.bf16.gmra.mxu0 %v5549_v46  ;;  %v5651_v11 = vpack.c.bf16 %v2493_v13, %v2491_v26  ;;  %v6177_v26 = vld [vmem:[#allocation46_spill] sm:$0xff]  ;;  %v4016_v13 = vld [vmem:[#allocation10 + $0x48] sm:$0xff]  ;;  %v6178_v5 = vld [vmem:[#allocation25_spill] sm:$0xff] }
 0x350   : > { %2778 = vmatpush.bf16.msrb.mxu1 %v4016_v13 }
 0x352   : > { %v2069_v24 = vpop.f32.mrf.mxu3 }
 0x353   : > { %v2070_v29 = vadd.f32 %v2069_v24, %v6174_v47 }
 0x354   : > { %v5654_v10 = vpop.f32.mrf.mxu0 }
 0x355   : > { %v5656_v60 = vpop.f32.mrf.mxu1  ;;  %v2495_v1 = vmax.f32 %v2070_v29, 0.0 }
 0x35a   : > { %v2071_v8 = vpop.f32.mrf.mxu3 }
 0x35b   : > { %v2072_v18 = vadd.f32 %v2071_v8, %v6175_v34  ;;  %v6180_v8 = vld [vmem:[#allocation27_spill] sm:$0xff] }
 0x35c   : > { %v2163_v56 = vpop.f32.mrf.mxu0 }
 0x35d   : > { %v2497_v19 = vmax.f32 %v2072_v18, 0.0  ;;  %v2164_v20 = vadd.f32 %v2163_v56, %v5499_v28  ;;  %v2252_v46 = vpop.f32.mrf.mxu1 }
 0x35f   : > { %v5660_v32 = vadd.f32 %v2252_v46, %v2164_v20  ;;  %2389 = vmatmul.bf16.gmra.mxu3 %v6177_v26  ;;  %2706 = vmatmul.bf16.gmra.mxu0 %v5565_v9  ;;  %v5664_v0 = vpack.c.bf16 %v2497_v19, %v2495_v1  ;;  %v6182_v1 = vld [vmem:[#allocation48_spill] sm:$0xff]  ;;  %v4028_v19 = vld [vmem:[#allocation11 + $0x28] sm:$0xff] }
 0x360   : > { %2979 = vmatpush.bf16.msrb.mxu2 %v4028_v19 }
 0x361   : > { %6176 = vst [vmem:[#allocation34_spill] sm:$0xff] %v5660_v32 }
 0x362   : > { %v2074_v58 = vpop.f32.mrf.mxu3 }
 0x363   : > { %v2075_v25 = vadd.f32 %v2074_v58, %v6178_v5  ;;  %v6183_v5 = vld [vmem:[#allocation28_spill] sm:$0xff] }
 0x364   : > { %v5667_v24 = vpop.f32.mrf.mxu0 }
 0x365   : > { %v5669_v47 = vpop.f32.mrf.mxu1  ;;  %v2499_v56 = vmax.f32 %v2075_v25, 0.0 }
 0x366   : > { %6179 = vst [vmem:[#allocation35_spill] sm:$0xff] %v5669_v47 }
 0x36a   : > { %v2076_v29 = vpop.f32.mrf.mxu3 }
 0x36b   : > { %v2077_v34 = vadd.f32 %v2076_v29, %v6180_v8 }
 0x36c   : > { %v2168_v18 = vpop.f32.mrf.mxu0 }
 0x36d   : > { %v2501_v20 = vmax.f32 %v2077_v34, 0.0  ;;  %v2169_v46 = vadd.f32 %v2168_v18, %v5499_v28  ;;  %v2257_v9 = vpop.f32.mrf.mxu1  ;;  %v6186_v34 = vld [vmem:[#allocation29_spill] sm:$0xff] }
 0x36f   : > { %v5673_v26 = vadd.f32 %v2257_v9, %v2169_v46  ;;  %2394 = vmatmul.bf16.gmra.mxu3 %v6182_v1  ;;  %2711 = vmatmul.bf16.gmra.mxu0 %v5580_v40  ;;  %v5677_v13 = vpack.c.bf16 %v2501_v20, %v2499_v56  ;;  %v6188_v56 = vld [vmem:[#allocation49_spill] sm:$0xff]  ;;  %v4015_v20 = vld [vmem:[#allocation10 + $0x40] sm:$0xff] }
 0x370   : > { %2779 = vmatpush.bf16.msrb.mxu1 %v4015_v20 }
 0x371   : > { %6181 = vst [vmem:[#allocation36_spill] sm:$0xff] %v5673_v26 }
 0x372   : > { %v2079_v58 = vpop.f32.mrf.mxu3 }
 0x373   : > { %v2080_v47 = vadd.f32 %v2079_v58, %v6183_v5  ;;  %v6189_v5 = vld [vmem:[#allocation30_spill] sm:$0xff] }
 0x374   : > { %v5680_v29 = vpop.f32.mrf.mxu0 }
 0x375   : > { %6184 = vst [vmem:[#allocation37_spill] sm:$0xff] %v5680_v29  ;;  %v5682_v25 = vpop.f32.mrf.mxu1  ;;  %v2503_v9 = vmax.f32 %v2080_v47, 0.0  ;;  %v4027_v29 = vld [vmem:[#allocation11 + $0x20] sm:$0xff] }
 0x376   : > { %6185 = vst [vmem:[#allocation38_spill] sm:$0xff] %v5682_v25  ;;  %2980 = vmatpush.bf16.msrb.mxu2 %v4027_v29 }
 0x37a   : > { %v2081_v8 = vpop.f32.mrf.mxu3 }
 0x37b   : > { %v2082_v18 = vadd.f32 %v2081_v8, %v6186_v34 }
 0x37c   : > { %v2173_v46 = vpop.f32.mrf.mxu0 }
 0x37d   : > { %v2505_v26 = vmax.f32 %v2082_v18, 0.0  ;;  %v2174_v1 = vadd.f32 %v2173_v46, %v5499_v28  ;;  %v2262_v40 = vpop.f32.mrf.mxu1  ;;  %v6191_v18 = vld [vmem:[#allocation31_spill] sm:$0xff] }
 0x37f   : > { %v5686_v32 = vadd.f32 %v2262_v40, %v2174_v1  ;;  %2399 = vmatmul.bf16.gmra.mxu3 %v6188_v56  ;;  %2716 = vmatmul.bf16.gmra.mxu0 %v5595_v12  ;;  %v5690_v19 = vpack.c.bf16 %v2505_v26, %v2503_v9  ;;  %v6193_v9 = vld [vmem:[#allocation50_spill] sm:$0xff] }
 0x381   : > { %6187 = vst [vmem:[#allocation40_spill] sm:$0xff] %v5686_v32 }
 0x382   : > { %v2084_v58 = vpop.f32.mrf.mxu3 }
 0x383   : > { %v2085_v25 = vadd.f32 %v2084_v58, %v6189_v5 }
 0x384   : > { %v5693_v8 = vpop.f32.mrf.mxu0 }
 0x385   : > { %v5695_v47 = vpop.f32.mrf.mxu1  ;;  %v2507_v40 = vmax.f32 %v2085_v25, 0.0 }
 0x386   : > { %6190 = vst [vmem:[#allocation41_spill] sm:$0xff] %v5695_v47  ;;  %v6199_v47 = vld [vmem:[#allocation52_spill] sm:$0xff] }
 0x38a   : > { %v2086_v34 = vpop.f32.mrf.mxu3 }
 0x38b   : > { %v2087_v46 = vadd.f32 %v2086_v34, %v6191_v18 }
 0x38c   : > { %v2178_v1 = vpop.f32.mrf.mxu0 }
 0x38d   : > { %v2509_v32 = vmax.f32 %v2087_v46, 0.0  ;;  %v2179_v56 = vadd.f32 %v2178_v1, %v5499_v28  ;;  %v2267_v12 = vpop.f32.mrf.mxu1 }
 0x38f   : > { %v5699_v26 = vadd.f32 %v2267_v12, %v2179_v56  ;;  %2404 = vmatmul.bf16.gmra.mxu3 %v6193_v9  ;;  %2721 = vmatmul.bf16.gmra.mxu0 %v5610_v3  ;;  %v5703_v20 = vpack.c.bf16 %v2509_v32, %v2507_v40  ;;  %v6196_v32 = vld [vmem:[#allocation51_spill] sm:$0xff]  ;;  %v6197_v40 = vld [vmem:[#allocation32_spill] sm:$0xff] }
 0x391   : > { %6192 = vst [vmem:[#allocation42_spill] sm:$0xff] %v5699_v26 }
 0x392   : > { %v2089_v58 = vpop.f32.mrf.mxu3 }
 0x393   : > { %v2090_v5 = vadd.f32 %v2089_v58, %v5478_v35 }
 0x394   : > { %v5706_v34 = vpop.f32.mrf.mxu0 }
 0x395   : > { %6194 = vst [vmem:[#allocation43_spill] sm:$0xff] %v5706_v34  ;;  %v5708_v25 = vpop.f32.mrf.mxu1  ;;  %v2511_v56 = vmax.f32 %v2090_v5, 0.0  ;;  %v6198_v34 = vld [vmem:[#allocation33_spill] sm:$0xff] }
 0x396   : > { %6195 = vst [vmem:[#allocation44_spill] sm:$0xff] %v5708_v25 }
 0x39a   : > { %v2091_v18 = vpop.f32.mrf.mxu3 }
 0x39b   : > { %v2092_v46 = vadd.f32 %v2091_v18, %v5483_v45 }
 0x39c   : > { %v2183_v1 = vpop.f32.mrf.mxu0 }
 0x39d   : > { %v2513_v12 = vmax.f32 %v2092_v46, 0.0  ;;  %v2184_v9 = vadd.f32 %v2183_v1, %v5499_v28  ;;  %v2272_v26 = vpop.f32.mrf.mxu1  ;;  %v4026_v46 = vld [vmem:[#allocation11 + $0x18] sm:$0xff] }
 0x39e   : > { %2981 = vmatpush.bf16.msrb.mxu2 %v4026_v46 }
 0x39f   : > { %v5712_v3 = vadd.f32 %v2272_v26, %v2184_v9  ;;  %2409 = vmatmul.bf16.gmra.mxu3 %v6196_v32  ;;  %2726 = vmatmul.bf16.gmra.mxu0 %v5625_v38  ;;  %v5716_v35 = vpack.c.bf16 %v2513_v12, %v2511_v56 }
 0x3a2   : > { %v2094_v29 = vpop.f32.mrf.mxu3 }
 0x3a3   : > { %v2095_v58 = vadd.f32 %v2094_v29, %v6197_v40  ;;  %v2306_v29 = vpop.f32.mrf.mxu2 }
 0x3a5   : > { %v2515_v18 = vmax.f32 %v2095_v58, 0.0 }
 0x3aa   : > { %v2096_v25 = vpop.f32.mrf.mxu3 }
 0x3ab   : > { %v2097_v45 = vadd.f32 %v2096_v25, %v6198_v34 }
 0x3ad   : > { %v2517_v5 = vmax.f32 %v2097_v45, 0.0 }
 0x3af   : > { %2414 = vmatmul.bf16.gmra.mxu3 %v6199_v47  ;;  %2731 = vmatmul.bf16.gmra.mxu0 %v5638_v44  ;;  %v5722_v26 = vpack.c.bf16 %v2517_v5, %v2515_v18  ;;  %v2308_v44 = vpop.f32.mrf.mxu2  ;;  %v4025_v18 = vld [vmem:[#allocation11 + $0x10] sm:$0xff] }
 0x3b0   : > { %2982 = vmatpush.bf16.msrb.mxu2 %v4025_v18 }
 0x3b2   : > { %v2375_v1 = vpop.f32.mrf.mxu3 }
 0x3b3   : > { %v2376_v38 = vadd.f32 %v2375_v1, %v5512_v63 }
 0x3b5   : > { %v2456_v9 = vmax.f32 %v2376_v38, 0.0 }
 0x3b7   : > { %v2311_v5 = vpop.f32.mrf.mxu2 }
 0x3ba   : > { %v2377_v56 = vpop.f32.mrf.mxu3 }
 0x3bb   : > { %v2378_v12 = vadd.f32 %v2377_v56, %v5516_v27  ;;  %v5730_v27 = vpop.f32.mrf.mxu0 }
 0x3bd   : > { %v2458_v32 = vmax.f32 %v2378_v12, 0.0 }
 0x3bf   : > { %v2520_v34 = vpack.c.bf16 %v2458_v32, %v2456_v9  ;;  %2419 = vmatmul.bf16.gmra.mxu3 %v5418_v52  ;;  %2736 = vmatmul.bf16.gmra.mxu0 %v5651_v11  ;;  %v2313_v38 = vpop.f32.mrf.mxu2 }
 0x3c1   : > { %2780 = vmatmul.bf16.vlgmr.msrb.gmra.mxu1 %v2520_v34 }
 0x3c2   : > { %v2380_v47 = vpop.f32.mrf.mxu3 }
 0x3c3   : > { %v2381_v25 = vadd.f32 %v2380_v47, %v5526_v23  ;;  %v5734_v46 = vpop.f32.mrf.mxu0 }
 0x3c5   : > { %v2460_v63 = vmax.f32 %v2381_v25, 0.0 }
 0x3c7   : > { %v2316_v32 = vpop.f32.mrf.mxu2 }
 0x3ca   : > { %v2382_v40 = vpop.f32.mrf.mxu3 }
 0x3cb   : > { %v2383_v58 = vadd.f32 %v2382_v40, %v5530_v36  ;;  %v5740_v9 = vpop.f32.mrf.mxu0 }
 0x3cd   : > { %v2462_v45 = vmax.f32 %v2383_v58, 0.0 }
 0x3cf   : > { %2424 = vmatmul.bf16.gmra.mxu3 %v5432_v21  ;;  %2741 = vmatmul.bf16.gmra.mxu0 %v5664_v0  ;;  %v2522_v52 = vpack.c.bf16 %v2462_v45, %v2460_v63  ;;  %v2318_v58 = vpop.f32.mrf.mxu2  ;;  %v2307_v45 = vadd.f32 %v2306_v29, %v5561_v7  ;;  %v2312_v29 = vadd.f32 %v2311_v5, %v5576_v49 }
 0x3d1   : > { %2785 = vmatmul.bf16.gmra.mxu1 %v2522_v52 }
 0x3d2   : > { %v2385_v11 = vpop.f32.mrf.mxu3 }
 0x3d3   : > { %v2386_v23 = vadd.f32 %v2385_v11, %v5540_v2  ;;  %v5744_v25 = vpop.f32.mrf.mxu0 }
 0x3d5   : > { %v2464_v56 = vmax.f32 %v2386_v23, 0.0 }
 0x3d7   : > { %v2321_v23 = vpop.f32.mrf.mxu2 }
 0x3da   : > { %v2387_v1 = vpop.f32.mrf.mxu3 }
 0x3db   : > { %v2388_v36 = vadd.f32 %v2387_v1, %v5544_v14  ;;  %v5752_v18 = vpop.f32.mrf.mxu0 }
 0x3dd   : > { %v2466_v12 = vmax.f32 %v2388_v36, 0.0 }
 0x3df   : > { %2429 = vmatmul.bf16.gmra.mxu3 %v5446_v4  ;;  %2746 = vmatmul.bf16.gmra.mxu0 %v5677_v13  ;;  %v2524_v21 = vpack.c.bf16 %v2466_v12, %v2464_v56  ;;  %v4024_v13 = vld [vmem:[#allocation11 + $0x8] sm:$0xff] }
 0x3e0   : > { %2983 = vmatpush.bf16.msrb.mxu2 %v4024_v13 }
 0x3e1   : > { %2790 = vmatmul.bf16.gmra.mxu1 %v2524_v21 }
 0x3e2   : > { %v2390_v0 = vpop.f32.mrf.mxu3 }
 0x3e3   : > { %v2391_v34 = vadd.f32 %v2390_v0, %v5554_v54  ;;  %v2131_v54 = vadd.f32 %v5570_v22, %v5499_v28  ;;  %v5756_v12 = vpop.f32.mrf.mxu0  ;;  %v2136_v22 = vadd.f32 %v5585_v37, %v5499_v28  ;;  %v4023_v37 = vld [vmem:[#allocation11] sm:$0xff] }
 0x3e4   : > { %2984 = vmatpush.bf16.msrb.mxu2 %v4023_v37 }
 0x3e5   : > { %v2468_v14 = vmax.f32 %v2391_v34, 0.0 }
 0x3ea   : > { %v2392_v47 = vpop.f32.mrf.mxu3 }
 0x3eb   : > { %v2393_v2 = vadd.f32 %v2392_v47, %v5558_v43  ;;  %v2220_v43 = vadd.f32 %v5572_v41, %v2131_v54  ;;  %v2323_v41 = vpop.f32.mrf.mxu2  ;;  %v5762_v47 = vpop.f32.mrf.mxu0 }
 0x3ed   : > { %v2470_v40 = vmax.f32 %v2393_v2, 0.0  ;;  %v2309_v52 = vadd.f32 %v2308_v44, %v2220_v43  ;;  %v2225_v44 = vadd.f32 %v5587_v39, %v2136_v22  ;;  %v2141_v39 = vadd.f32 %v5600_v50, %v5499_v28 }
 0x3ef   : > { %2434 = vmatmul.bf16.gmra.mxu3 %v5460_v6  ;;  %2751 = vmatmul.bf16.gmra.mxu0 %v5690_v19  ;;  %v2526_v4 = vpack.c.bf16 %v2470_v40, %v2468_v14  ;;  %v2314_v21 = vadd.f32 %v2313_v38, %v2225_v44  ;;  %v2317_v38 = vadd.f32 %v2316_v32, %v5591_v15  ;;  %v5789_v44 = vld [vmem:[%s6052_s6] ss:$0 sm:$0xff] }
 0x3f0   : > { %v2146_v15 = vadd.f32 %v5615_v33, %v5499_v28  ;;  %v2322_v32 = vadd.f32 %v2321_v23, %v5606_v57  ;;  %v5782_v33 = vpop.f32.mrf.mxu1 }
 0x3f1   : > { %2795 = vmatmul.bf16.gmra.mxu1 %v2526_v4  ;;  %v2230_v4 = vadd.f32 %v5602_v42, %v2141_v39 }
 0x3f2   : > { %v2395_v63 = vpop.f32.mrf.mxu3 }
 0x3f3   : > { %v2396_v11 = vadd.f32 %v2395_v63, %v2307_v45  ;;  %v2326_v14 = vpop.f32.mrf.mxu2  ;;  %v5768_v5 = vpop.f32.mrf.mxu0  ;;  %v2319_v13 = vadd.f32 %v2318_v58, %v2230_v4  ;;  %v2235_v58 = vadd.f32 %v5617_v55, %v2146_v15 }
 0x3f4   : > { %v2327_v57 = vadd.f32 %v2326_v14, %v5621_v51 }
 0x3f5   : > { %v2472_v1 = vmax.f32 %v2396_v11, 0.0 }
 0x3fa   : > { %v2397_v6 = vpop.f32.mrf.mxu3 }
 0x3fb   : > { %v2398_v19 = vadd.f32 %v2397_v6, %v2309_v52  ;;  %v2328_v63 = vpop.f32.mrf.mxu2  ;;  %v5772_v52 = vpop.f32.mrf.mxu0  ;;  %v2324_v6 = vadd.f32 %v2323_v41, %v2235_v58 }
 0x3fd   : > { %v2474_v36 = vmax.f32 %v2398_v19, 0.0 }
 0x3ff   : > { %v2528_v56 = vpack.c.bf16 %v2474_v36, %v2472_v1  ;;  %2439 = vmatmul.bf16.gmra.mxu3 %v5474_v30  ;;  %2756 = vmatmul.bf16.gmra.mxu0 %v5703_v20 }
 0x401   : > { %2800 = vmatmul.bf16.gmra.mxu1 %v2528_v56 }
 0x402   : > { %v2400_v7 = vpop.f32.mrf.mxu3 }
 0x403   : > { %v2401_v0 = vadd.f32 %v2400_v7, %v2312_v29  ;;  %v2331_v42 = vpop.f32.mrf.mxu2  ;;  %v2151_v29 = vadd.f32 %v5628_v59, %v5499_v28  ;;  %v2693_v59 = vadd.f32 %v5789_v44, %v5734_v46  ;;  %v2695_v46 = vadd.f32 %v5789_v44, %v5740_v9 }
 0x404   : > { %v2698_v9 = vadd.f32 %v5789_v44, %v5744_v25 }
 0x405   : > { %v2476_v2 = vmax.f32 %v2401_v0, 0.0  ;;  %v2240_v55 = vadd.f32 %v5630_v53, %v2151_v29 }
 0x407   : > { %v2329_v41 = vadd.f32 %v2328_v63, %v2240_v55 }
 0x40a   : > { %v2402_v34 = vpop.f32.mrf.mxu3 }
 0x40b   : > { %v2403_v30 = vadd.f32 %v2402_v34, %v2314_v21  ;;  %v2333_v56 = vpop.f32.mrf.mxu2 }
 0x40d   : > { %v2478_v20 = vmax.f32 %v2403_v30, 0.0 }
 0x40f   : > { %v2530_v40 = vpack.c.bf16 %v2478_v20, %v2476_v2  ;;  %2444 = vmatmul.bf16.gmra.mxu3 %v5488_v61  ;;  %2761 = vmatmul.bf16.gmra.mxu0 %v5716_v35 }
 0x411   : > { %2805 = vmatmul.bf16.gmra.mxu1 %v2530_v40 }
 0x412   : > { %v2405_v49 = vpop.f32.mrf.mxu3 }
 0x413   : > { %v2406_v54 = vadd.f32 %v2405_v49, %v2317_v38  ;;  %v2336_v23 = vpop.f32.mrf.mxu2  ;;  %v2156_v49 = vadd.f32 %v5641_v62, %v5499_v28  ;;  %v2332_v38 = vadd.f32 %v2331_v42, %v5634_v31 }
 0x415   : > { %v2480_v43 = vmax.f32 %v2406_v54, 0.0  ;;  %v2245_v4 = vadd.f32 %v5643_v48, %v2156_v49 }
 0x417   : > { %v2334_v63 = vadd.f32 %v2333_v56, %v2245_v4  ;;  %v2337_v56 = vadd.f32 %v2336_v23, %v5647_v17 }
 0x41a   : > { %v2407_v45 = vpop.f32.mrf.mxu3 }
 0x41b   : > { %v2408_v61 = vadd.f32 %v2407_v45, %v2319_v13  ;;  %v2338_v14 = vpop.f32.mrf.mxu2 }
 0x41d   : > { %v2482_v35 = vmax.f32 %v2408_v61, 0.0 }
 0x41f   : > { %v2532_v11 = vpack.c.bf16 %v2482_v35, %v2480_v43  ;;  %2449 = vmatmul.bf16.gmra.mxu3 %v5507_v16  ;;  %2766 = vmatmul.bf16.gmra.mxu0 %v5722_v26 }
 0x421   : > { %2810 = vmatmul.bf16.gmra.mxu1 %v2532_v11  ;;  %v5806_v11 = vpop.f32.mrf.mxu0 }
 0x422   : > { %v2410_v50 = vpop.f32.mrf.mxu3 }
 0x423   : > { %v2411_v19 = vadd.f32 %v2410_v50, %v2322_v32  ;;  %v2341_v62 = vpop.f32.mrf.mxu2 }
 0x425   : > { %v2484_v7 = vmax.f32 %v2411_v19, 0.0 }
 0x42a   : > { %v2412_v1 = vpop.f32.mrf.mxu3 }
 0x42b   : > { %v2413_v36 = vadd.f32 %v2412_v1, %v2324_v6  ;;  %v2161_v6 = vadd.f32 %v5654_v10, %v5499_v28  ;;  %v2343_v19 = vpop.f32.mrf.mxu2  ;;  %v2700_v1 = vadd.f32 %v5789_v44, %v5752_v18 }
 0x42d   : > { %v2486_v22 = vmax.f32 %v2413_v36, 0.0  ;;  %v5815_v36 = vpop.f32.mrf.mxu0 }
 0x42f   : > { %v2534_v16 = vpack.c.bf16 %v2486_v22, %v2484_v7  ;;  %v2250_v7 = vadd.f32 %v5656_v60, %v2161_v6  ;;  %v6204_v6 = vld [vmem:[#allocation38_spill] sm:$0xff] }
 0x431   : > { %2815 = vmatmul.bf16.gmra.mxu1 %v2534_v16  ;;  %v2339_v16 = vadd.f32 %v2338_v14, %v2250_v7  ;;  %v6201_v14 = vld [vmem:[#allocation35_spill] sm:$0xff] }
 0x432   : > { %v2415_v26 = vpop.f32.mrf.mxu3 }
 0x433   : > { %v2416_v21 = vadd.f32 %v2415_v26, %v2327_v57 }
 0x435   : > { %v2488_v30 = vmax.f32 %v2416_v21, 0.0  ;;  %v5822_v60 = vpop.f32.mrf.mxu0 }
 0x43a   : > { %v2417_v0 = vpop.f32.mrf.mxu3 }
 0x43b   : > { %v2418_v34 = vadd.f32 %v2417_v0, %v2329_v41  ;;  %v2703_v41 = vadd.f32 %v5789_v44, %v5756_v12  ;;  %v2705_v12 = vadd.f32 %v5789_v44, %v5762_v47  ;;  %v2708_v47 = vadd.f32 %v5789_v44, %v5768_v5 }
 0x43c   : > { %v2710_v5 = vadd.f32 %v5789_v44, %v5772_v52 }
 0x43d   : > { %v2490_v2 = vmax.f32 %v2418_v34, 0.0  ;;  %v2346_v34 = vpop.f32.mrf.mxu2  ;;  %v5831_v4 = vpop.f32.mrf.mxu0 }
 0x43e   : > { %v2781_v51 = vpop.f32.mrf.mxu1 }
 0x43f   : > { %v2536_v20 = vpack.c.bf16 %v2490_v2, %v2488_v30  ;;  %v2782_v53 = vadd.f32 %v2781_v51, %v2693_v59  ;;  %v2166_v2 = vadd.f32 %v5667_v24, %v5499_v28 }
 0x441   : > { %v2861_v40 = vmax.f32 %v2782_v53, 0.0  ;;  %2820 = vmatmul.bf16.gmra.mxu1 %v2536_v20  ;;  %v6200_v20 = vld [vmem:[#allocation34_spill] sm:$0xff] }
 0x442   : > { %v2420_v37 = vpop.f32.mrf.mxu3  ;;  %v2342_v53 = vadd.f32 %v2341_v62, %v6200_v20 }
 0x443   : > { %3098 = vst [vmem:[%s5798_s12] sm:$0xff] %v2861_v40  ;;  %v2421_v54 = vadd.f32 %v2420_v37, %v2332_v38 }
 0x445   : > { %v2492_v50 = vmax.f32 %v2421_v54, 0.0 }
 0x446   : > { %v2783_v39 = vpop.f32.mrf.mxu1 }
 0x447   : > { %v2784_v13 = vadd.f32 %v2783_v39, %v2695_v46  ;;  %v2348_v46 = vpop.f32.mrf.mxu2 }
 0x449   : > { %v2862_v45 = vmax.f32 %v2784_v13, 0.0 }
 0x44a   : > { %v2422_v61 = vpop.f32.mrf.mxu3 }
 0x44b   : > { %v2893_v43 = vpack.c.bf16 %v2862_v45, %v2861_v40  ;;  %3099 = vst [vmem:[%s5798_s12 + $0x8] sm:$0xff] %v2862_v45  ;;  %v2423_v35 = vadd.f32 %v2422_v61, %v2334_v63  ;;  %v2255_v40 = vadd.f32 %v6201_v14, %v2166_v2  ;;  %v6206_v2 = vld [vmem:[#allocation41_spill] sm:$0xff] }
 0x44d   : > { %v2494_v15 = vmax.f32 %v2423_v35, 0.0  ;;  %2985 = vmatmul.bf16.vlgmr.msrb.gmra.mxu2 %v2893_v43  ;;  %v2344_v49 = vadd.f32 %v2343_v19, %v2255_v40 }
 0x44e   : > { %v2786_v31 = vpop.f32.mrf.mxu1 }
 0x44f   : > { %v2538_v48 = vpack.c.bf16 %v2494_v15, %v2492_v50  ;;  %v2787_v42 = vadd.f32 %v2786_v31, %v2698_v9  ;;  %v6202_v50 = vld [vmem:[#allocation37_spill] sm:$0xff]  ;;  %v2351_v31 = vpop.f32.mrf.mxu2 }
 0x450   : > { %v2171_v15 = vadd.f32 %v6202_v50, %v5499_v28 }
 0x451   : > { %v2863_v32 = vmax.f32 %v2787_v42, 0.0  ;;  %2825 = vmatmul.bf16.gmra.mxu1 %v2538_v48  ;;  %v5839_v48 = vpop.f32.mrf.mxu0 }
 0x452   : > { %v2425_v58 = vpop.f32.mrf.mxu3  ;;  %v2260_v19 = vadd.f32 %v6204_v6, %v2171_v15  ;;  %v6209_v15 = vld [vmem:[#allocation44_spill] sm:$0xff] }
 0x453   : > { %3100 = vst [vmem:[%s5798_s12 + $0x10] sm:$0xff] %v2863_v32  ;;  %v2426_v26 = vadd.f32 %v2425_v58, %v2337_v56 }
 0x455   : > { %v2496_v18 = vmax.f32 %v2426_v26, 0.0 }
 0x456   : > { %v2788_v25 = vpop.f32.mrf.mxu1 }
 0x457   : > { %v2789_v22 = vadd.f32 %v2788_v25, %v2700_v1  ;;  %v2349_v25 = vadd.f32 %v2348_v46, %v2260_v19 }
 0x459   : > { %v2864_v29 = vmax.f32 %v2789_v22, 0.0 }
 0x45a   : > { %v2427_v57 = vpop.f32.mrf.mxu3 }
 0x45b   : > { %3101 = vst [vmem:[%s5798_s12 + $0x18] sm:$0xff] %v2864_v29  ;;  %v2428_v10 = vadd.f32 %v2427_v57, %v2339_v16  ;;  %v2894_v55 = vpack.c.bf16 %v2864_v29, %v2863_v32  ;;  %v6203_v32 = vld [vmem:[#allocation36_spill] sm:$0xff]  ;;  %v2353_v29 = vpop.f32.mrf.mxu2  ;;  %v2713_v57 = vadd.f32 %v5789_v44, %v5806_v11 }
 0x45c   : > { %v2347_v58 = vadd.f32 %v2346_v34, %v6203_v32 }
 0x45d   : > { %v2498_v21 = vmax.f32 %v2428_v10, 0.0  ;;  %2990 = vmatmul.bf16.gmra.mxu2 %v2894_v55  ;;  %v5848_v55 = vpop.f32.mrf.mxu0 }
 0x45e   : > { %v2791_v0 = vpop.f32.mrf.mxu1 }
 0x45f   : > { %v2540_v17 = vpack.c.bf16 %v2498_v21, %v2496_v18  ;;  %v2792_v23 = vadd.f32 %v2791_v0, %v2703_v41 }
 0x461   : > { %v2865_v59 = vmax.f32 %v2792_v23, 0.0  ;;  %2830 = vmatmul.bf16.gmra.mxu1 %v2540_v17  ;;  %v2176_v17 = vadd.f32 %v5693_v8, %v5499_v28  ;;  %v2715_v23 = vadd.f32 %v5789_v44, %v5815_v36 }
 0x462   : > { %v2430_v30 = vpop.f32.mrf.mxu3 }
 0x463   : > { %3102 = vst [vmem:[%s5798_s12 + $0x20] sm:$0xff] %v2865_v59  ;;  %v2431_v39 = vadd.f32 %v2430_v30, %v2342_v53 }
 0x465   : > { %v2500_v54 = vmax.f32 %v2431_v39, 0.0  ;;  %v2727_v53 = vpop.f32.mrf.mxu0  ;;  %v2718_v39 = vadd.f32 %v5789_v44, %v5822_v60 }
 0x466   : > { %v2793_v51 = vpop.f32.mrf.mxu1 }
 0x467   : > { %v2794_v37 = vadd.f32 %v2793_v51, %v2705_v12  ;;  %v2265_v12 = vadd.f32 %v6206_v2, %v2176_v17  ;;  %v2356_v51 = vpop.f32.mrf.mxu2 }
 0x469   : > { %v2866_v38 = vmax.f32 %v2794_v37, 0.0  ;;  %v2354_v14 = vadd.f32 %v2353_v29, %v2265_v12 }
 0x46a   : > { %v2432_v13 = vpop.f32.mrf.mxu3 }
 0x46b   : > { %3103 = vst [vmem:[%s5798_s12 + $0x28] sm:$0xff] %v2866_v38  ;;  %v2433_v24 = vadd.f32 %v2432_v13, %v2344_v49  ;;  %v2895_v63 = vpack.c.bf16 %v2866_v38, %v2865_v59  ;;  %v6205_v59 = vld [vmem:[#allocation40_spill] sm:$0xff] }
 0x46c   : > { %v2352_v30 = vadd.f32 %v2351_v31, %v6205_v59 }
 0x46d   : > { %v2502_v45 = vmax.f32 %v2433_v24, 0.0  ;;  %2995 = vmatmul.bf16.gmra.mxu2 %v2895_v63 }
 0x46e   : > { %v2796_v61 = vpop.f32.mrf.mxu1 }
 0x46f   : > { %v2542_v62 = vpack.c.bf16 %v2502_v45, %v2500_v54  ;;  %v2797_v43 = vadd.f32 %v2796_v61, %v2708_v47  ;;  %v2358_v47 = vpop.f32.mrf.mxu2  ;;  %v2729_v45 = vpop.f32.mrf.mxu0 }
 0x471   : > { %v2867_v35 = vmax.f32 %v2797_v43, 0.0  ;;  %2835 = vmatmul.bf16.gmra.mxu1 %v2542_v62  ;;  %v6207_v62 = vld [vmem:[#allocation43_spill] sm:$0xff] }
 0x472   : > { %v2435_v9 = vpop.f32.mrf.mxu3  ;;  %v2181_v43 = vadd.f32 %v6207_v62, %v5499_v28 }
 0x473   : > { %3104 = vst [vmem:[%s5798_s12 + $0x30] sm:$0xff] %v2867_v35  ;;  %v2436_v56 = vadd.f32 %v2435_v9, %v2347_v58  ;;  %v6208_v9 = vld [vmem:[#allocation42_spill] sm:$0xff] }
 0x474   : > { %v2357_v50 = vadd.f32 %v2356_v51, %v6208_v9  ;;  %v2270_v31 = vadd.f32 %v6209_v15, %v2181_v43  ;;  %v5890_v43 = vld [vmem:[%s6054_s8] ss:$0 sm:$0xff] }
 0x475   : > { %v2504_v10 = vmax.f32 %v2436_v56, 0.0 }
 0x476   : > { %v2798_v42 = vpop.f32.mrf.mxu1 }
 0x477   : > { %v2799_v1 = vadd.f32 %v2798_v42, %v2710_v5  ;;  %v2359_v42 = vadd.f32 %v2358_v47, %v2270_v31  ;;  %v2361_v19 = vpop.f32.mrf.mxu2  ;;  %v2732_v56 = vpop.f32.mrf.mxu0 }
 0x479   : > { %v2868_v7 = vmax.f32 %v2799_v1, 0.0 }
 0x47a   : > { %v2437_v22 = vpop.f32.mrf.mxu3 }
 0x47b   : > { %3105 = vst [vmem:[%s5798_s12 + $0x38] sm:$0xff] %v2868_v7  ;;  %v2438_v16 = vadd.f32 %v2437_v22, %v2349_v25  ;;  %v2896_v26 = vpack.c.bf16 %v2868_v7, %v2867_v35  ;;  %v2720_v35 = vadd.f32 %v5789_v44, %v5831_v4  ;;  %v2723_v7 = vadd.f32 %v5789_v44, %v5839_v48 }
 0x47d   : > { %v2506_v52 = vmax.f32 %v2438_v16, 0.0  ;;  %3000 = vmatmul.bf16.gmra.mxu2 %v2896_v26 }
 0x47e   : > { %v2801_v41 = vpop.f32.mrf.mxu1 }
 0x47f   : > { %v2544_v18 = vpack.c.bf16 %v2506_v52, %v2504_v10  ;;  %v2802_v21 = vadd.f32 %v2801_v41, %v2713_v57  ;;  %v2186_v52 = vadd.f32 %v5730_v27, %v5499_v28  ;;  %v2363_v41 = vpop.f32.mrf.mxu2  ;;  %v2728_v27 = vadd.f32 %v5789_v44, %v2727_v53 }
 0x481   : > { %v2869_v0 = vmax.f32 %v2802_v21, 0.0  ;;  %2840 = vmatmul.bf16.gmra.mxu1 %v2544_v18  ;;  %v2725_v18 = vadd.f32 %v5789_v44, %v5848_v55  ;;  %v2734_v21 = vpop.f32.mrf.mxu0 }
 0x482   : > { %v2440_v34 = vpop.f32.mrf.mxu3 }
 0x483   : > { %3106 = vst [vmem:[%s5798_s12 + $0x40] sm:$0xff] %v2869_v0  ;;  %v2441_v40 = vadd.f32 %v2440_v34, %v2352_v30  ;;  %v2275_v34 = vadd.f32 %v5782_v33, %v2186_v52 }
 0x485   : > { %v2508_v36 = vmax.f32 %v2441_v40, 0.0  ;;  %v2730_v40 = vadd.f32 %v5789_v44, %v2729_v45 }
 0x486   : > { %v2803_v11 = vpop.f32.mrf.mxu1 }
 0x487   : > { %v2804_v20 = vadd.f32 %v2803_v11, %v2715_v23  ;;  %v2364_v23 = vadd.f32 %v2363_v41, %v2275_v34 }
 0x489   : > { %v2870_v37 = vmax.f32 %v2804_v20, 0.0 }
 0x48a   : > { %v2442_v49 = vpop.f32.mrf.mxu3 }
 0x48b   : > { %v2897_v46 = vpack.c.bf16 %v2870_v37, %v2869_v0  ;;  %3107 = vst [vmem:[%s5798_s12 + $0x48] sm:$0xff] %v2870_v37  ;;  %v2443_v8 = vadd.f32 %v2442_v49, %v2354_v14  ;;  %v2362_v0 = vadd.f32 %v2361_v19, %v5712_v3  ;;  %v2737_v14 = vpop.f32.mrf.mxu0 }
 0x48c   : > { %v2738_v62 = vadd.f32 %v5789_v44, %v2737_v14 }
 0x48d   : > { %v2510_v38 = vmax.f32 %v2443_v8, 0.0  ;;  %3005 = vmatmul.bf16.gmra.mxu2 %v2897_v46 }
 0x48e   : > { %v2806_v13 = vpop.f32.mrf.mxu1 }
 0x48f   : > { %v2546_v24 = vpack.c.bf16 %v2510_v38, %v2508_v36  ;;  %v2807_v63 = vadd.f32 %v2806_v13, %v2718_v39  ;;  %v2733_v39 = vadd.f32 %v5789_v44, %v2732_v56 }
 0x491   : > { %v2871_v54 = vmax.f32 %v2807_v63, 0.0  ;;  %2845 = vmatmul.bf16.gmra.mxu1 %v2546_v24  ;;  %v2735_v63 = vadd.f32 %v5789_v44, %v2734_v21 }
 0x492   : > { %v2445_v61 = vpop.f32.mrf.mxu3 }
 0x493   : > { %3108 = vst [vmem:[%s5798_s12 + $0x50] sm:$0xff] %v2871_v54  ;;  %v2446_v32 = vadd.f32 %v2445_v61, %v2357_v50  ;;  %v2739_v8 = vpop.f32.mrf.mxu0 }
 0x495   : > { %v2512_v4 = vmax.f32 %v2446_v32, 0.0 }
 0x496   : > { %v2808_v60 = vpop.f32.mrf.mxu1 }
 0x497   : > { %v2809_v5 = vadd.f32 %v2808_v60, %v2720_v35 }
 0x499   : > { %v2872_v58 = vmax.f32 %v2809_v5, 0.0  ;;  %v2740_v5 = vadd.f32 %v5789_v44, %v2739_v8 }
 0x49a   : > { %v2447_v6 = vpop.f32.mrf.mxu3 }
 0x49b   : > { %v2898_v1 = vpack.c.bf16 %v2872_v58, %v2871_v54  ;;  %3109 = vst [vmem:[%s5798_s12 + $0x58] sm:$0xff] %v2872_v58  ;;  %v2448_v25 = vadd.f32 %v2447_v6, %v2359_v42  ;;  %v2742_v24 = vpop.f32.mrf.mxu0 }
 0x49c   : > { %v2743_v56 = vadd.f32 %v5789_v44, %v2742_v24 }
 0x49d   : > { %v2514_v22 = vmax.f32 %v2448_v25, 0.0  ;;  %3010 = vmatmul.bf16.gmra.mxu2 %v2898_v1 }
 0x49e   : > { %v2811_v16 = vpop.f32.mrf.mxu1 }
 0x49f   : > { %v2548_v26 = vpack.c.bf16 %v2514_v22, %v2512_v4  ;;  %v2812_v29 = vadd.f32 %v2811_v16, %v2723_v7 }
 0x4a1   : > { %v2873_v57 = vmax.f32 %v2812_v29, 0.0  ;;  %2850 = vmatmul.bf16.gmra.mxu1 %v2548_v26 }
 0x4a2   : > { %v2450_v10 = vpop.f32.mrf.mxu3 }
 0x4a3   : > { %3110 = vst [vmem:[%s5798_s12 + $0x60] sm:$0xff] %v2873_v57  ;;  %v2451_v11 = vadd.f32 %v2450_v10, %v2362_v0  ;;  %v2744_v35 = vpop.f32.mrf.mxu0 }
 0x4a5   : > { %v2516_v12 = vmax.f32 %v2451_v11, 0.0 }
 0x4a6   : > { %v2813_v48 = vpop.f32.mrf.mxu1 }
 0x4a7   : > { %v2814_v17 = vadd.f32 %v2813_v48, %v2725_v18 }
 0x4a9   : > { %v2874_v59 = vmax.f32 %v2814_v17, 0.0 }
 0x4aa   : > { %v2452_v30 = vpop.f32.mrf.mxu3 }
 0x4ab   : > { %v2899_v2 = vpack.c.bf16 %v2874_v59, %v2873_v57  ;;  %3111 = vst [vmem:[%s5798_s12 + $0x68] sm:$0xff] %v2874_v59  ;;  %v2453_v28 = vadd.f32 %v2452_v30, %v2364_v23  ;;  %v2747_v58 = vpop.f32.mrf.mxu0  ;;  %v2745_v57 = vadd.f32 %v5789_v44, %v2744_v35 }
 0x4ac   : > { %v2748_v34 = vadd.f32 %v5789_v44, %v2747_v58 }
 0x4ad   : > { %v2518_v55 = vmax.f32 %v2453_v28, 0.0  ;;  %3015 = vmatmul.bf16.gmra.mxu2 %v2899_v2 }
 0x4ae   : > { %v2816_v51 = vpop.f32.mrf.mxu1 }
 0x4af   : > { %v2550_v20 = vpack.c.bf16 %v2518_v55, %v2516_v12  ;;  %v2817_v3 = vadd.f32 %v2816_v51, %v2728_v27 }
 0x4b1   : > { %v2875_v33 = vmax.f32 %v2817_v3, 0.0  ;;  %2855 = vmatmul.bf16.gmra.mxu1 %v2550_v20 }
 0x4b3   : > { %3112 = vst [vmem:[%s5798_s12 + $0x70] sm:$0xff] %v2875_v33  ;;  %v2749_v29 = vpop.f32.mrf.mxu0 }
 0x4b4   : > { %v2750_v2 = vadd.f32 %v5789_v44, %v2749_v29 }
 0x4b6   : > { %v2818_v37 = vpop.f32.mrf.mxu1 }
 0x4b7   : > { %v2819_v49 = vadd.f32 %v2818_v37, %v2730_v40 }
 0x4b9   : > { %v2876_v46 = vmax.f32 %v2819_v49, 0.0 }
 0x4bb   : > { %v2900_v53 = vpack.c.bf16 %v2876_v46, %v2875_v33  ;;  %3113 = vst [vmem:[%s5798_s12 + $0x78] sm:$0xff] %v2876_v46  ;;  %v2752_v0 = vpop.f32.mrf.mxu0 }
 0x4bc   : > { %v2753_v14 = vadd.f32 %v5789_v44, %v2752_v0 }
 0x4bd   : > { %3020 = vmatmul.bf16.gmra.mxu2 %v2900_v53 }
 0x4be   : > { %v2821_v36 = vpop.f32.mrf.mxu1 }
 0x4bf   : > { %v2822_v38 = vadd.f32 %v2821_v36, %v2733_v39 }
 0x4c1   : > { %v2877_v13 = vmax.f32 %v2822_v38, 0.0 }
 0x4c3   : > { %3114 = vst [vmem:[%s5798_s12 + $0x80] sm:$0xff] %v2877_v13  ;;  %v2754_v28 = vpop.f32.mrf.mxu0 }
 0x4c4   : > { %v2755_v53 = vadd.f32 %v5789_v44, %v2754_v28 }
 0x4c6   : > { %v2823_v47 = vpop.f32.mrf.mxu1 }
 0x4c7   : > { %v2824_v54 = vadd.f32 %v2823_v47, %v2735_v63 }
 0x4c9   : > { %v2878_v45 = vmax.f32 %v2824_v54, 0.0 }
 0x4cb   : > { %v2901_v61 = vpack.c.bf16 %v2878_v45, %v2877_v13  ;;  %3115 = vst [vmem:[%s5798_s12 + $0x88] sm:$0xff] %v2878_v45  ;;  %v2757_v37 = vpop.f32.mrf.mxu0 }
 0x4cc   : > { %v2758_v54 = vadd.f32 %v5789_v44, %v2757_v37 }
 0x4cd   : > { %3025 = vmatmul.bf16.gmra.mxu2 %v2901_v61 }
 0x4ce   : > { %v2826_v60 = vpop.f32.mrf.mxu1 }
 0x4cf   : > { %v2827_v9 = vadd.f32 %v2826_v60, %v2738_v62 }
 0x4d0   : > { %v2986_v50 = vpop.f32.mrf.mxu2 }
 0x4d1   : > { %v2879_v15 = vmax.f32 %v2827_v9, 0.0  ;;  %v2987_v31 = vadd.f32 %v5890_v43, %v2986_v50 }
 0x4d3   : > { %3116 = vst [vmem:[%s5798_s12 + $0x90] sm:$0xff] %v2879_v15  ;;  %v2759_v63 = vpop.f32.mrf.mxu0 }
 0x4d4   : > { %3066 = vst [vmem:[%s5896_s25] sm:$0xff] %v2987_v31  ;;  %v2760_v50 = vadd.f32 %v5789_v44, %v2759_v63 }
 0x4d6   : > { %v2828_v42 = vpop.f32.mrf.mxu1 }
 0x4d7   : > { %v2829_v32 = vadd.f32 %v2828_v42, %v2740_v5 }
 0x4d8   : > { %v2988_v6 = vpop.f32.mrf.mxu2 }
 0x4d9   : > { %v2880_v19 = vmax.f32 %v2829_v32, 0.0  ;;  %v2989_v1 = vadd.f32 %v5890_v43, %v2988_v6 }
 0x4db   : > { %v2902_v25 = vpack.c.bf16 %v2880_v19, %v2879_v15  ;;  %3117 = vst [vmem:[%s5798_s12 + $0x98] sm:$0xff] %v2880_v19  ;;  %v2762_v9 = vpop.f32.mrf.mxu0 }
 0x4dc   : > { %3067 = vst [vmem:[%s5896_s25 + $0x8] sm:$0xff] %v2989_v1  ;;  %v2763_v6 = vadd.f32 %v5789_v44, %v2762_v9 }
 0x4dd   : > { %3030 = vmatmul.bf16.gmra.mxu2 %v2902_v25 }
 0x4de   : > { %v2831_v7 = vpop.f32.mrf.mxu1 }
 0x4df   : > { %v2832_v4 = vadd.f32 %v2831_v7, %v2743_v56 }
 0x4e0   : > { %v2991_v22 = vpop.f32.mrf.mxu2 }
 0x4e1   : > { %v2881_v16 = vmax.f32 %v2832_v4, 0.0  ;;  %v2992_v26 = vadd.f32 %v5890_v43, %v2991_v22 }
 0x4e3   : > { %3118 = vst [vmem:[%s5798_s12 + $0xa0] sm:$0xff] %v2881_v16  ;;  %v2764_v19 = vpop.f32.mrf.mxu0 }
 0x4e4   : > { %3068 = vst [vmem:[%s5896_s25 + $0x10] sm:$0xff] %v2992_v26  ;;  %v2765_v22 = vadd.f32 %v5789_v44, %v2764_v19 }
 0x4e6   : > { %v2833_v10 = vpop.f32.mrf.mxu1 }
 0x4e7   : > { %v2834_v52 = vadd.f32 %v2833_v10, %v2745_v57 }
 0x4e8   : > { %v2993_v41 = vpop.f32.mrf.mxu2 }
 0x4e9   : > { %v2882_v18 = vmax.f32 %v2834_v52, 0.0  ;;  %v2994_v21 = vadd.f32 %v5890_v43, %v2993_v41 }
 0x4eb   : > { %v2903_v48 = vpack.c.bf16 %v2882_v18, %v2881_v16  ;;  %3119 = vst [vmem:[%s5798_s12 + $0xa8] sm:$0xff] %v2882_v18  ;;  %v2767_v29 = vpop.f32.mrf.mxu0 }
 0x4ec   : > { %3069 = vst [vmem:[%s5896_s25 + $0x18] sm:$0xff] %v2994_v21  ;;  %v2768_v18 = vadd.f32 %v5789_v44, %v2767_v29 }
 0x4ed   : > { %3035 = vmatmul.bf16.gmra.mxu2 %v2903_v48 }
 0x4ee   : > { %v2836_v17 = vpop.f32.mrf.mxu1 }
 0x4ef   : > { %v2837_v23 = vadd.f32 %v2836_v17, %v2748_v34 }
 0x4f0   : > { %v2996_v11 = vpop.f32.mrf.mxu2 }
 0x4f1   : > { %v2883_v59 = vmax.f32 %v2837_v23, 0.0  ;;  %v2997_v30 = vadd.f32 %v5890_v43, %v2996_v11 }
 0x4f3   : > { %3120 = vst [vmem:[%s5798_s12 + $0xb0] sm:$0xff] %v2883_v59  ;;  %v2769_v23 = vpop.f32.mrf.mxu0 }
 0x4f4   : > { %3070 = vst [vmem:[%s5896_s25 + $0x20] sm:$0xff] %v2997_v30  ;;  %v2770_v11 = vadd.f32 %v5789_v44, %v2769_v23 }
 0x4f6   : > { %v2838_v27 = vpop.f32.mrf.mxu1 }
 0x4f7   : > { %v2839_v12 = vadd.f32 %v2838_v27, %v2750_v2 }
 0x4f8   : > { %v2998_v55 = vpop.f32.mrf.mxu2 }
 0x4f9   : > { %v2884_v51 = vmax.f32 %v2839_v12, 0.0  ;;  %v2999_v20 = vadd.f32 %v5890_v43, %v2998_v55 }
 0x4fb   : > { %v2904_v3 = vpack.c.bf16 %v2884_v51, %v2883_v59  ;;  %3121 = vst [vmem:[%s5798_s12 + $0xb8] sm:$0xff] %v2884_v51 }
 0x4fc   : > { %3071 = vst [vmem:[%s5896_s25 + $0x28] sm:$0xff] %v2999_v20 }
 0x4fd   : > { %3040 = vmatmul.bf16.gmra.mxu2 %v2904_v3 }
 0x4fe   : > { %v2841_v33 = vpop.f32.mrf.mxu1 }
 0x4ff   : > { %v2842_v40 = vadd.f32 %v2841_v33, %v2753_v14 }
 0x500   : > { %v3001_v49 = vpop.f32.mrf.mxu2 }
 0x501   : > { %v2885_v46 = vmax.f32 %v2842_v40, 0.0  ;;  %v3002_v8 = vadd.f32 %v5890_v43, %v3001_v49 }
 0x503   : > { %3122 = vst [vmem:[%s5798_s12 + $0xc0] sm:$0xff] %v2885_v46 }
 0x504   : > { %3072 = vst [vmem:[%s5896_s25 + $0x30] sm:$0xff] %v3002_v8 }
 0x506   : > { %v2843_v39 = vpop.f32.mrf.mxu1 }
 0x507   : > { %v2844_v36 = vadd.f32 %v2843_v39, %v2755_v53 }
 0x508   : > { %v3003_v38 = vpop.f32.mrf.mxu2 }
 0x509   : > { %v2886_v13 = vmax.f32 %v2844_v36, 0.0  ;;  %v3004_v24 = vadd.f32 %v5890_v43, %v3003_v38 }
 0x50b   : > { %v2905_v47 = vpack.c.bf16 %v2886_v13, %v2885_v46  ;;  %3123 = vst [vmem:[%s5798_s12 + $0xc8] sm:$0xff] %v2886_v13 }
 0x50c   : > { %3073 = vst [vmem:[%s5896_s25 + $0x38] sm:$0xff] %v3004_v24 }
 0x50d   : > { %3045 = vmatmul.bf16.gmra.mxu2 %v2905_v47 }
 0x50e   : > { %v2846_v45 = vpop.f32.mrf.mxu1 }
 0x50f   : > { %v2847_v61 = vadd.f32 %v2846_v45, %v2758_v54 }
 0x510   : > { %v3006_v62 = vpop.f32.mrf.mxu2 }
 0x511   : > { %v2887_v35 = vmax.f32 %v2847_v61, 0.0  ;;  %v3007_v60 = vadd.f32 %v5890_v43, %v3006_v62 }
 0x513   : > { %3124 = vst [vmem:[%s5798_s12 + $0xd0] sm:$0xff] %v2887_v35 }
 0x514   : > { %3074 = vst [vmem:[%s5896_s25 + $0x40] sm:$0xff] %v3007_v60 }
 0x516   : > { %v2848_v15 = vpop.f32.mrf.mxu1 }
 0x517   : > { %v2849_v31 = vadd.f32 %v2848_v15, %v2760_v50 }
 0x518   : > { %v3008_v5 = vpop.f32.mrf.mxu2 }
 0x519   : > { %v2888_v42 = vmax.f32 %v2849_v31, 0.0  ;;  %v3009_v32 = vadd.f32 %v5890_v43, %v3008_v5 }
 0x51b   : > { %v2906_v58 = vpack.c.bf16 %v2888_v42, %v2887_v35  ;;  %3125 = vst [vmem:[%s5798_s12 + $0xd8] sm:$0xff] %v2888_v42 }
 0x51c   : > { %3075 = vst [vmem:[%s5896_s25 + $0x48] sm:$0xff] %v3009_v32 }
 0x51d   : > { %3050 = vmatmul.bf16.gmra.mxu2 %v2906_v58 }
 0x51e   : > { %v2851_v1 = vpop.f32.mrf.mxu1 }
 0x51f   : > { %v2852_v25 = vadd.f32 %v2851_v1, %v2763_v6 }
 0x520   : > { %v3011_v56 = vpop.f32.mrf.mxu2 }
 0x521   : > { %v2889_v7 = vmax.f32 %v2852_v25, 0.0  ;;  %v3012_v4 = vadd.f32 %v5890_v43, %v3011_v56 }
 0x523   : > { %3126 = vst [vmem:[%s5798_s12 + $0xe0] sm:$0xff] %v2889_v7 }
 0x524   : > { %3076 = vst [vmem:[%s5896_s25 + $0x50] sm:$0xff] %v3012_v4 }
 0x526   : > { %v2853_v16 = vpop.f32.mrf.mxu1 }
 0x527   : > { %v2854_v26 = vadd.f32 %v2853_v16, %v2765_v22 }
 0x528   : > { %v3013_v57 = vpop.f32.mrf.mxu2 }
 0x529   : > { %v2890_v10 = vmax.f32 %v2854_v26, 0.0  ;;  %v3014_v52 = vadd.f32 %v5890_v43, %v3013_v57 }
 0x52b   : > { %v2907_v41 = vpack.c.bf16 %v2890_v10, %v2889_v7  ;;  %3127 = vst [vmem:[%s5798_s12 + $0xe8] sm:$0xff] %v2890_v10 }
 0x52c   : > { %3077 = vst [vmem:[%s5896_s25 + $0x58] sm:$0xff] %v3014_v52 }
 0x52d   : > { %3055 = vmatmul.bf16.gmra.mxu2 %v2907_v41 }
 0x52e   : > { %v2856_v21 = vpop.f32.mrf.mxu1 }
 0x52f   : > { %v2857_v48 = vadd.f32 %v2856_v21, %v2768_v18 }
 0x530   : > { %v3016_v0 = vpop.f32.mrf.mxu2 }
 0x531   : > { %v2891_v34 = vmax.f32 %v2857_v48, 0.0  ;;  %v3017_v17 = vadd.f32 %v5890_v43, %v3016_v0 }
 0x533   : > { %3128 = vst [vmem:[%s5798_s12 + $0xf0] sm:$0xff] %v2891_v34 }
 0x534   : > { %3078 = vst [vmem:[%s5896_s25 + $0x60] sm:$0xff] %v3017_v17 }
 0x536   : > { %v2858_v59 = vpop.f32.mrf.mxu1 }
 0x537   : > { %v2859_v30 = vadd.f32 %v2858_v59, %v2770_v11 }
 0x538   : > { %v3018_v2 = vpop.f32.mrf.mxu2 }
 0x539   : > { %v2892_v28 = vmax.f32 %v2859_v30, 0.0  ;;  %v3019_v27 = vadd.f32 %v5890_v43, %v3018_v2 }
 0x53b   : > { %v2908_v12 = vpack.c.bf16 %v2892_v28, %v2891_v34  ;;  %3129 = vst [vmem:[%s5798_s12 + $0xf8] sm:$0xff] %v2892_v28 }
 0x53c   : > { %3079 = vst [vmem:[%s5896_s25 + $0x68] sm:$0xff] %v3019_v27 }
 0x53d   : > { %3060 = vmatmul.bf16.gmra.mxu2 %v2908_v12 }
 0x540   : > { %v3021_v55 = vpop.f32.mrf.mxu2 }
 0x541   : > { %v3022_v51 = vadd.f32 %v5890_v43, %v3021_v55 }
 0x543   : > { %3080 = vst [vmem:[%s5896_s25 + $0x70] sm:$0xff] %v3022_v51 }
 0x548   : > { %v3023_v20 = vpop.f32.mrf.mxu2 }
 0x549   : > { %v3024_v44 = vadd.f32 %v5890_v43, %v3023_v20 }
 0x54b   : > { %3081 = vst [vmem:[%s5896_s25 + $0x78] sm:$0xff] %v3024_v44 }
 0x550   : > { %v3026_v3 = vpop.f32.mrf.mxu2 }
 0x551   : > { %v3027_v14 = vadd.f32 %v5890_v43, %v3026_v3 }
 0x552   : > { %4381 = shalt.err (!%p4378_p9)
}
 0x553   : > { %s4477_s11 = smov 128   ;;  %s4478_s21 = smov 8   ;;  %3082 = vst [vmem:[%s5896_s25 + $0x80] sm:$0xff] %v3027_v14 }
 0x554   : > { %4080 = dma.vmem_to_hbm [thread:$0]  (%p4626_p13), %s3166_s29, 4096, %s3168_s30, %s3136_s27, %s4477_s11, %s4477_s11, %s4478_s21  }
 0x555   : > { %s3147_s27 = scalar_lea.hbm %s6055_s9, %s4031_s2  ;;  %s3148_s24 = sshll.u32 %s5896_s25, 4  ;;  %s3149_s24 = int_to_ptr.vmem [resolvable:$true] %s3148_s24 }
 0x556   : > { %s3150_s18 = sshll.u32 %s3147_s27, 4  ;;  %s3131_s1 = scalar_lea.sflag [#allocation4], %s4660_s3  ;;  %s3151_s18 = int_to_ptr.hbm [resolvable:$true] %s3150_s18 }
 0x557   : > { %s4396_s17 = sshra.s32 %s3151_s18, 4  ;;  %s4402_s2 = scalar_lea.hbm %s6055_s9, 512  ;;  %s4397_s17 = int_to_ptr.hbm [resolvable:$true] %s4396_s17 }
 0x558   : > { %v3028_v33 = vpop.f32.mrf.mxu2  ;;  %s4398_s23 = scalar_lea.hbm %s4397_s17, 256  ;;  %p4403_p2 = scmp.lt.s32.totalorder %s4397_s17, %s6055_s9 }
 0x559   : > { %v3029_v40 = vadd.f32 %v5890_v43, %v3028_v33  ;;  %p4399_p10 = scmp.ne.s32.totalorder %s4397_s17, %s4398_s23  ;;  %p4404_p6 = scmp.lt.s32.totalorder %s4402_s2, %s4398_s23 }
 0x55b   : > { %3083 = vst [vmem:[%s5896_s25 + $0x88] sm:$0xff] %v3029_v40  ;;  %p4400_p11 = pnand %p4399_p10, %p4626_p13  ;;  %p4405_p1 = por %p4404_p6, %p4403_p2 }
 0x55d   : > { %p4401_p0 = pneg %p4400_p11 }
 0x55f   : > { %p4406_p3 = pnand %p4405_p1, %p4401_p0 }
 0x560   : > { %v3031_v37 = vpop.f32.mrf.mxu2 }
 0x561   : > { %v3032_v49 = vadd.f32 %v5890_v43, %v3031_v37 }
 0x563   : > { %3084 = vst [vmem:[%s5896_s25 + $0x90] sm:$0xff] %v3032_v49 }
 0x568   : > { %v3033_v46 = vpop.f32.mrf.mxu2 }
 0x569   : > { %v3034_v8 = vadd.f32 %v5890_v43, %v3033_v46 }
 0x56b   : > { %3085 = vst [vmem:[%s5896_s25 + $0x98] sm:$0xff] %v3034_v8 }
 0x570   : > { %v3036_v53 = vpop.f32.mrf.mxu2 }
 0x571   : > { %v3037_v39 = vadd.f32 %v5890_v43, %v3036_v53 }
 0x573   : > { %3086 = vst [vmem:[%s5896_s25 + $0xa0] sm:$0xff] %v3037_v39 }
 0x578   : > { %v3038_v36 = vpop.f32.mrf.mxu2 }
 0x579   : > { %v3039_v38 = vadd.f32 %v5890_v43, %v3038_v36 }
 0x57b   : > { %3087 = vst [vmem:[%s5896_s25 + $0xa8] sm:$0xff] %v3039_v38 }
 0x580   : > { %v3041_v13 = vpop.f32.mrf.mxu2 }
 0x581   : > { %v3042_v24 = vadd.f32 %v5890_v43, %v3041_v13 }
 0x583   : > { %3088 = vst [vmem:[%s5896_s25 + $0xb0] sm:$0xff] %v3042_v24 }
 0x588   : > { %v3043_v63 = vpop.f32.mrf.mxu2 }
 0x589   : > { %v3044_v47 = vadd.f32 %v5890_v43, %v3043_v63 }
 0x58b   : > { %3089 = vst [vmem:[%s5896_s25 + $0xb8] sm:$0xff] %v3044_v47 }
 0x590   : > { %v3046_v54 = vpop.f32.mrf.mxu2 }
 0x591   : > { %v3047_v45 = vadd.f32 %v5890_v43, %v3046_v54 }
 0x593   : > { %3090 = vst [vmem:[%s5896_s25 + $0xc0] sm:$0xff] %v3047_v45 }
 0x598   : > { %v3048_v61 = vpop.f32.mrf.mxu2 }
 0x599   : > { %v3049_v62 = vadd.f32 %v5890_v43, %v3048_v61 }
 0x59b   : > { %3091 = vst [vmem:[%s5896_s25 + $0xc8] sm:$0xff] %v3049_v62 }
 0x5a0   : > { %v3051_v35 = vpop.f32.mrf.mxu2 }
 0x5a1   : > { %v3052_v60 = vadd.f32 %v5890_v43, %v3051_v35 }
 0x5a3   : > { %3092 = vst [vmem:[%s5896_s25 + $0xd0] sm:$0xff] %v3052_v60 }
 0x5a8   : > { %v3053_v9 = vpop.f32.mrf.mxu2 }
 0x5a9   : > { %v3054_v50 = vadd.f32 %v5890_v43, %v3053_v9 }
 0x5ab   : > { %3093 = vst [vmem:[%s5896_s25 + $0xd8] sm:$0xff] %v3054_v50 }
 0x5b0   : > { %v3056_v15 = vpop.f32.mrf.mxu2 }
 0x5b1   : > { %v3057_v31 = vadd.f32 %v5890_v43, %v3056_v15 }
 0x5b3   : > { %3094 = vst [vmem:[%s5896_s25 + $0xe0] sm:$0xff] %v3057_v31 }
 0x5b8   : > { %v3058_v5 = vpop.f32.mrf.mxu2 }
 0x5b9   : > { %v3059_v42 = vadd.f32 %v5890_v43, %v3058_v5 }
 0x5bb   : > { %3095 = vst [vmem:[%s5896_s25 + $0xe8] sm:$0xff] %v3059_v42 }
 0x5c0   : > { %v3061_v32 = vpop.f32.mrf.mxu2 }
 0x5c1   : > { %v3062_v58 = vadd.f32 %v5890_v43, %v3061_v32 }
 0x5c3   : > { %3096 = vst [vmem:[%s5896_s25 + $0xf0] sm:$0xff] %v3062_v58 }
 0x5c8   : > { %v3063_v6 = vpop.f32.mrf.mxu2 }
 0x5c9   : > { %v3064_v19 = vadd.f32 %v5890_v43, %v3063_v6 }
 0x5cb   : > { %3097 = vst [vmem:[%s5896_s25 + $0xf8] sm:$0xff] %v3064_v19 }
 0x5cc   : > { %4409 = shalt.err (!%p4406_p3)
}
 0x5cd   : > { %4079 = dma.vmem_to_hbm [thread:$0]  (%p4626_p13), %s3149_s24, 4096, %s3151_s18, %s3131_s1, %s4477_s11, %s4477_s11, %s4478_s21  }
 0x5ce PF: > { %s3182_s3 = sand.u32 1, %s4452_s13   ;;  %p6210_p5 = scmp.ge.s32.totalorder %s4464_s16, 2 }
 0x5cf   : > { %s3183_s25 = scalar_lea.sflag [#allocation4], %s3182_s3 }
 0x5d0   : > { %p4104_p12 = pnand %p6210_p5, %p4631_p4 }
 0x5d2   : > { %p4105_p8 = pneg %p4104_p12 }
 0x5d4   : > { %4443 = dma.done.wait (%p4105_p8), %s3183_s25, 4096  }
 0x5d5   : > { %4445 = vsyncadd (%p4105_p8), %s3183_s25, 4294963200  ;;  %s3193_s30 = scalar_lea.sflag [#allocation15], %s3182_s3 }
 0x5d6   : > { %4447 = dma.done.wait (%p4105_p8), %s3193_s30, 4096  }
 0x5d7   : > { %4449 = vsyncadd (%p4105_p8), %s3193_s30, 4294963200  ;;  %p30_p13 = scmp.ge.s32.totalorder %s4606_s22, 4   ;;  %s6211_s13 = smov %s4456_s14 }
 0x5d8   : > { %s6212_s14 = smov %s4460_s15  ;;  %s6213_s15 = smov %s4618_s28 }
 0x5d9   : > { %s6214_s16 = smov %s4606_s22  ;;  %32 = sbr.rel (!%p30_p13) target bundleno = 15 (0xf), region = 138 }
 0x5de   :  { %3199 = vsyncpa [#allocation3], 1 }
 0x5df   :  { %3201 = vsyncpa [#allocation3 + $0x1], 1 }
 0x5e0   :  { %3202 = vsyncpa [#allocation6], 1 }
 0x5e1   :  { %3203 = vsyncpa [#allocation9], 1 }
 0x5e2   :  { %3204 = vsyncpa [#allocation12], 1 }
 0x5e3   :  { %3205 = vsyncpa [#allocation4], 1 }
 0x5e4   :  { %3207 = vsyncpa [#allocation4 + $0x1], 1 }
 0x5e5   :  { %3208 = vsyncpa [#allocation15], 1 }
 0x5e6   :  { %3210 = vsyncpa [#allocation15 + $0x1], 1 }

</bundles_post_ra>
